<compile_context>
chip_gen: v7x
topology: tpu7x:2x2x1
jax: 0.10.0
libtpu: 0.0.40
codegen_flags: <defaults>
</compile_context>

<pallas_src>
import jax
import jax.numpy as jnp
from jax.experimental import pallas as pl
from jax.experimental.pallas import tpu as pltpu

D_MODEL = 128           # GRU input_size / bidirectional output size
H = D_MODEL // 2        # per-direction hidden size (64)
NUM_LAYERS = 3
VOCAB = 50
VOCAB_PAD = 128         # embedding table padded to a full lane tile
PAD_ID = 1
B = 2                   # batch  (raise for real workloads: sublanes/MXU rows are mostly empty at B=2)
T = 8                   # sequence length


# -------------------------------------------------------------- fused kernel
def _fused_birnn_kernel(ids_ref, emb_ref, wih_ref, whh_ref, bih_ref, bhhn_ref,
                        wd_ref, bd_ref, msum_ref, out_ref):
    """Whole BiRNN forward in one kernel.

    ids_ref  : [T*B, 1] int32     token ids, time-major (row = t*B + b)
    emb_ref  : [VOCAB_PAD, 128]   bf16 embedding table (rows >= VOCAB are zero)
    wih_ref  : [L, 128, 384]      bf16 input->gates, cols [r_f|r_b|z_f|z_b|n_f|n_b]
    whh_ref  : [L, 128, 384]      bf16 hidden->gates, block-diagonal
    bih_ref  : [L, 1, 384]        f32  (r/z hidden biases folded in)
    bhhn_ref : [L, 1, 128]        f32  n-gate hidden bias [fwd|rev]
    wd_ref   : [128, 1]           f32  dense scorer weight (transposed)
    bd_ref   : [1, 1]             f32  dense scorer bias
    msum_ref : [B, T*B]           f32  per-batch time-sum selection matrix
    out_ref  : [B, 128]           pooled embedding
    """
    TB = T * B
    H2 = 2 * H      # 128
    H4 = 4 * H      # 256

    ids = ids_ref[...]                                          # [TB, 1] int32

    # -------- embedding lookup as a one-hot matmul (table resident in VMEM) --
    vocab_iota = jax.lax.broadcasted_iota(jnp.int32, (TB, VOCAB_PAD), 1)
    onehot = (ids == vocab_iota).astype(jnp.bfloat16)            # [TB, 128]
    x = jnp.dot(onehot, emb_ref[...],
                preferred_element_type=jnp.float32)              # [TB, 128] time-major

    # direction masks (constant, built once)
    col_rz = jax.lax.broadcasted_iota(jnp.int32, (B, H4), 1)
    rev_rz = (col_rz % H2) >= H                                  # reverse-dir r/z cols
    col_h = jax.lax.broadcasted_iota(jnp.int32, (B, H2), 1)
    rev_n = col_h >= H                                           # reverse-dir n cols
    fwd_lane = col_h < H                                         # fwd half of hidden

    # ---------------------------- 3 bidirectional GRU layers (fused dirs) ----
    for layer in range(NUM_LAYERS):
        # hoisted input projection: all timesteps, both directions, one matmul
        gi_all = jnp.dot(x.astype(jnp.bfloat16), wih_ref[layer],
                         preferred_element_type=jnp.float32) + bih_ref[layer]   # [TB,384]

        # recurrent weight: loaded once per layer, split 256 + 128 for the MXU
        whh_l = whh_ref[layer]                                   # [128, 384] bf16
        w_rz = whh_l[:, 0:H4]                                    # [128, 256]
        w_n = whh_l[:, H4:]                                      # [128, 128]
        bhh_n = jnp.broadcast_to(bhhn_ref[layer], (B, H2))       # hoisted broadcast

        # per-step gate inputs with direction fusion, all loop-invariant
        gi_rz_f = [gi_all[t * B:(t + 1) * B, 0:H4] for t in range(T)]
        gi_n_f = [gi_all[t * B:(t + 1) * B, H4:] for t in range(T)]
        gi_rz = [jnp.where(rev_rz, gi_rz_f[T - 1 - t], gi_rz_f[t]) for t in range(T)]
        gi_n = [jnp.where(rev_n, gi_n_f[T - 1 - t], gi_n_f[t]) for t in range(T)]

        h = jnp.zeros((B, H2), jnp.float32)                      # [fwd | rev]
        h_steps = []
        for step in range(T):                                    # fully unrolled
            h_bf = h.astype(jnp.bfloat16)
            gh_rz = jnp.dot(h_bf, w_rz, preferred_element_type=jnp.float32)   # [B,256]
            gh_n = jnp.dot(h_bf, w_n, preferred_element_type=jnp.float32)     # [B,128]
            rz = jax.nn.sigmoid(gi_rz[step] + gh_rz)             # r and z together
            r = rz[:, 0:H2]
            z = rz[:, H2:]
            n = jnp.tanh(gi_n[step] + r * (gh_n + bhh_n))
            h = (1.0 - z) * n + z * h
            h_steps.append(h)

        # layer output stays in vregs: row t = [h_fwd(step t) | h_rev(step T-1-t)]
        x_rows = [jnp.where(fwd_lane, h_steps[t], h_steps[T - 1 - t]) for t in range(T)]
        x = jnp.concatenate(x_rows, axis=0)                      # [TB, 128]

    # ----------------- dense scorer + masked softmax + attention pooling -----
    pad = (ids == PAD_ID).astype(jnp.float32)                    # [TB, 1]
    s = jnp.dot(x, wd_ref[...], preferred_element_type=jnp.float32) \
        + bd_ref[...] - 1.0e10 * pad                             # [TB, 1]

    # Per-batch softmax over time. A single global shift is sufficient for
    # numerical stability (softmax is invariant to per-batch constant shifts).
    m = jnp.max(s, axis=0, keepdims=True)                        # [1, 1]
    e = jnp.exp(s - m)                                           # [TB, 1]
    ex = e * x                                                   # [TB, 128] lane-dense
    denom = jnp.dot(msum_ref[...], e, preferred_element_type=jnp.float32)     # [B, 1]
    pooled = jnp.dot(msum_ref[...], ex, preferred_element_type=jnp.float32)   # [B, 128]
    out_ref[...] = pooled * pl.reciprocal(denom)                 # exact reciprocal


# -------------------------------------------------------------------- wrapper
def birnn_forward(token_ids, kp):
    # time-major token-id column [T*B, 1] (only glue op outside the kernel)
    ids_tm = token_ids.astype(jnp.int32).T.reshape(T * B, 1)
    return pl.pallas_call(
        _fused_birnn_kernel,
        out_shape=jax.ShapeDtypeStruct((B, D_MODEL), jnp.float32),
        in_specs=[pl.BlockSpec(memory_space=pltpu.MemorySpace.VMEM)] * 9,
        out_specs=pl.BlockSpec(memory_space=pltpu.MemorySpace.VMEM),
    )(ids_tm, kp["emb"], kp["wih"], kp["whh"], kp["bih"], kp["bhhn"],
      kp["wd"], kp["bd"], kp["msum"])


# --------------------------------------------------------- parameter handling
def init_params(key):
    """Raw parameters in PyTorch GRU layout ([3H, Din] with gate order r,z,n)."""
    keys = jax.random.split(key, 2 + NUM_LAYERS * 2 * 4)
    ki = iter(keys)
    params = {}
    params["emb"] = jax.random.normal(next(ki), (VOCAB, D_MODEL), jnp.float32) * 0.1

    gru = []
    for _layer in range(NUM_LAYERS):
        din = D_MODEL  # layer 0: 128; later layers: 2*H = 128
        dirs = []
        for _direction in range(2):
            scale = 1.0 / float(H) ** 0.5
            wih = jax.random.uniform(next(ki), (3 * H, din), jnp.float32, -scale, scale)
            whh = jax.random.uniform(next(ki), (3 * H, H), jnp.float32, -scale, scale)
            bih = jax.random.uniform(next(ki), (3 * H,), jnp.float32, -scale, scale)
            bhh = jax.random.uniform(next(ki), (3 * H,), jnp.float32, -scale, scale)
            dirs.append((wih, whh, bih, bhh))
        gru.append(dirs)
    params["gru"] = gru

    k_dw, k_db = jax.random.split(keys[-1])
    sc = 1.0 / float(D_MODEL) ** 0.5
    params["dense_w"] = jax.random.uniform(k_dw, (1, D_MODEL), jnp.float32, -sc, sc)
    params["dense_b"] = jax.random.uniform(k_db, (1,), jnp.float32, -0.1, 0.1)
    return params


def pack_params(params):
    """Repack PyTorch-layout weights into the fused, lane-dense kernel layout."""
    emb_pad = jnp.zeros((VOCAB_PAD, D_MODEL), jnp.float32).at[:VOCAB, :].set(params["emb"])

    zeros_hh = jnp.zeros((H, H), jnp.float32)
    wih_l, whh_l, bih_l, bhhn_l = [], [], [], []

    def g(w, k):  # k-th gate block of a stacked [3H, *] matrix, transposed
        return w[k * H:(k + 1) * H, :].T

    def b(v, k):  # k-th gate block of a stacked [3H] bias
        return v[k * H:(k + 1) * H]

    for layer in range(NUM_LAYERS):
        wih_f, whh_f, bih_f, bhh_f = params["gru"][layer][0]
        wih_b, whh_b, bih_b, bhh_b = params["gru"][layer][1]

        # input->gates, columns interleaved [r_f|r_b|z_f|z_b|n_f|n_b]
        wih_cat = jnp.concatenate(
            [g(wih_f, 0), g(wih_b, 0), g(wih_f, 1), g(wih_b, 1), g(wih_f, 2), g(wih_b, 2)],
            axis=1)                                               # [128, 384]
        # hidden->gates, block diagonal: rows 0:H act on h_fwd, rows H:2H on h_rev
        top = jnp.concatenate(
            [g(whh_f, 0), zeros_hh, g(whh_f, 1), zeros_hh, g(whh_f, 2), zeros_hh], axis=1)
        bot = jnp.concatenate(
            [zeros_hh, g(whh_b, 0), zeros_hh, g(whh_b, 1), zeros_hh, g(whh_b, 2)], axis=1)
        whh_cat = jnp.concatenate([top, bot], axis=0)             # [128, 384]

        # fold r/z hidden biases into the input bias (only the n-gate hidden
        # bias must stay separate: it is multiplied by r inside the cell)
        bih_cat = jnp.concatenate([
            b(bih_f, 0) + b(bhh_f, 0), b(bih_b, 0) + b(bhh_b, 0),
            b(bih_f, 1) + b(bhh_f, 1), b(bih_b, 1) + b(bhh_b, 1),
            b(bih_f, 2), b(bih_b, 2)])[None, :]                   # [1, 384]
        bhhn_cat = jnp.concatenate([b(bhh_f, 2), b(bhh_b, 2)])[None, :]   # [1, 128]

        wih_l.append(wih_cat)
        whh_l.append(whh_cat)
        bih_l.append(bih_cat)
        bhhn_l.append(bhhn_cat)

    # per-batch time-sum selection matrix: msum[b, t*B + b'] = (b == b')
    msum = jnp.tile(jnp.eye(B, dtype=jnp.float32), (1, T))       # [B, T*B]

    return {
        "emb": emb_pad.astype(jnp.bfloat16),           # [128, 128] bf16
        "wih": jnp.stack(wih_l).astype(jnp.bfloat16),  # [3, 128, 384] bf16
        "whh": jnp.stack(whh_l).astype(jnp.bfloat16),  # [3, 128, 384] bf16
        "bih": jnp.stack(bih_l),                       # [3, 1, 384] f32
        "bhhn": jnp.stack(bhhn_l),                     # [3, 1, 128] f32
        "wd": params["dense_w"].T,                     # [128, 1]
        "bd": params["dense_b"].reshape(1, 1),         # [1, 1]
        "msum": msum,                                  # [2, 16]
    }


if __name__ == "__main__":
    key = jax.random.PRNGKey(0)
    raw_params = init_params(key)
    kp = pack_params(raw_params)

    ids = jax.random.randint(jax.random.PRNGKey(1), (B, T), 0, VOCAB, jnp.int32)
    # force a few trailing padding tokens (pad id == 1) so the mask path is exercised
    ids = ids.at[:, -2:].set(PAD_ID)

    fwd = jax.jit(lambda t: birnn_forward(t, kp))
    out = fwd(ids)
    jax.block_until_ready(out)

    assert out.shape == (B, D_MODEL) and out.dtype == jnp.float32
    assert bool(jnp.all(jnp.isfinite(out)))
    print("KERNEL_OK")
</pallas_src>

<mosaic_0001>
module attributes {stable_mosaic.version = 11 : i64} {
  func.func @_fused_birnn_kernel(%arg0: memref<16x1xi32, #tpu.memory_space<vmem>>, %arg1: memref<128x128xbf16, #tpu.memory_space<vmem>>, %arg2: memref<3x128x384xbf16, #tpu.memory_space<vmem>>, %arg3: memref<3x128x384xbf16, #tpu.memory_space<vmem>>, %arg4: memref<3x1x384xf32, #tpu.memory_space<vmem>>, %arg5: memref<3x1x128xf32, #tpu.memory_space<vmem>>, %arg6: memref<128x1xf32, #tpu.memory_space<vmem>>, %arg7: memref<1x1xf32, #tpu.memory_space<vmem>>, %arg8: memref<2x16xf32, #tpu.memory_space<vmem>>, %arg9: memref<2x128xf32, #tpu.memory_space<vmem>>) attributes {dimension_semantics = [], scalar_prefetch = 0 : i64, scratch_operands = 0 : i64, tpu.core_type = #tpu.core_type<tc>} {
    %c0 = arith.constant 0 : index
    %c0_0 = arith.constant 0 : index
    %0 = vector.load %arg0[%c0, %c0_0] : memref<16x1xi32, #tpu.memory_space<vmem>>, vector<16x1xi32>
    %1 = tpu.iota {dimensions = array<i32: 1>} : vector<16x128xi32>
    %2 = vector.broadcast %0 : vector<16x1xi32> to vector<16x128xi32>
    %3 = arith.cmpi eq, %2, %1 : vector<16x128xi32>
    %4 = arith.extui %3 : vector<16x128xi1> to vector<16x128xi32>
    %5 = arith.sitofp %4 : vector<16x128xi32> to vector<16x128xf32>
    %6 = arith.truncf %5 : vector<16x128xf32> to vector<16x128xbf16>
    %c0_1 = arith.constant 0 : index
    %c0_2 = arith.constant 0 : index
    %7 = vector.load %arg1[%c0_1, %c0_2] : memref<128x128xbf16, #tpu.memory_space<vmem>>, vector<128x128xbf16>
    %cst = arith.constant dense<0.000000e+00> : vector<16x128xf32>
    %8 = tpu.matmul %6, %7, %cst {dimension_numbers = #tpu.dot_dimension_numbers<[1], [0], [0], [1], [0, 0, 1, 1], [], []>} : vector<16x128xbf16>, vector<128x128xbf16>, vector<16x128xf32> -> vector<16x128xf32>
    %9 = tpu.iota {dimensions = array<i32: 1>} : vector<2x256xi32>
    %c128_i32 = arith.constant 128 : i32
    %c0_i32 = arith.constant 0 : i32
    %10 = arith.cmpi eq, %c128_i32, %c0_i32 : i32
    %c1_i32 = arith.constant 1 : i32
    %11 = arith.select %10, %c1_i32, %c128_i32 : i32
    %12 = vector.broadcast %11 : i32 to vector<2x256xi32>
    %13 = arith.remsi %9, %12 : vector<2x256xi32>
    %c0_i32_3 = arith.constant 0 : i32
    %14 = vector.broadcast %c0_i32_3 : i32 to vector<2x256xi32>
    %15 = arith.cmpi ne, %13, %14 : vector<2x256xi32>
    %c0_i32_4 = arith.constant 0 : i32
    %16 = vector.broadcast %c0_i32_4 : i32 to vector<2x256xi32>
    %17 = arith.cmpi slt, %13, %16 : vector<2x256xi32>
    %c0_i32_5 = arith.constant 0 : i32
    %18 = arith.cmpi slt, %11, %c0_i32_5 : i32
    %19 = vector.broadcast %18 : i1 to vector<2x256xi1>
    %20 = vector.broadcast %19 : vector<2x256xi1> to vector<2x256xi1>
    %21 = arith.xori %17, %20 : vector<2x256xi1>
    %22 = arith.andi %21, %15 : vector<2x256xi1>
    %23 = vector.broadcast %11 : i32 to vector<2x256xi32>
    %24 = arith.addi %13, %23 : vector<2x256xi32>
    %25 = arith.select %22, %24, %13 : vector<2x256xi1>, vector<2x256xi32>
    %c64_i32 = arith.constant 64 : i32
    %26 = vector.broadcast %c64_i32 : i32 to vector<2x256xi32>
    %27 = arith.cmpi sge, %25, %26 : vector<2x256xi32>
    %28 = tpu.iota {dimensions = array<i32: 1>} : vector<2x128xi32>
    %c64_i32_6 = arith.constant 64 : i32
    %29 = vector.broadcast %c64_i32_6 : i32 to vector<2x128xi32>
    %30 = arith.cmpi sge, %28, %29 : vector<2x128xi32>
    %c64_i32_7 = arith.constant 64 : i32
    %31 = vector.broadcast %c64_i32_7 : i32 to vector<2x128xi32>
    %32 = arith.cmpi slt, %28, %31 : vector<2x128xi32>
    %33 = arith.truncf %8 : vector<16x128xf32> to vector<16x128xbf16>
    %c0_8 = arith.constant 0 : index
    %c0_9 = arith.constant 0 : index
    %c0_10 = arith.constant 0 : index
    %34 = vector.load %arg2[%c0_8, %c0_9, %c0_10] : memref<3x128x384xbf16, #tpu.memory_space<vmem>>, vector<1x128x384xbf16>
    %35 = vector.shape_cast %34 : vector<1x128x384xbf16> to vector<128x384xbf16>
    %cst_11 = arith.constant dense<0.000000e+00> : vector<16x384xf32>
    %36 = tpu.matmul %33, %35, %cst_11 {dimension_numbers = #tpu.dot_dimension_numbers<[1], [0], [0], [1], [0, 0, 1, 1], [], []>} : vector<16x128xbf16>, vector<128x384xbf16>, vector<16x384xf32> -> vector<16x384xf32>
    %c0_12 = arith.constant 0 : index
    %c0_13 = arith.constant 0 : index
    %c0_14 = arith.constant 0 : index
    %37 = vector.load %arg4[%c0_12, %c0_13, %c0_14] : memref<3x1x384xf32, #tpu.memory_space<vmem>>, vector<1x1x384xf32>
    %38 = vector.shape_cast %37 : vector<1x1x384xf32> to vector<1x384xf32>
    %39 = vector.broadcast %38 : vector<1x384xf32> to vector<16x384xf32>
    %40 = arith.addf %36, %39 : vector<16x384xf32>
    %c0_15 = arith.constant 0 : index
    %c0_16 = arith.constant 0 : index
    %c0_17 = arith.constant 0 : index
    %41 = vector.load %arg3[%c0_15, %c0_16, %c0_17] : memref<3x128x384xbf16, #tpu.memory_space<vmem>>, vector<1x128x384xbf16>
    %42 = vector.shape_cast %41 : vector<1x128x384xbf16> to vector<128x384xbf16>
    %43 = vector.extract_strided_slice %42 {offsets = [0, 0], sizes = [128, 256], strides = [1, 1]} : vector<128x384xbf16> to vector<128x256xbf16>
    %44 = vector.extract_strided_slice %42 {offsets = [0, 256], sizes = [128, 128], strides = [1, 1]} : vector<128x384xbf16> to vector<128x128xbf16>
    %c0_18 = arith.constant 0 : index
    %c0_19 = arith.constant 0 : index
    %c0_20 = arith.constant 0 : index
    %45 = vector.load %arg5[%c0_18, %c0_19, %c0_20] : memref<3x1x128xf32, #tpu.memory_space<vmem>>, vector<1x1x128xf32>
    %46 = vector.shape_cast %45 : vector<1x1x128xf32> to vector<1x128xf32>
    %47 = vector.shape_cast %46 : vector<1x128xf32> to vector<1x128xf32>
    %48 = vector.broadcast %47 : vector<1x128xf32> to vector<2x128xf32>
    %49 = vector.extract_strided_slice %40 {offsets = [0, 0], sizes = [2, 256], strides = [1, 1]} : vector<16x384xf32> to vector<2x256xf32>
    %50 = vector.extract_strided_slice %40 {offsets = [2, 0], sizes = [2, 256], strides = [1, 1]} : vector<16x384xf32> to vector<2x256xf32>
    %51 = vector.extract_strided_slice %40 {offsets = [4, 0], sizes = [2, 256], strides = [1, 1]} : vector<16x384xf32> to vector<2x256xf32>
    %52 = vector.extract_strided_slice %40 {offsets = [6, 0], sizes = [2, 256], strides = [1, 1]} : vector<16x384xf32> to vector<2x256xf32>
    %53 = vector.extract_strided_slice %40 {offsets = [8, 0], sizes = [2, 256], strides = [1, 1]} : vector<16x384xf32> to vector<2x256xf32>
    %54 = vector.extract_strided_slice %40 {offsets = [10, 0], sizes = [2, 256], strides = [1, 1]} : vector<16x384xf32> to vector<2x256xf32>
    %55 = vector.extract_strided_slice %40 {offsets = [12, 0], sizes = [2, 256], strides = [1, 1]} : vector<16x384xf32> to vector<2x256xf32>
    %56 = vector.extract_strided_slice %40 {offsets = [14, 0], sizes = [2, 256], strides = [1, 1]} : vector<16x384xf32> to vector<2x256xf32>
    %57 = vector.extract_strided_slice %40 {offsets = [0, 256], sizes = [2, 128], strides = [1, 1]} : vector<16x384xf32> to vector<2x128xf32>
    %58 = vector.extract_strided_slice %40 {offsets = [2, 256], sizes = [2, 128], strides = [1, 1]} : vector<16x384xf32> to vector<2x128xf32>
    %59 = vector.extract_strided_slice %40 {offsets = [4, 256], sizes = [2, 128], strides = [1, 1]} : vector<16x384xf32> to vector<2x128xf32>
    %60 = vector.extract_strided_slice %40 {offsets = [6, 256], sizes = [2, 128], strides = [1, 1]} : vector<16x384xf32> to vector<2x128xf32>
    %61 = vector.extract_strided_slice %40 {offsets = [8, 256], sizes = [2, 128], strides = [1, 1]} : vector<16x384xf32> to vector<2x128xf32>
    %62 = vector.extract_strided_slice %40 {offsets = [10, 256], sizes = [2, 128], strides = [1, 1]} : vector<16x384xf32> to vector<2x128xf32>
    %63 = vector.extract_strided_slice %40 {offsets = [12, 256], sizes = [2, 128], strides = [1, 1]} : vector<16x384xf32> to vector<2x128xf32>
    %64 = vector.extract_strided_slice %40 {offsets = [14, 256], sizes = [2, 128], strides = [1, 1]} : vector<16x384xf32> to vector<2x128xf32>
    %65 = arith.select %27, %56, %49 : vector<2x256xi1>, vector<2x256xf32>
    %66 = arith.select %27, %55, %50 : vector<2x256xi1>, vector<2x256xf32>
    %67 = arith.select %27, %54, %51 : vector<2x256xi1>, vector<2x256xf32>
    %68 = arith.select %27, %53, %52 : vector<2x256xi1>, vector<2x256xf32>
    %69 = arith.select %27, %52, %53 : vector<2x256xi1>, vector<2x256xf32>
    %70 = arith.select %27, %51, %54 : vector<2x256xi1>, vector<2x256xf32>
    %71 = arith.select %27, %50, %55 : vector<2x256xi1>, vector<2x256xf32>
    %72 = arith.select %27, %49, %56 : vector<2x256xi1>, vector<2x256xf32>
    %73 = arith.select %30, %64, %57 : vector<2x128xi1>, vector<2x128xf32>
    %74 = arith.select %30, %63, %58 : vector<2x128xi1>, vector<2x128xf32>
    %75 = arith.select %30, %62, %59 : vector<2x128xi1>, vector<2x128xf32>
    %76 = arith.select %30, %61, %60 : vector<2x128xi1>, vector<2x128xf32>
    %77 = arith.select %30, %60, %61 : vector<2x128xi1>, vector<2x128xf32>
    %78 = arith.select %30, %59, %62 : vector<2x128xi1>, vector<2x128xf32>
    %79 = arith.select %30, %58, %63 : vector<2x128xi1>, vector<2x128xf32>
    %80 = arith.select %30, %57, %64 : vector<2x128xi1>, vector<2x128xf32>
    %cst_21 = arith.constant 0.000000e+00 : f32
    %81 = vector.broadcast %cst_21 : f32 to vector<2x128xf32>
    %82 = arith.truncf %81 : vector<2x128xf32> to vector<2x128xbf16>
    %cst_22 = arith.constant dense<0.000000e+00> : vector<2x256xf32>
    %83 = tpu.matmul %82, %43, %cst_22 {dimension_numbers = #tpu.dot_dimension_numbers<[1], [0], [0], [1], [0, 0, 1, 1], [], []>} : vector<2x128xbf16>, vector<128x256xbf16>, vector<2x256xf32> -> vector<2x256xf32>
    %cst_23 = arith.constant dense<0.000000e+00> : vector<2x128xf32>
    %84 = tpu.matmul %82, %44, %cst_23 {dimension_numbers = #tpu.dot_dimension_numbers<[1], [0], [0], [1], [0, 0, 1, 1], [], []>} : vector<2x128xbf16>, vector<128x128xbf16>, vector<2x128xf32> -> vector<2x128xf32>
    %85 = arith.addf %65, %83 : vector<2x256xf32>
    %86 = arith.negf %85 : vector<2x256xf32>
    %87 = math.exp %86 : vector<2x256xf32>
    %cst_24 = arith.constant 1.000000e+00 : f32
    %88 = vector.broadcast %cst_24 : f32 to vector<2x256xf32>
    %89 = arith.addf %88, %87 : vector<2x256xf32>
    %90 = arith.divf %88, %89 : vector<2x256xf32>
    %91 = vector.extract_strided_slice %90 {offsets = [0, 0], sizes = [2, 128], strides = [1, 1]} : vector<2x256xf32> to vector<2x128xf32>
    %92 = vector.extract_strided_slice %90 {offsets = [0, 128], sizes = [2, 128], strides = [1, 1]} : vector<2x256xf32> to vector<2x128xf32>
    %93 = arith.addf %84, %48 : vector<2x128xf32>
    %94 = arith.mulf %91, %93 : vector<2x128xf32>
    %95 = arith.addf %73, %94 : vector<2x128xf32>
    %96 = math.tanh %95 : vector<2x128xf32>
    %cst_25 = arith.constant 1.000000e+00 : f32
    %97 = vector.broadcast %cst_25 : f32 to vector<2x128xf32>
    %98 = arith.subf %97, %92 : vector<2x128xf32>
    %99 = arith.mulf %98, %96 : vector<2x128xf32>
    %100 = arith.mulf %92, %81 : vector<2x128xf32>
    %101 = arith.addf %99, %100 : vector<2x128xf32>
    %102 = arith.truncf %101 : vector<2x128xf32> to vector<2x128xbf16>
    %cst_26 = arith.constant dense<0.000000e+00> : vector<2x256xf32>
    %103 = tpu.matmul %102, %43, %cst_26 {dimension_numbers = #tpu.dot_dimension_numbers<[1], [0], [0], [1], [0, 0, 1, 1], [], []>} : vector<2x128xbf16>, vector<128x256xbf16>, vector<2x256xf32> -> vector<2x256xf32>
    %cst_27 = arith.constant dense<0.000000e+00> : vector<2x128xf32>
    %104 = tpu.matmul %102, %44, %cst_27 {dimension_numbers = #tpu.dot_dimension_numbers<[1], [0], [0], [1], [0, 0, 1, 1], [], []>} : vector<2x128xbf16>, vector<128x128xbf16>, vector<2x128xf32> -> vector<2x128xf32>
    %105 = arith.addf %66, %103 : vector<2x256xf32>
    %106 = arith.negf %105 : vector<2x256xf32>
    %107 = math.exp %106 : vector<2x256xf32>
    %cst_28 = arith.constant 1.000000e+00 : f32
    %108 = vector.broadcast %cst_28 : f32 to vector<2x256xf32>
    %109 = arith.addf %108, %107 : vector<2x256xf32>
    %110 = arith.divf %108, %109 : vector<2x256xf32>
    %111 = vector.extract_strided_slice %110 {offsets = [0, 0], sizes = [2, 128], strides = [1, 1]} : vector<2x256xf32> to vector<2x128xf32>
    %112 = vector.extract_strided_slice %110 {offsets = [0, 128], sizes = [2, 128], strides = [1, 1]} : vector<2x256xf32> to vector<2x128xf32>
    %113 = arith.addf %104, %48 : vector<2x128xf32>
    %114 = arith.mulf %111, %113 : vector<2x128xf32>
    %115 = arith.addf %74, %114 : vector<2x128xf32>
    %116 = math.tanh %115 : vector<2x128xf32>
    %cst_29 = arith.constant 1.000000e+00 : f32
    %117 = vector.broadcast %cst_29 : f32 to vector<2x128xf32>
    %118 = arith.subf %117, %112 : vector<2x128xf32>
    %119 = arith.mulf %118, %116 : vector<2x128xf32>
    %120 = arith.mulf %112, %101 : vector<2x128xf32>
    %121 = arith.addf %119, %120 : vector<2x128xf32>
    %122 = arith.truncf %121 : vector<2x128xf32> to vector<2x128xbf16>
    %cst_30 = arith.constant dense<0.000000e+00> : vector<2x256xf32>
    %123 = tpu.matmul %122, %43, %cst_30 {dimension_numbers = #tpu.dot_dimension_numbers<[1], [0], [0], [1], [0, 0, 1, 1], [], []>} : vector<2x128xbf16>, vector<128x256xbf16>, vector<2x256xf32> -> vector<2x256xf32>
    %cst_31 = arith.constant dense<0.000000e+00> : vector<2x128xf32>
    %124 = tpu.matmul %122, %44, %cst_31 {dimension_numbers = #tpu.dot_dimension_numbers<[1], [0], [0], [1], [0, 0, 1, 1], [], []>} : vector<2x128xbf16>, vector<128x128xbf16>, vector<2x128xf32> -> vector<2x128xf32>
    %125 = arith.addf %67, %123 : vector<2x256xf32>
    %126 = arith.negf %125 : vector<2x256xf32>
    %127 = math.exp %126 : vector<2x256xf32>
    %cst_32 = arith.constant 1.000000e+00 : f32
    %128 = vector.broadcast %cst_32 : f32 to vector<2x256xf32>
    %129 = arith.addf %128, %127 : vector<2x256xf32>
    %130 = arith.divf %128, %129 : vector<2x256xf32>
    %131 = vector.extract_strided_slice %130 {offsets = [0, 0], sizes = [2, 128], strides = [1, 1]} : vector<2x256xf32> to vector<2x128xf32>
    %132 = vector.extract_strided_slice %130 {offsets = [0, 128], sizes = [2, 128], strides = [1, 1]} : vector<2x256xf32> to vector<2x128xf32>
    %133 = arith.addf %124, %48 : vector<2x128xf32>
    %134 = arith.mulf %131, %133 : vector<2x128xf32>
    %135 = arith.addf %75, %134 : vector<2x128xf32>
    %136 = math.tanh %135 : vector<2x128xf32>
    %cst_33 = arith.constant 1.000000e+00 : f32
    %137 = vector.broadcast %cst_33 : f32 to vector<2x128xf32>
    %138 = arith.subf %137, %132 : vector<2x128xf32>
    %139 = arith.mulf %138, %136 : vector<2x128xf32>
    %140 = arith.mulf %132, %121 : vector<2x128xf32>
    %141 = arith.addf %139, %140 : vector<2x128xf32>
    %142 = arith.truncf %141 : vector<2x128xf32> to vector<2x128xbf16>
    %cst_34 = arith.constant dense<0.000000e+00> : vector<2x256xf32>
    %143 = tpu.matmul %142, %43, %cst_34 {dimension_numbers = #tpu.dot_dimension_numbers<[1], [0], [0], [1], [0, 0, 1, 1], [], []>} : vector<2x128xbf16>, vector<128x256xbf16>, vector<2x256xf32> -> vector<2x256xf32>
    %cst_35 = arith.constant dense<0.000000e+00> : vector<2x128xf32>
    %144 = tpu.matmul %142, %44, %cst_35 {dimension_numbers = #tpu.dot_dimension_numbers<[1], [0], [0], [1], [0, 0, 1, 1], [], []>} : vector<2x128xbf16>, vector<128x128xbf16>, vector<2x128xf32> -> vector<2x128xf32>
    %145 = arith.addf %68, %143 : vector<2x256xf32>
    %146 = arith.negf %145 : vector<2x256xf32>
    %147 = math.exp %146 : vector<2x256xf32>
    %cst_36 = arith.constant 1.000000e+00 : f32
    %148 = vector.broadcast %cst_36 : f32 to vector<2x256xf32>
    %149 = arith.addf %148, %147 : vector<2x256xf32>
    %150 = arith.divf %148, %149 : vector<2x256xf32>
    %151 = vector.extract_strided_slice %150 {offsets = [0, 0], sizes = [2, 128], strides = [1, 1]} : vector<2x256xf32> to vector<2x128xf32>
    %152 = vector.extract_strided_slice %150 {offsets = [0, 128], sizes = [2, 128], strides = [1, 1]} : vector<2x256xf32> to vector<2x128xf32>
    %153 = arith.addf %144, %48 : vector<2x128xf32>
    %154 = arith.mulf %151, %153 : vector<2x128xf32>
    %155 = arith.addf %76, %154 : vector<2x128xf32>
    %156 = math.tanh %155 : vector<2x128xf32>
    %cst_37 = arith.constant 1.000000e+00 : f32
    %157 = vector.broadcast %cst_37 : f32 to vector<2x128xf32>
    %158 = arith.subf %157, %152 : vector<2x128xf32>
    %159 = arith.mulf %158, %156 : vector<2x128xf32>
    %160 = arith.mulf %152, %141 : vector<2x128xf32>
    %161 = arith.addf %159, %160 : vector<2x128xf32>
    %162 = arith.truncf %161 : vector<2x128xf32> to vector<2x128xbf16>
    %cst_38 = arith.constant dense<0.000000e+00> : vector<2x256xf32>
    %163 = tpu.matmul %162, %43, %cst_38 {dimension_numbers = #tpu.dot_dimension_numbers<[1], [0], [0], [1], [0, 0, 1, 1], [], []>} : vector<2x128xbf16>, vector<128x256xbf16>, vector<2x256xf32> -> vector<2x256xf32>
    %cst_39 = arith.constant dense<0.000000e+00> : vector<2x128xf32>
    %164 = tpu.matmul %162, %44, %cst_39 {dimension_numbers = #tpu.dot_dimension_numbers<[1], [0], [0], [1], [0, 0, 1, 1], [], []>} : vector<2x128xbf16>, vector<128x128xbf16>, vector<2x128xf32> -> vector<2x128xf32>
    %165 = arith.addf %69, %163 : vector<2x256xf32>
    %166 = arith.negf %165 : vector<2x256xf32>
    %167 = math.exp %166 : vector<2x256xf32>
    %cst_40 = arith.constant 1.000000e+00 : f32
    %168 = vector.broadcast %cst_40 : f32 to vector<2x256xf32>
    %169 = arith.addf %168, %167 : vector<2x256xf32>
    %170 = arith.divf %168, %169 : vector<2x256xf32>
    %171 = vector.extract_strided_slice %170 {offsets = [0, 0], sizes = [2, 128], strides = [1, 1]} : vector<2x256xf32> to vector<2x128xf32>
    %172 = vector.extract_strided_slice %170 {offsets = [0, 128], sizes = [2, 128], strides = [1, 1]} : vector<2x256xf32> to vector<2x128xf32>
    %173 = arith.addf %164, %48 : vector<2x128xf32>
    %174 = arith.mulf %171, %173 : vector<2x128xf32>
    %175 = arith.addf %77, %174 : vector<2x128xf32>
    %176 = math.tanh %175 : vector<2x128xf32>
    %cst_41 = arith.constant 1.000000e+00 : f32
    %177 = vector.broadcast %cst_41 : f32 to vector<2x128xf32>
    %178 = arith.subf %177, %172 : vector<2x128xf32>
    %179 = arith.mulf %178, %176 : vector<2x128xf32>
    %180 = arith.mulf %172, %161 : vector<2x128xf32>
    %181 = arith.addf %179, %180 : vector<2x128xf32>
    %182 = arith.truncf %181 : vector<2x128xf32> to vector<2x128xbf16>
    %cst_42 = arith.constant dense<0.000000e+00> : vector<2x256xf32>
    %183 = tpu.matmul %182, %43, %cst_42 {dimension_numbers = #tpu.dot_dimension_numbers<[1], [0], [0], [1], [0, 0, 1, 1], [], []>} : vector<2x128xbf16>, vector<128x256xbf16>, vector<2x256xf32> -> vector<2x256xf32>
    %cst_43 = arith.constant dense<0.000000e+00> : vector<2x128xf32>
    %184 = tpu.matmul %182, %44, %cst_43 {dimension_numbers = #tpu.dot_dimension_numbers<[1], [0], [0], [1], [0, 0, 1, 1], [], []>} : vector<2x128xbf16>, vector<128x128xbf16>, vector<2x128xf32> -> vector<2x128xf32>
    %185 = arith.addf %70, %183 : vector<2x256xf32>
    %186 = arith.negf %185 : vector<2x256xf32>
    %187 = math.exp %186 : vector<2x256xf32>
    %cst_44 = arith.constant 1.000000e+00 : f32
    %188 = vector.broadcast %cst_44 : f32 to vector<2x256xf32>
    %189 = arith.addf %188, %187 : vector<2x256xf32>
    %190 = arith.divf %188, %189 : vector<2x256xf32>
    %191 = vector.extract_strided_slice %190 {offsets = [0, 0], sizes = [2, 128], strides = [1, 1]} : vector<2x256xf32> to vector<2x128xf32>
    %192 = vector.extract_strided_slice %190 {offsets = [0, 128], sizes = [2, 128], strides = [1, 1]} : vector<2x256xf32> to vector<2x128xf32>
    %193 = arith.addf %184, %48 : vector<2x128xf32>
    %194 = arith.mulf %191, %193 : vector<2x128xf32>
    %195 = arith.addf %78, %194 : vector<2x128xf32>
    %196 = math.tanh %195 : vector<2x128xf32>
    %cst_45 = arith.constant 1.000000e+00 : f32
    %197 = vector.broadcast %cst_45 : f32 to vector<2x128xf32>
    %198 = arith.subf %197, %192 : vector<2x128xf32>
    %199 = arith.mulf %198, %196 : vector<2x128xf32>
    %200 = arith.mulf %192, %181 : vector<2x128xf32>
    %201 = arith.addf %199, %200 : vector<2x128xf32>
    %202 = arith.truncf %201 : vector<2x128xf32> to vector<2x128xbf16>
    %cst_46 = arith.constant dense<0.000000e+00> : vector<2x256xf32>
    %203 = tpu.matmul %202, %43, %cst_46 {dimension_numbers = #tpu.dot_dimension_numbers<[1], [0], [0], [1], [0, 0, 1, 1], [], []>} : vector<2x128xbf16>, vector<128x256xbf16>, vector<2x256xf32> -> vector<2x256xf32>
    %cst_47 = arith.constant dense<0.000000e+00> : vector<2x128xf32>
    %204 = tpu.matmul %202, %44, %cst_47 {dimension_numbers = #tpu.dot_dimension_numbers<[1], [0], [0], [1], [0, 0, 1, 1], [], []>} : vector<2x128xbf16>, vector<128x128xbf16>, vector<2x128xf32> -> vector<2x128xf32>
    %205 = arith.addf %71, %203 : vector<2x256xf32>
    %206 = arith.negf %205 : vector<2x256xf32>
    %207 = math.exp %206 : vector<2x256xf32>
    %cst_48 = arith.constant 1.000000e+00 : f32
    %208 = vector.broadcast %cst_48 : f32 to vector<2x256xf32>
    %209 = arith.addf %208, %207 : vector<2x256xf32>
    %210 = arith.divf %208, %209 : vector<2x256xf32>
    %211 = vector.extract_strided_slice %210 {offsets = [0, 0], sizes = [2, 128], strides = [1, 1]} : vector<2x256xf32> to vector<2x128xf32>
    %212 = vector.extract_strided_slice %210 {offsets = [0, 128], sizes = [2, 128], strides = [1, 1]} : vector<2x256xf32> to vector<2x128xf32>
    %213 = arith.addf %204, %48 : vector<2x128xf32>
    %214 = arith.mulf %211, %213 : vector<2x128xf32>
    %215 = arith.addf %79, %214 : vector<2x128xf32>
    %216 = math.tanh %215 : vector<2x128xf32>
    %cst_49 = arith.constant 1.000000e+00 : f32
    %217 = vector.broadcast %cst_49 : f32 to vector<2x128xf32>
    %218 = arith.subf %217, %212 : vector<2x128xf32>
    %219 = arith.mulf %218, %216 : vector<2x128xf32>
    %220 = arith.mulf %212, %201 : vector<2x128xf32>
    %221 = arith.addf %219, %220 : vector<2x128xf32>
    %222 = arith.truncf %221 : vector<2x128xf32> to vector<2x128xbf16>
    %cst_50 = arith.constant dense<0.000000e+00> : vector<2x256xf32>
    %223 = tpu.matmul %222, %43, %cst_50 {dimension_numbers = #tpu.dot_dimension_numbers<[1], [0], [0], [1], [0, 0, 1, 1], [], []>} : vector<2x128xbf16>, vector<128x256xbf16>, vector<2x256xf32> -> vector<2x256xf32>
    %cst_51 = arith.constant dense<0.000000e+00> : vector<2x128xf32>
    %224 = tpu.matmul %222, %44, %cst_51 {dimension_numbers = #tpu.dot_dimension_numbers<[1], [0], [0], [1], [0, 0, 1, 1], [], []>} : vector<2x128xbf16>, vector<128x128xbf16>, vector<2x128xf32> -> vector<2x128xf32>
    %225 = arith.addf %72, %223 : vector<2x256xf32>
    %226 = arith.negf %225 : vector<2x256xf32>
    %227 = math.exp %226 : vector<2x256xf32>
    %cst_52 = arith.constant 1.000000e+00 : f32
    %228 = vector.broadcast %cst_52 : f32 to vector<2x256xf32>
    %229 = arith.addf %228, %227 : vector<2x256xf32>
    %230 = arith.divf %228, %229 : vector<2x256xf32>
    %231 = vector.extract_strided_slice %230 {offsets = [0, 0], sizes = [2, 128], strides = [1, 1]} : vector<2x256xf32> to vector<2x128xf32>
    %232 = vector.extract_strided_slice %230 {offsets = [0, 128], sizes = [2, 128], strides = [1, 1]} : vector<2x256xf32> to vector<2x128xf32>
    %233 = arith.addf %224, %48 : vector<2x128xf32>
    %234 = arith.mulf %231, %233 : vector<2x128xf32>
    %235 = arith.addf %80, %234 : vector<2x128xf32>
    %236 = math.tanh %235 : vector<2x128xf32>
    %cst_53 = arith.constant 1.000000e+00 : f32
    %237 = vector.broadcast %cst_53 : f32 to vector<2x128xf32>
    %238 = arith.subf %237, %232 : vector<2x128xf32>
    %239 = arith.mulf %238, %236 : vector<2x128xf32>
    %240 = arith.mulf %232, %221 : vector<2x128xf32>
    %241 = arith.addf %239, %240 : vector<2x128xf32>
    %242 = arith.select %32, %101, %241 : vector<2x128xi1>, vector<2x128xf32>
    %243 = arith.select %32, %121, %221 : vector<2x128xi1>, vector<2x128xf32>
    %244 = arith.select %32, %141, %201 : vector<2x128xi1>, vector<2x128xf32>
    %245 = arith.select %32, %161, %181 : vector<2x128xi1>, vector<2x128xf32>
    %246 = arith.select %32, %181, %161 : vector<2x128xi1>, vector<2x128xf32>
    %247 = arith.select %32, %201, %141 : vector<2x128xi1>, vector<2x128xf32>
    %248 = arith.select %32, %221, %121 : vector<2x128xi1>, vector<2x128xf32>
    %249 = arith.select %32, %241, %101 : vector<2x128xi1>, vector<2x128xf32>
    %250 = tpu.concatenate %242, %243, %244, %245, %246, %247, %248, %249 in 0 : vector<2x128xf32>, vector<2x128xf32>, vector<2x128xf32>, vector<2x128xf32>, vector<2x128xf32>, vector<2x128xf32>, vector<2x128xf32>, vector<2x128xf32> -> vector<16x128xf32>
    %251 = arith.truncf %250 : vector<16x128xf32> to vector<16x128xbf16>
    %c1 = arith.constant 1 : index
    %c0_54 = arith.constant 0 : index
    %c0_55 = arith.constant 0 : index
    %252 = vector.load %arg2[%c1, %c0_54, %c0_55] : memref<3x128x384xbf16, #tpu.memory_space<vmem>>, vector<1x128x384xbf16>
    %253 = vector.shape_cast %252 : vector<1x128x384xbf16> to vector<128x384xbf16>
    %cst_56 = arith.constant dense<0.000000e+00> : vector<16x384xf32>
    %254 = tpu.matmul %251, %253, %cst_56 {dimension_numbers = #tpu.dot_dimension_numbers<[1], [0], [0], [1], [0, 0, 1, 1], [], []>} : vector<16x128xbf16>, vector<128x384xbf16>, vector<16x384xf32> -> vector<16x384xf32>
    %c1_57 = arith.constant 1 : index
    %c0_58 = arith.constant 0 : index
    %c0_59 = arith.constant 0 : index
    %255 = vector.load %arg4[%c1_57, %c0_58, %c0_59] : memref<3x1x384xf32, #tpu.memory_space<vmem>>, vector<1x1x384xf32>
    %256 = vector.shape_cast %255 : vector<1x1x384xf32> to vector<1x384xf32>
    %257 = vector.broadcast %256 : vector<1x384xf32> to vector<16x384xf32>
    %258 = arith.addf %254, %257 : vector<16x384xf32>
    %c1_60 = arith.constant 1 : index
    %c0_61 = arith.constant 0 : index
    %c0_62 = arith.constant 0 : index
    %259 = vector.load %arg3[%c1_60, %c0_61, %c0_62] : memref<3x128x384xbf16, #tpu.memory_space<vmem>>, vector<1x128x384xbf16>
    %260 = vector.shape_cast %259 : vector<1x128x384xbf16> to vector<128x384xbf16>
    %261 = vector.extract_strided_slice %260 {offsets = [0, 0], sizes = [128, 256], strides = [1, 1]} : vector<128x384xbf16> to vector<128x256xbf16>
    %262 = vector.extract_strided_slice %260 {offsets = [0, 256], sizes = [128, 128], strides = [1, 1]} : vector<128x384xbf16> to vector<128x128xbf16>
    %c1_63 = arith.constant 1 : index
    %c0_64 = arith.constant 0 : index
    %c0_65 = arith.constant 0 : index
    %263 = vector.load %arg5[%c1_63, %c0_64, %c0_65] : memref<3x1x128xf32, #tpu.memory_space<vmem>>, vector<1x1x128xf32>
    %264 = vector.shape_cast %263 : vector<1x1x128xf32> to vector<1x128xf32>
    %265 = vector.shape_cast %264 : vector<1x128xf32> to vector<1x128xf32>
    %266 = vector.broadcast %265 : vector<1x128xf32> to vector<2x128xf32>
    %267 = vector.extract_strided_slice %258 {offsets = [0, 0], sizes = [2, 256], strides = [1, 1]} : vector<16x384xf32> to vector<2x256xf32>
    %268 = vector.extract_strided_slice %258 {offsets = [2, 0], sizes = [2, 256], strides = [1, 1]} : vector<16x384xf32> to vector<2x256xf32>
    %269 = vector.extract_strided_slice %258 {offsets = [4, 0], sizes = [2, 256], strides = [1, 1]} : vector<16x384xf32> to vector<2x256xf32>
    %270 = vector.extract_strided_slice %258 {offsets = [6, 0], sizes = [2, 256], strides = [1, 1]} : vector<16x384xf32> to vector<2x256xf32>
    %271 = vector.extract_strided_slice %258 {offsets = [8, 0], sizes = [2, 256], strides = [1, 1]} : vector<16x384xf32> to vector<2x256xf32>
    %272 = vector.extract_strided_slice %258 {offsets = [10, 0], sizes = [2, 256], strides = [1, 1]} : vector<16x384xf32> to vector<2x256xf32>
    %273 = vector.extract_strided_slice %258 {offsets = [12, 0], sizes = [2, 256], strides = [1, 1]} : vector<16x384xf32> to vector<2x256xf32>
    %274 = vector.extract_strided_slice %258 {offsets = [14, 0], sizes = [2, 256], strides = [1, 1]} : vector<16x384xf32> to vector<2x256xf32>
    %275 = vector.extract_strided_slice %258 {offsets = [0, 256], sizes = [2, 128], strides = [1, 1]} : vector<16x384xf32> to vector<2x128xf32>
    %276 = vector.extract_strided_slice %258 {offsets = [2, 256], sizes = [2, 128], strides = [1, 1]} : vector<16x384xf32> to vector<2x128xf32>
    %277 = vector.extract_strided_slice %258 {offsets = [4, 256], sizes = [2, 128], strides = [1, 1]} : vector<16x384xf32> to vector<2x128xf32>
    %278 = vector.extract_strided_slice %258 {offsets = [6, 256], sizes = [2, 128], strides = [1, 1]} : vector<16x384xf32> to vector<2x128xf32>
    %279 = vector.extract_strided_slice %258 {offsets = [8, 256], sizes = [2, 128], strides = [1, 1]} : vector<16x384xf32> to vector<2x128xf32>
    %280 = vector.extract_strided_slice %258 {offsets = [10, 256], sizes = [2, 128], strides = [1, 1]} : vector<16x384xf32> to vector<2x128xf32>
    %281 = vector.extract_strided_slice %258 {offsets = [12, 256], sizes = [2, 128], strides = [1, 1]} : vector<16x384xf32> to vector<2x128xf32>
    %282 = vector.extract_strided_slice %258 {offsets = [14, 256], sizes = [2, 128], strides = [1, 1]} : vector<16x384xf32> to vector<2x128xf32>
    %283 = arith.select %27, %274, %267 : vector<2x256xi1>, vector<2x256xf32>
    %284 = arith.select %27, %273, %268 : vector<2x256xi1>, vector<2x256xf32>
    %285 = arith.select %27, %272, %269 : vector<2x256xi1>, vector<2x256xf32>
    %286 = arith.select %27, %271, %270 : vector<2x256xi1>, vector<2x256xf32>
    %287 = arith.select %27, %270, %271 : vector<2x256xi1>, vector<2x256xf32>
    %288 = arith.select %27, %269, %272 : vector<2x256xi1>, vector<2x256xf32>
    %289 = arith.select %27, %268, %273 : vector<2x256xi1>, vector<2x256xf32>
    %290 = arith.select %27, %267, %274 : vector<2x256xi1>, vector<2x256xf32>
    %291 = arith.select %30, %282, %275 : vector<2x128xi1>, vector<2x128xf32>
    %292 = arith.select %30, %281, %276 : vector<2x128xi1>, vector<2x128xf32>
    %293 = arith.select %30, %280, %277 : vector<2x128xi1>, vector<2x128xf32>
    %294 = arith.select %30, %279, %278 : vector<2x128xi1>, vector<2x128xf32>
    %295 = arith.select %30, %278, %279 : vector<2x128xi1>, vector<2x128xf32>
    %296 = arith.select %30, %277, %280 : vector<2x128xi1>, vector<2x128xf32>
    %297 = arith.select %30, %276, %281 : vector<2x128xi1>, vector<2x128xf32>
    %298 = arith.select %30, %275, %282 : vector<2x128xi1>, vector<2x128xf32>
    %cst_66 = arith.constant 0.000000e+00 : f32
    %299 = vector.broadcast %cst_66 : f32 to vector<2x128xf32>
    %300 = arith.truncf %299 : vector<2x128xf32> to vector<2x128xbf16>
    %cst_67 = arith.constant dense<0.000000e+00> : vector<2x256xf32>
    %301 = tpu.matmul %300, %261, %cst_67 {dimension_numbers = #tpu.dot_dimension_numbers<[1], [0], [0], [1], [0, 0, 1, 1], [], []>} : vector<2x128xbf16>, vector<128x256xbf16>, vector<2x256xf32> -> vector<2x256xf32>
    %cst_68 = arith.constant dense<0.000000e+00> : vector<2x128xf32>
    %302 = tpu.matmul %300, %262, %cst_68 {dimension_numbers = #tpu.dot_dimension_numbers<[1], [0], [0], [1], [0, 0, 1, 1], [], []>} : vector<2x128xbf16>, vector<128x128xbf16>, vector<2x128xf32> -> vector<2x128xf32>
    %303 = arith.addf %283, %301 : vector<2x256xf32>
    %304 = arith.negf %303 : vector<2x256xf32>
    %305 = math.exp %304 : vector<2x256xf32>
    %cst_69 = arith.constant 1.000000e+00 : f32
    %306 = vector.broadcast %cst_69 : f32 to vector<2x256xf32>
    %307 = arith.addf %306, %305 : vector<2x256xf32>
    %308 = arith.divf %306, %307 : vector<2x256xf32>
    %309 = vector.extract_strided_slice %308 {offsets = [0, 0], sizes = [2, 128], strides = [1, 1]} : vector<2x256xf32> to vector<2x128xf32>
    %310 = vector.extract_strided_slice %308 {offsets = [0, 128], sizes = [2, 128], strides = [1, 1]} : vector<2x256xf32> to vector<2x128xf32>
    %311 = arith.addf %302, %266 : vector<2x128xf32>
    %312 = arith.mulf %309, %311 : vector<2x128xf32>
    %313 = arith.addf %291, %312 : vector<2x128xf32>
    %314 = math.tanh %313 : vector<2x128xf32>
    %cst_70 = arith.constant 1.000000e+00 : f32
    %315 = vector.broadcast %cst_70 : f32 to vector<2x128xf32>
    %316 = arith.subf %315, %310 : vector<2x128xf32>
    %317 = arith.mulf %316, %314 : vector<2x128xf32>
    %318 = arith.mulf %310, %299 : vector<2x128xf32>
    %319 = arith.addf %317, %318 : vector<2x128xf32>
    %320 = arith.truncf %319 : vector<2x128xf32> to vector<2x128xbf16>
    %cst_71 = arith.constant dense<0.000000e+00> : vector<2x256xf32>
    %321 = tpu.matmul %320, %261, %cst_71 {dimension_numbers = #tpu.dot_dimension_numbers<[1], [0], [0], [1], [0, 0, 1, 1], [], []>} : vector<2x128xbf16>, vector<128x256xbf16>, vector<2x256xf32> -> vector<2x256xf32>
    %cst_72 = arith.constant dense<0.000000e+00> : vector<2x128xf32>
    %322 = tpu.matmul %320, %262, %cst_72 {dimension_numbers = #tpu.dot_dimension_numbers<[1], [0], [0], [1], [0, 0, 1, 1], [], []>} : vector<2x128xbf16>, vector<128x128xbf16>, vector<2x128xf32> -> vector<2x128xf32>
    %323 = arith.addf %284, %321 : vector<2x256xf32>
    %324 = arith.negf %323 : vector<2x256xf32>
    %325 = math.exp %324 : vector<2x256xf32>
    %cst_73 = arith.constant 1.000000e+00 : f32
    %326 = vector.broadcast %cst_73 : f32 to vector<2x256xf32>
    %327 = arith.addf %326, %325 : vector<2x256xf32>
    %328 = arith.divf %326, %327 : vector<2x256xf32>
    %329 = vector.extract_strided_slice %328 {offsets = [0, 0], sizes = [2, 128], strides = [1, 1]} : vector<2x256xf32> to vector<2x128xf32>
    %330 = vector.extract_strided_slice %328 {offsets = [0, 128], sizes = [2, 128], strides = [1, 1]} : vector<2x256xf32> to vector<2x128xf32>
    %331 = arith.addf %322, %266 : vector<2x128xf32>
    %332 = arith.mulf %329, %331 : vector<2x128xf32>
    %333 = arith.addf %292, %332 : vector<2x128xf32>
    %334 = math.tanh %333 : vector<2x128xf32>
    %cst_74 = arith.constant 1.000000e+00 : f32
    %335 = vector.broadcast %cst_74 : f32 to vector<2x128xf32>
    %336 = arith.subf %335, %330 : vector<2x128xf32>
    %337 = arith.mulf %336, %334 : vector<2x128xf32>
    %338 = arith.mulf %330, %319 : vector<2x128xf32>
    %339 = arith.addf %337, %338 : vector<2x128xf32>
    %340 = arith.truncf %339 : vector<2x128xf32> to vector<2x128xbf16>
    %cst_75 = arith.constant dense<0.000000e+00> : vector<2x256xf32>
    %341 = tpu.matmul %340, %261, %cst_75 {dimension_numbers = #tpu.dot_dimension_numbers<[1], [0], [0], [1], [0, 0, 1, 1], [], []>} : vector<2x128xbf16>, vector<128x256xbf16>, vector<2x256xf32> -> vector<2x256xf32>
    %cst_76 = arith.constant dense<0.000000e+00> : vector<2x128xf32>
    %342 = tpu.matmul %340, %262, %cst_76 {dimension_numbers = #tpu.dot_dimension_numbers<[1], [0], [0], [1], [0, 0, 1, 1], [], []>} : vector<2x128xbf16>, vector<128x128xbf16>, vector<2x128xf32> -> vector<2x128xf32>
    %343 = arith.addf %285, %341 : vector<2x256xf32>
    %344 = arith.negf %343 : vector<2x256xf32>
    %345 = math.exp %344 : vector<2x256xf32>
    %cst_77 = arith.constant 1.000000e+00 : f32
    %346 = vector.broadcast %cst_77 : f32 to vector<2x256xf32>
    %347 = arith.addf %346, %345 : vector<2x256xf32>
    %348 = arith.divf %346, %347 : vector<2x256xf32>
    %349 = vector.extract_strided_slice %348 {offsets = [0, 0], sizes = [2, 128], strides = [1, 1]} : vector<2x256xf32> to vector<2x128xf32>
    %350 = vector.extract_strided_slice %348 {offsets = [0, 128], sizes = [2, 128], strides = [1, 1]} : vector<2x256xf32> to vector<2x128xf32>
    %351 = arith.addf %342, %266 : vector<2x128xf32>
    %352 = arith.mulf %349, %351 : vector<2x128xf32>
    %353 = arith.addf %293, %352 : vector<2x128xf32>
    %354 = math.tanh %353 : vector<2x128xf32>
    %cst_78 = arith.constant 1.000000e+00 : f32
    %355 = vector.broadcast %cst_78 : f32 to vector<2x128xf32>
    %356 = arith.subf %355, %350 : vector<2x128xf32>
    %357 = arith.mulf %356, %354 : vector<2x128xf32>
    %358 = arith.mulf %350, %339 : vector<2x128xf32>
    %359 = arith.addf %357, %358 : vector<2x128xf32>
    %360 = arith.truncf %359 : vector<2x128xf32> to vector<2x128xbf16>
    %cst_79 = arith.constant dense<0.000000e+00> : vector<2x256xf32>
    %361 = tpu.matmul %360, %261, %cst_79 {dimension_numbers = #tpu.dot_dimension_numbers<[1], [0], [0], [1], [0, 0, 1, 1], [], []>} : vector<2x128xbf16>, vector<128x256xbf16>, vector<2x256xf32> -> vector<2x256xf32>
    %cst_80 = arith.constant dense<0.000000e+00> : vector<2x128xf32>
    %362 = tpu.matmul %360, %262, %cst_80 {dimension_numbers = #tpu.dot_dimension_numbers<[1], [0], [0], [1], [0, 0, 1, 1], [], []>} : vector<2x128xbf16>, vector<128x128xbf16>, vector<2x128xf32> -> vector<2x128xf32>
    %363 = arith.addf %286, %361 : vector<2x256xf32>
    %364 = arith.negf %363 : vector<2x256xf32>
    %365 = math.exp %364 : vector<2x256xf32>
    %cst_81 = arith.constant 1.000000e+00 : f32
    %366 = vector.broadcast %cst_81 : f32 to vector<2x256xf32>
    %367 = arith.addf %366, %365 : vector<2x256xf32>
    %368 = arith.divf %366, %367 : vector<2x256xf32>
    %369 = vector.extract_strided_slice %368 {offsets = [0, 0], sizes = [2, 128], strides = [1, 1]} : vector<2x256xf32> to vector<2x128xf32>
    %370 = vector.extract_strided_slice %368 {offsets = [0, 128], sizes = [2, 128], strides = [1, 1]} : vector<2x256xf32> to vector<2x128xf32>
    %371 = arith.addf %362, %266 : vector<2x128xf32>
    %372 = arith.mulf %369, %371 : vector<2x128xf32>
    %373 = arith.addf %294, %372 : vector<2x128xf32>
    %374 = math.tanh %373 : vector<2x128xf32>
    %cst_82 = arith.constant 1.000000e+00 : f32
    %375 = vector.broadcast %cst_82 : f32 to vector<2x128xf32>
    %376 = arith.subf %375, %370 : vector<2x128xf32>
    %377 = arith.mulf %376, %374 : vector<2x128xf32>
    %378 = arith.mulf %370, %359 : vector<2x128xf32>
    %379 = arith.addf %377, %378 : vector<2x128xf32>
    %380 = arith.truncf %379 : vector<2x128xf32> to vector<2x128xbf16>
    %cst_83 = arith.constant dense<0.000000e+00> : vector<2x256xf32>
    %381 = tpu.matmul %380, %261, %cst_83 {dimension_numbers = #tpu.dot_dimension_numbers<[1], [0], [0], [1], [0, 0, 1, 1], [], []>} : vector<2x128xbf16>, vector<128x256xbf16>, vector<2x256xf32> -> vector<2x256xf32>
    %cst_84 = arith.constant dense<0.000000e+00> : vector<2x128xf32>
    %382 = tpu.matmul %380, %262, %cst_84 {dimension_numbers = #tpu.dot_dimension_numbers<[1], [0], [0], [1], [0, 0, 1, 1], [], []>} : vector<2x128xbf16>, vector<128x128xbf16>, vector<2x128xf32> -> vector<2x128xf32>
    %383 = arith.addf %287, %381 : vector<2x256xf32>
    %384 = arith.negf %383 : vector<2x256xf32>
    %385 = math.exp %384 : vector<2x256xf32>
    %cst_85 = arith.constant 1.000000e+00 : f32
    %386 = vector.broadcast %cst_85 : f32 to vector<2x256xf32>
    %387 = arith.addf %386, %385 : vector<2x256xf32>
    %388 = arith.divf %386, %387 : vector<2x256xf32>
    %389 = vector.extract_strided_slice %388 {offsets = [0, 0], sizes = [2, 128], strides = [1, 1]} : vector<2x256xf32> to vector<2x128xf32>
    %390 = vector.extract_strided_slice %388 {offsets = [0, 128], sizes = [2, 128], strides = [1, 1]} : vector<2x256xf32> to vector<2x128xf32>
    %391 = arith.addf %382, %266 : vector<2x128xf32>
    %392 = arith.mulf %389, %391 : vector<2x128xf32>
    %393 = arith.addf %295, %392 : vector<2x128xf32>
    %394 = math.tanh %393 : vector<2x128xf32>
    %cst_86 = arith.constant 1.000000e+00 : f32
    %395 = vector.broadcast %cst_86 : f32 to vector<2x128xf32>
    %396 = arith.subf %395, %390 : vector<2x128xf32>
    %397 = arith.mulf %396, %394 : vector<2x128xf32>
    %398 = arith.mulf %390, %379 : vector<2x128xf32>
    %399 = arith.addf %397, %398 : vector<2x128xf32>
    %400 = arith.truncf %399 : vector<2x128xf32> to vector<2x128xbf16>
    %cst_87 = arith.constant dense<0.000000e+00> : vector<2x256xf32>
    %401 = tpu.matmul %400, %261, %cst_87 {dimension_numbers = #tpu.dot_dimension_numbers<[1], [0], [0], [1], [0, 0, 1, 1], [], []>} : vector<2x128xbf16>, vector<128x256xbf16>, vector<2x256xf32> -> vector<2x256xf32>
    %cst_88 = arith.constant dense<0.000000e+00> : vector<2x128xf32>
    %402 = tpu.matmul %400, %262, %cst_88 {dimension_numbers = #tpu.dot_dimension_numbers<[1], [0], [0], [1], [0, 0, 1, 1], [], []>} : vector<2x128xbf16>, vector<128x128xbf16>, vector<2x128xf32> -> vector<2x128xf32>
    %403 = arith.addf %288, %401 : vector<2x256xf32>
    %404 = arith.negf %403 : vector<2x256xf32>
    %405 = math.exp %404 : vector<2x256xf32>
    %cst_89 = arith.constant 1.000000e+00 : f32
    %406 = vector.broadcast %cst_89 : f32 to vector<2x256xf32>
    %407 = arith.addf %406, %405 : vector<2x256xf32>
    %408 = arith.divf %406, %407 : vector<2x256xf32>
    %409 = vector.extract_strided_slice %408 {offsets = [0, 0], sizes = [2, 128], strides = [1, 1]} : vector<2x256xf32> to vector<2x128xf32>
    %410 = vector.extract_strided_slice %408 {offsets = [0, 128], sizes = [2, 128], strides = [1, 1]} : vector<2x256xf32> to vector<2x128xf32>
    %411 = arith.addf %402, %266 : vector<2x128xf32>
    %412 = arith.mulf %409, %411 : vector<2x128xf32>
    %413 = arith.addf %296, %412 : vector<2x128xf32>
    %414 = math.tanh %413 : vector<2x128xf32>
    %cst_90 = arith.constant 1.000000e+00 : f32
    %415 = vector.broadcast %cst_90 : f32 to vector<2x128xf32>
    %416 = arith.subf %415, %410 : vector<2x128xf32>
    %417 = arith.mulf %416, %414 : vector<2x128xf32>
    %418 = arith.mulf %410, %399 : vector<2x128xf32>
    %419 = arith.addf %417, %418 : vector<2x128xf32>
    %420 = arith.truncf %419 : vector<2x128xf32> to vector<2x128xbf16>
    %cst_91 = arith.constant dense<0.000000e+00> : vector<2x256xf32>
    %421 = tpu.matmul %420, %261, %cst_91 {dimension_numbers = #tpu.dot_dimension_numbers<[1], [0], [0], [1], [0, 0, 1, 1], [], []>} : vector<2x128xbf16>, vector<128x256xbf16>, vector<2x256xf32> -> vector<2x256xf32>
    %cst_92 = arith.constant dense<0.000000e+00> : vector<2x128xf32>
    %422 = tpu.matmul %420, %262, %cst_92 {dimension_numbers = #tpu.dot_dimension_numbers<[1], [0], [0], [1], [0, 0, 1, 1], [], []>} : vector<2x128xbf16>, vector<128x128xbf16>, vector<2x128xf32> -> vector<2x128xf32>
    %423 = arith.addf %289, %421 : vector<2x256xf32>
    %424 = arith.negf %423 : vector<2x256xf32>
    %425 = math.exp %424 : vector<2x256xf32>
    %cst_93 = arith.constant 1.000000e+00 : f32
    %426 = vector.broadcast %cst_93 : f32 to vector<2x256xf32>
    %427 = arith.addf %426, %425 : vector<2x256xf32>
    %428 = arith.divf %426, %427 : vector<2x256xf32>
    %429 = vector.extract_strided_slice %428 {offsets = [0, 0], sizes = [2, 128], strides = [1, 1]} : vector<2x256xf32> to vector<2x128xf32>
    %430 = vector.extract_strided_slice %428 {offsets = [0, 128], sizes = [2, 128], strides = [1, 1]} : vector<2x256xf32> to vector<2x128xf32>
    %431 = arith.addf %422, %266 : vector<2x128xf32>
    %432 = arith.mulf %429, %431 : vector<2x128xf32>
    %433 = arith.addf %297, %432 : vector<2x128xf32>
    %434 = math.tanh %433 : vector<2x128xf32>
    %cst_94 = arith.constant 1.000000e+00 : f32
    %435 = vector.broadcast %cst_94 : f32 to vector<2x128xf32>
    %436 = arith.subf %435, %430 : vector<2x128xf32>
    %437 = arith.mulf %436, %434 : vector<2x128xf32>
    %438 = arith.mulf %430, %419 : vector<2x128xf32>
    %439 = arith.addf %437, %438 : vector<2x128xf32>
    %440 = arith.truncf %439 : vector<2x128xf32> to vector<2x128xbf16>
    %cst_95 = arith.constant dense<0.000000e+00> : vector<2x256xf32>
    %441 = tpu.matmul %440, %261, %cst_95 {dimension_numbers = #tpu.dot_dimension_numbers<[1], [0], [0], [1], [0, 0, 1, 1], [], []>} : vector<2x128xbf16>, vector<128x256xbf16>, vector<2x256xf32> -> vector<2x256xf32>
    %cst_96 = arith.constant dense<0.000000e+00> : vector<2x128xf32>
    %442 = tpu.matmul %440, %262, %cst_96 {dimension_numbers = #tpu.dot_dimension_numbers<[1], [0], [0], [1], [0, 0, 1, 1], [], []>} : vector<2x128xbf16>, vector<128x128xbf16>, vector<2x128xf32> -> vector<2x128xf32>
    %443 = arith.addf %290, %441 : vector<2x256xf32>
    %444 = arith.negf %443 : vector<2x256xf32>
    %445 = math.exp %444 : vector<2x256xf32>
    %cst_97 = arith.constant 1.000000e+00 : f32
    %446 = vector.broadcast %cst_97 : f32 to vector<2x256xf32>
    %447 = arith.addf %446, %445 : vector<2x256xf32>
    %448 = arith.divf %446, %447 : vector<2x256xf32>
    %449 = vector.extract_strided_slice %448 {offsets = [0, 0], sizes = [2, 128], strides = [1, 1]} : vector<2x256xf32> to vector<2x128xf32>
    %450 = vector.extract_strided_slice %448 {offsets = [0, 128], sizes = [2, 128], strides = [1, 1]} : vector<2x256xf32> to vector<2x128xf32>
    %451 = arith.addf %442, %266 : vector<2x128xf32>
    %452 = arith.mulf %449, %451 : vector<2x128xf32>
    %453 = arith.addf %298, %452 : vector<2x128xf32>
    %454 = math.tanh %453 : vector<2x128xf32>
    %cst_98 = arith.constant 1.000000e+00 : f32
    %455 = vector.broadcast %cst_98 : f32 to vector<2x128xf32>
    %456 = arith.subf %455, %450 : vector<2x128xf32>
    %457 = arith.mulf %456, %454 : vector<2x128xf32>
    %458 = arith.mulf %450, %439 : vector<2x128xf32>
    %459 = arith.addf %457, %458 : vector<2x128xf32>
    %460 = arith.select %32, %319, %459 : vector<2x128xi1>, vector<2x128xf32>
    %461 = arith.select %32, %339, %439 : vector<2x128xi1>, vector<2x128xf32>
    %462 = arith.select %32, %359, %419 : vector<2x128xi1>, vector<2x128xf32>
    %463 = arith.select %32, %379, %399 : vector<2x128xi1>, vector<2x128xf32>
    %464 = arith.select %32, %399, %379 : vector<2x128xi1>, vector<2x128xf32>
    %465 = arith.select %32, %419, %359 : vector<2x128xi1>, vector<2x128xf32>
    %466 = arith.select %32, %439, %339 : vector<2x128xi1>, vector<2x128xf32>
    %467 = arith.select %32, %459, %319 : vector<2x128xi1>, vector<2x128xf32>
    %468 = tpu.concatenate %460, %461, %462, %463, %464, %465, %466, %467 in 0 : vector<2x128xf32>, vector<2x128xf32>, vector<2x128xf32>, vector<2x128xf32>, vector<2x128xf32>, vector<2x128xf32>, vector<2x128xf32>, vector<2x128xf32> -> vector<16x128xf32>
    %469 = arith.truncf %468 : vector<16x128xf32> to vector<16x128xbf16>
    %c2 = arith.constant 2 : index
    %c0_99 = arith.constant 0 : index
    %c0_100 = arith.constant 0 : index
    %470 = vector.load %arg2[%c2, %c0_99, %c0_100] : memref<3x128x384xbf16, #tpu.memory_space<vmem>>, vector<1x128x384xbf16>
    %471 = vector.shape_cast %470 : vector<1x128x384xbf16> to vector<128x384xbf16>
    %cst_101 = arith.constant dense<0.000000e+00> : vector<16x384xf32>
    %472 = tpu.matmul %469, %471, %cst_101 {dimension_numbers = #tpu.dot_dimension_numbers<[1], [0], [0], [1], [0, 0, 1, 1], [], []>} : vector<16x128xbf16>, vector<128x384xbf16>, vector<16x384xf32> -> vector<16x384xf32>
    %c2_102 = arith.constant 2 : index
    %c0_103 = arith.constant 0 : index
    %c0_104 = arith.constant 0 : index
    %473 = vector.load %arg4[%c2_102, %c0_103, %c0_104] : memref<3x1x384xf32, #tpu.memory_space<vmem>>, vector<1x1x384xf32>
    %474 = vector.shape_cast %473 : vector<1x1x384xf32> to vector<1x384xf32>
    %475 = vector.broadcast %474 : vector<1x384xf32> to vector<16x384xf32>
    %476 = arith.addf %472, %475 : vector<16x384xf32>
    %c2_105 = arith.constant 2 : index
    %c0_106 = arith.constant 0 : index
    %c0_107 = arith.constant 0 : index
    %477 = vector.load %arg3[%c2_105, %c0_106, %c0_107] : memref<3x128x384xbf16, #tpu.memory_space<vmem>>, vector<1x128x384xbf16>
    %478 = vector.shape_cast %477 : vector<1x128x384xbf16> to vector<128x384xbf16>
    %479 = vector.extract_strided_slice %478 {offsets = [0, 0], sizes = [128, 256], strides = [1, 1]} : vector<128x384xbf16> to vector<128x256xbf16>
    %480 = vector.extract_strided_slice %478 {offsets = [0, 256], sizes = [128, 128], strides = [1, 1]} : vector<128x384xbf16> to vector<128x128xbf16>
    %c2_108 = arith.constant 2 : index
    %c0_109 = arith.constant 0 : index
    %c0_110 = arith.constant 0 : index
    %481 = vector.load %arg5[%c2_108, %c0_109, %c0_110] : memref<3x1x128xf32, #tpu.memory_space<vmem>>, vector<1x1x128xf32>
    %482 = vector.shape_cast %481 : vector<1x1x128xf32> to vector<1x128xf32>
    %483 = vector.shape_cast %482 : vector<1x128xf32> to vector<1x128xf32>
    %484 = vector.broadcast %483 : vector<1x128xf32> to vector<2x128xf32>
    %485 = vector.extract_strided_slice %476 {offsets = [0, 0], sizes = [2, 256], strides = [1, 1]} : vector<16x384xf32> to vector<2x256xf32>
    %486 = vector.extract_strided_slice %476 {offsets = [2, 0], sizes = [2, 256], strides = [1, 1]} : vector<16x384xf32> to vector<2x256xf32>
    %487 = vector.extract_strided_slice %476 {offsets = [4, 0], sizes = [2, 256], strides = [1, 1]} : vector<16x384xf32> to vector<2x256xf32>
    %488 = vector.extract_strided_slice %476 {offsets = [6, 0], sizes = [2, 256], strides = [1, 1]} : vector<16x384xf32> to vector<2x256xf32>
    %489 = vector.extract_strided_slice %476 {offsets = [8, 0], sizes = [2, 256], strides = [1, 1]} : vector<16x384xf32> to vector<2x256xf32>
    %490 = vector.extract_strided_slice %476 {offsets = [10, 0], sizes = [2, 256], strides = [1, 1]} : vector<16x384xf32> to vector<2x256xf32>
    %491 = vector.extract_strided_slice %476 {offsets = [12, 0], sizes = [2, 256], strides = [1, 1]} : vector<16x384xf32> to vector<2x256xf32>
    %492 = vector.extract_strided_slice %476 {offsets = [14, 0], sizes = [2, 256], strides = [1, 1]} : vector<16x384xf32> to vector<2x256xf32>
    %493 = vector.extract_strided_slice %476 {offsets = [0, 256], sizes = [2, 128], strides = [1, 1]} : vector<16x384xf32> to vector<2x128xf32>
    %494 = vector.extract_strided_slice %476 {offsets = [2, 256], sizes = [2, 128], strides = [1, 1]} : vector<16x384xf32> to vector<2x128xf32>
    %495 = vector.extract_strided_slice %476 {offsets = [4, 256], sizes = [2, 128], strides = [1, 1]} : vector<16x384xf32> to vector<2x128xf32>
    %496 = vector.extract_strided_slice %476 {offsets = [6, 256], sizes = [2, 128], strides = [1, 1]} : vector<16x384xf32> to vector<2x128xf32>
    %497 = vector.extract_strided_slice %476 {offsets = [8, 256], sizes = [2, 128], strides = [1, 1]} : vector<16x384xf32> to vector<2x128xf32>
    %498 = vector.extract_strided_slice %476 {offsets = [10, 256], sizes = [2, 128], strides = [1, 1]} : vector<16x384xf32> to vector<2x128xf32>
    %499 = vector.extract_strided_slice %476 {offsets = [12, 256], sizes = [2, 128], strides = [1, 1]} : vector<16x384xf32> to vector<2x128xf32>
    %500 = vector.extract_strided_slice %476 {offsets = [14, 256], sizes = [2, 128], strides = [1, 1]} : vector<16x384xf32> to vector<2x128xf32>
    %501 = arith.select %27, %492, %485 : vector<2x256xi1>, vector<2x256xf32>
    %502 = arith.select %27, %491, %486 : vector<2x256xi1>, vector<2x256xf32>
    %503 = arith.select %27, %490, %487 : vector<2x256xi1>, vector<2x256xf32>
    %504 = arith.select %27, %489, %488 : vector<2x256xi1>, vector<2x256xf32>
    %505 = arith.select %27, %488, %489 : vector<2x256xi1>, vector<2x256xf32>
    %506 = arith.select %27, %487, %490 : vector<2x256xi1>, vector<2x256xf32>
    %507 = arith.select %27, %486, %491 : vector<2x256xi1>, vector<2x256xf32>
    %508 = arith.select %27, %485, %492 : vector<2x256xi1>, vector<2x256xf32>
    %509 = arith.select %30, %500, %493 : vector<2x128xi1>, vector<2x128xf32>
    %510 = arith.select %30, %499, %494 : vector<2x128xi1>, vector<2x128xf32>
    %511 = arith.select %30, %498, %495 : vector<2x128xi1>, vector<2x128xf32>
    %512 = arith.select %30, %497, %496 : vector<2x128xi1>, vector<2x128xf32>
    %513 = arith.select %30, %496, %497 : vector<2x128xi1>, vector<2x128xf32>
    %514 = arith.select %30, %495, %498 : vector<2x128xi1>, vector<2x128xf32>
    %515 = arith.select %30, %494, %499 : vector<2x128xi1>, vector<2x128xf32>
    %516 = arith.select %30, %493, %500 : vector<2x128xi1>, vector<2x128xf32>
    %cst_111 = arith.constant 0.000000e+00 : f32
    %517 = vector.broadcast %cst_111 : f32 to vector<2x128xf32>
    %518 = arith.truncf %517 : vector<2x128xf32> to vector<2x128xbf16>
    %cst_112 = arith.constant dense<0.000000e+00> : vector<2x256xf32>
    %519 = tpu.matmul %518, %479, %cst_112 {dimension_numbers = #tpu.dot_dimension_numbers<[1], [0], [0], [1], [0, 0, 1, 1], [], []>} : vector<2x128xbf16>, vector<128x256xbf16>, vector<2x256xf32> -> vector<2x256xf32>
    %cst_113 = arith.constant dense<0.000000e+00> : vector<2x128xf32>
    %520 = tpu.matmul %518, %480, %cst_113 {dimension_numbers = #tpu.dot_dimension_numbers<[1], [0], [0], [1], [0, 0, 1, 1], [], []>} : vector<2x128xbf16>, vector<128x128xbf16>, vector<2x128xf32> -> vector<2x128xf32>
    %521 = arith.addf %501, %519 : vector<2x256xf32>
    %522 = arith.negf %521 : vector<2x256xf32>
    %523 = math.exp %522 : vector<2x256xf32>
    %cst_114 = arith.constant 1.000000e+00 : f32
    %524 = vector.broadcast %cst_114 : f32 to vector<2x256xf32>
    %525 = arith.addf %524, %523 : vector<2x256xf32>
    %526 = arith.divf %524, %525 : vector<2x256xf32>
    %527 = vector.extract_strided_slice %526 {offsets = [0, 0], sizes = [2, 128], strides = [1, 1]} : vector<2x256xf32> to vector<2x128xf32>
    %528 = vector.extract_strided_slice %526 {offsets = [0, 128], sizes = [2, 128], strides = [1, 1]} : vector<2x256xf32> to vector<2x128xf32>
    %529 = arith.addf %520, %484 : vector<2x128xf32>
    %530 = arith.mulf %527, %529 : vector<2x128xf32>
    %531 = arith.addf %509, %530 : vector<2x128xf32>
    %532 = math.tanh %531 : vector<2x128xf32>
    %cst_115 = arith.constant 1.000000e+00 : f32
    %533 = vector.broadcast %cst_115 : f32 to vector<2x128xf32>
    %534 = arith.subf %533, %528 : vector<2x128xf32>
    %535 = arith.mulf %534, %532 : vector<2x128xf32>
    %536 = arith.mulf %528, %517 : vector<2x128xf32>
    %537 = arith.addf %535, %536 : vector<2x128xf32>
    %538 = arith.truncf %537 : vector<2x128xf32> to vector<2x128xbf16>
    %cst_116 = arith.constant dense<0.000000e+00> : vector<2x256xf32>
    %539 = tpu.matmul %538, %479, %cst_116 {dimension_numbers = #tpu.dot_dimension_numbers<[1], [0], [0], [1], [0, 0, 1, 1], [], []>} : vector<2x128xbf16>, vector<128x256xbf16>, vector<2x256xf32> -> vector<2x256xf32>
    %cst_117 = arith.constant dense<0.000000e+00> : vector<2x128xf32>
    %540 = tpu.matmul %538, %480, %cst_117 {dimension_numbers = #tpu.dot_dimension_numbers<[1], [0], [0], [1], [0, 0, 1, 1], [], []>} : vector<2x128xbf16>, vector<128x128xbf16>, vector<2x128xf32> -> vector<2x128xf32>
    %541 = arith.addf %502, %539 : vector<2x256xf32>
    %542 = arith.negf %541 : vector<2x256xf32>
    %543 = math.exp %542 : vector<2x256xf32>
    %cst_118 = arith.constant 1.000000e+00 : f32
    %544 = vector.broadcast %cst_118 : f32 to vector<2x256xf32>
    %545 = arith.addf %544, %543 : vector<2x256xf32>
    %546 = arith.divf %544, %545 : vector<2x256xf32>
    %547 = vector.extract_strided_slice %546 {offsets = [0, 0], sizes = [2, 128], strides = [1, 1]} : vector<2x256xf32> to vector<2x128xf32>
    %548 = vector.extract_strided_slice %546 {offsets = [0, 128], sizes = [2, 128], strides = [1, 1]} : vector<2x256xf32> to vector<2x128xf32>
    %549 = arith.addf %540, %484 : vector<2x128xf32>
    %550 = arith.mulf %547, %549 : vector<2x128xf32>
    %551 = arith.addf %510, %550 : vector<2x128xf32>
    %552 = math.tanh %551 : vector<2x128xf32>
    %cst_119 = arith.constant 1.000000e+00 : f32
    %553 = vector.broadcast %cst_119 : f32 to vector<2x128xf32>
    %554 = arith.subf %553, %548 : vector<2x128xf32>
    %555 = arith.mulf %554, %552 : vector<2x128xf32>
    %556 = arith.mulf %548, %537 : vector<2x128xf32>
    %557 = arith.addf %555, %556 : vector<2x128xf32>
    %558 = arith.truncf %557 : vector<2x128xf32> to vector<2x128xbf16>
    %cst_120 = arith.constant dense<0.000000e+00> : vector<2x256xf32>
    %559 = tpu.matmul %558, %479, %cst_120 {dimension_numbers = #tpu.dot_dimension_numbers<[1], [0], [0], [1], [0, 0, 1, 1], [], []>} : vector<2x128xbf16>, vector<128x256xbf16>, vector<2x256xf32> -> vector<2x256xf32>
    %cst_121 = arith.constant dense<0.000000e+00> : vector<2x128xf32>
    %560 = tpu.matmul %558, %480, %cst_121 {dimension_numbers = #tpu.dot_dimension_numbers<[1], [0], [0], [1], [0, 0, 1, 1], [], []>} : vector<2x128xbf16>, vector<128x128xbf16>, vector<2x128xf32> -> vector<2x128xf32>
    %561 = arith.addf %503, %559 : vector<2x256xf32>
    %562 = arith.negf %561 : vector<2x256xf32>
    %563 = math.exp %562 : vector<2x256xf32>
    %cst_122 = arith.constant 1.000000e+00 : f32
    %564 = vector.broadcast %cst_122 : f32 to vector<2x256xf32>
    %565 = arith.addf %564, %563 : vector<2x256xf32>
    %566 = arith.divf %564, %565 : vector<2x256xf32>
    %567 = vector.extract_strided_slice %566 {offsets = [0, 0], sizes = [2, 128], strides = [1, 1]} : vector<2x256xf32> to vector<2x128xf32>
    %568 = vector.extract_strided_slice %566 {offsets = [0, 128], sizes = [2, 128], strides = [1, 1]} : vector<2x256xf32> to vector<2x128xf32>
    %569 = arith.addf %560, %484 : vector<2x128xf32>
    %570 = arith.mulf %567, %569 : vector<2x128xf32>
    %571 = arith.addf %511, %570 : vector<2x128xf32>
    %572 = math.tanh %571 : vector<2x128xf32>
    %cst_123 = arith.constant 1.000000e+00 : f32
    %573 = vector.broadcast %cst_123 : f32 to vector<2x128xf32>
    %574 = arith.subf %573, %568 : vector<2x128xf32>
    %575 = arith.mulf %574, %572 : vector<2x128xf32>
    %576 = arith.mulf %568, %557 : vector<2x128xf32>
    %577 = arith.addf %575, %576 : vector<2x128xf32>
    %578 = arith.truncf %577 : vector<2x128xf32> to vector<2x128xbf16>
    %cst_124 = arith.constant dense<0.000000e+00> : vector<2x256xf32>
    %579 = tpu.matmul %578, %479, %cst_124 {dimension_numbers = #tpu.dot_dimension_numbers<[1], [0], [0], [1], [0, 0, 1, 1], [], []>} : vector<2x128xbf16>, vector<128x256xbf16>, vector<2x256xf32> -> vector<2x256xf32>
    %cst_125 = arith.constant dense<0.000000e+00> : vector<2x128xf32>
    %580 = tpu.matmul %578, %480, %cst_125 {dimension_numbers = #tpu.dot_dimension_numbers<[1], [0], [0], [1], [0, 0, 1, 1], [], []>} : vector<2x128xbf16>, vector<128x128xbf16>, vector<2x128xf32> -> vector<2x128xf32>
    %581 = arith.addf %504, %579 : vector<2x256xf32>
    %582 = arith.negf %581 : vector<2x256xf32>
    %583 = math.exp %582 : vector<2x256xf32>
    %cst_126 = arith.constant 1.000000e+00 : f32
    %584 = vector.broadcast %cst_126 : f32 to vector<2x256xf32>
    %585 = arith.addf %584, %583 : vector<2x256xf32>
    %586 = arith.divf %584, %585 : vector<2x256xf32>
    %587 = vector.extract_strided_slice %586 {offsets = [0, 0], sizes = [2, 128], strides = [1, 1]} : vector<2x256xf32> to vector<2x128xf32>
    %588 = vector.extract_strided_slice %586 {offsets = [0, 128], sizes = [2, 128], strides = [1, 1]} : vector<2x256xf32> to vector<2x128xf32>
    %589 = arith.addf %580, %484 : vector<2x128xf32>
    %590 = arith.mulf %587, %589 : vector<2x128xf32>
    %591 = arith.addf %512, %590 : vector<2x128xf32>
    %592 = math.tanh %591 : vector<2x128xf32>
    %cst_127 = arith.constant 1.000000e+00 : f32
    %593 = vector.broadcast %cst_127 : f32 to vector<2x128xf32>
    %594 = arith.subf %593, %588 : vector<2x128xf32>
    %595 = arith.mulf %594, %592 : vector<2x128xf32>
    %596 = arith.mulf %588, %577 : vector<2x128xf32>
    %597 = arith.addf %595, %596 : vector<2x128xf32>
    %598 = arith.truncf %597 : vector<2x128xf32> to vector<2x128xbf16>
    %cst_128 = arith.constant dense<0.000000e+00> : vector<2x256xf32>
    %599 = tpu.matmul %598, %479, %cst_128 {dimension_numbers = #tpu.dot_dimension_numbers<[1], [0], [0], [1], [0, 0, 1, 1], [], []>} : vector<2x128xbf16>, vector<128x256xbf16>, vector<2x256xf32> -> vector<2x256xf32>
    %cst_129 = arith.constant dense<0.000000e+00> : vector<2x128xf32>
    %600 = tpu.matmul %598, %480, %cst_129 {dimension_numbers = #tpu.dot_dimension_numbers<[1], [0], [0], [1], [0, 0, 1, 1], [], []>} : vector<2x128xbf16>, vector<128x128xbf16>, vector<2x128xf32> -> vector<2x128xf32>
    %601 = arith.addf %505, %599 : vector<2x256xf32>
    %602 = arith.negf %601 : vector<2x256xf32>
    %603 = math.exp %602 : vector<2x256xf32>
    %cst_130 = arith.constant 1.000000e+00 : f32
    %604 = vector.broadcast %cst_130 : f32 to vector<2x256xf32>
    %605 = arith.addf %604, %603 : vector<2x256xf32>
    %606 = arith.divf %604, %605 : vector<2x256xf32>
    %607 = vector.extract_strided_slice %606 {offsets = [0, 0], sizes = [2, 128], strides = [1, 1]} : vector<2x256xf32> to vector<2x128xf32>
    %608 = vector.extract_strided_slice %606 {offsets = [0, 128], sizes = [2, 128], strides = [1, 1]} : vector<2x256xf32> to vector<2x128xf32>
    %609 = arith.addf %600, %484 : vector<2x128xf32>
    %610 = arith.mulf %607, %609 : vector<2x128xf32>
    %611 = arith.addf %513, %610 : vector<2x128xf32>
    %612 = math.tanh %611 : vector<2x128xf32>
    %cst_131 = arith.constant 1.000000e+00 : f32
    %613 = vector.broadcast %cst_131 : f32 to vector<2x128xf32>
    %614 = arith.subf %613, %608 : vector<2x128xf32>
    %615 = arith.mulf %614, %612 : vector<2x128xf32>
    %616 = arith.mulf %608, %597 : vector<2x128xf32>
    %617 = arith.addf %615, %616 : vector<2x128xf32>
    %618 = arith.truncf %617 : vector<2x128xf32> to vector<2x128xbf16>
    %cst_132 = arith.constant dense<0.000000e+00> : vector<2x256xf32>
    %619 = tpu.matmul %618, %479, %cst_132 {dimension_numbers = #tpu.dot_dimension_numbers<[1], [0], [0], [1], [0, 0, 1, 1], [], []>} : vector<2x128xbf16>, vector<128x256xbf16>, vector<2x256xf32> -> vector<2x256xf32>
    %cst_133 = arith.constant dense<0.000000e+00> : vector<2x128xf32>
    %620 = tpu.matmul %618, %480, %cst_133 {dimension_numbers = #tpu.dot_dimension_numbers<[1], [0], [0], [1], [0, 0, 1, 1], [], []>} : vector<2x128xbf16>, vector<128x128xbf16>, vector<2x128xf32> -> vector<2x128xf32>
    %621 = arith.addf %506, %619 : vector<2x256xf32>
    %622 = arith.negf %621 : vector<2x256xf32>
    %623 = math.exp %622 : vector<2x256xf32>
    %cst_134 = arith.constant 1.000000e+00 : f32
    %624 = vector.broadcast %cst_134 : f32 to vector<2x256xf32>
    %625 = arith.addf %624, %623 : vector<2x256xf32>
    %626 = arith.divf %624, %625 : vector<2x256xf32>
    %627 = vector.extract_strided_slice %626 {offsets = [0, 0], sizes = [2, 128], strides = [1, 1]} : vector<2x256xf32> to vector<2x128xf32>
    %628 = vector.extract_strided_slice %626 {offsets = [0, 128], sizes = [2, 128], strides = [1, 1]} : vector<2x256xf32> to vector<2x128xf32>
    %629 = arith.addf %620, %484 : vector<2x128xf32>
    %630 = arith.mulf %627, %629 : vector<2x128xf32>
    %631 = arith.addf %514, %630 : vector<2x128xf32>
    %632 = math.tanh %631 : vector<2x128xf32>
    %cst_135 = arith.constant 1.000000e+00 : f32
    %633 = vector.broadcast %cst_135 : f32 to vector<2x128xf32>
    %634 = arith.subf %633, %628 : vector<2x128xf32>
    %635 = arith.mulf %634, %632 : vector<2x128xf32>
    %636 = arith.mulf %628, %617 : vector<2x128xf32>
    %637 = arith.addf %635, %636 : vector<2x128xf32>
    %638 = arith.truncf %637 : vector<2x128xf32> to vector<2x128xbf16>
    %cst_136 = arith.constant dense<0.000000e+00> : vector<2x256xf32>
    %639 = tpu.matmul %638, %479, %cst_136 {dimension_numbers = #tpu.dot_dimension_numbers<[1], [0], [0], [1], [0, 0, 1, 1], [], []>} : vector<2x128xbf16>, vector<128x256xbf16>, vector<2x256xf32> -> vector<2x256xf32>
    %cst_137 = arith.constant dense<0.000000e+00> : vector<2x128xf32>
    %640 = tpu.matmul %638, %480, %cst_137 {dimension_numbers = #tpu.dot_dimension_numbers<[1], [0], [0], [1], [0, 0, 1, 1], [], []>} : vector<2x128xbf16>, vector<128x128xbf16>, vector<2x128xf32> -> vector<2x128xf32>
    %641 = arith.addf %507, %639 : vector<2x256xf32>
    %642 = arith.negf %641 : vector<2x256xf32>
    %643 = math.exp %642 : vector<2x256xf32>
    %cst_138 = arith.constant 1.000000e+00 : f32
    %644 = vector.broadcast %cst_138 : f32 to vector<2x256xf32>
    %645 = arith.addf %644, %643 : vector<2x256xf32>
    %646 = arith.divf %644, %645 : vector<2x256xf32>
    %647 = vector.extract_strided_slice %646 {offsets = [0, 0], sizes = [2, 128], strides = [1, 1]} : vector<2x256xf32> to vector<2x128xf32>
    %648 = vector.extract_strided_slice %646 {offsets = [0, 128], sizes = [2, 128], strides = [1, 1]} : vector<2x256xf32> to vector<2x128xf32>
    %649 = arith.addf %640, %484 : vector<2x128xf32>
    %650 = arith.mulf %647, %649 : vector<2x128xf32>
    %651 = arith.addf %515, %650 : vector<2x128xf32>
    %652 = math.tanh %651 : vector<2x128xf32>
    %cst_139 = arith.constant 1.000000e+00 : f32
    %653 = vector.broadcast %cst_139 : f32 to vector<2x128xf32>
    %654 = arith.subf %653, %648 : vector<2x128xf32>
    %655 = arith.mulf %654, %652 : vector<2x128xf32>
    %656 = arith.mulf %648, %637 : vector<2x128xf32>
    %657 = arith.addf %655, %656 : vector<2x128xf32>
    %658 = arith.truncf %657 : vector<2x128xf32> to vector<2x128xbf16>
    %cst_140 = arith.constant dense<0.000000e+00> : vector<2x256xf32>
    %659 = tpu.matmul %658, %479, %cst_140 {dimension_numbers = #tpu.dot_dimension_numbers<[1], [0], [0], [1], [0, 0, 1, 1], [], []>} : vector<2x128xbf16>, vector<128x256xbf16>, vector<2x256xf32> -> vector<2x256xf32>
    %cst_141 = arith.constant dense<0.000000e+00> : vector<2x128xf32>
    %660 = tpu.matmul %658, %480, %cst_141 {dimension_numbers = #tpu.dot_dimension_numbers<[1], [0], [0], [1], [0, 0, 1, 1], [], []>} : vector<2x128xbf16>, vector<128x128xbf16>, vector<2x128xf32> -> vector<2x128xf32>
    %661 = arith.addf %508, %659 : vector<2x256xf32>
    %662 = arith.negf %661 : vector<2x256xf32>
    %663 = math.exp %662 : vector<2x256xf32>
    %cst_142 = arith.constant 1.000000e+00 : f32
    %664 = vector.broadcast %cst_142 : f32 to vector<2x256xf32>
    %665 = arith.addf %664, %663 : vector<2x256xf32>
    %666 = arith.divf %664, %665 : vector<2x256xf32>
    %667 = vector.extract_strided_slice %666 {offsets = [0, 0], sizes = [2, 128], strides = [1, 1]} : vector<2x256xf32> to vector<2x128xf32>
    %668 = vector.extract_strided_slice %666 {offsets = [0, 128], sizes = [2, 128], strides = [1, 1]} : vector<2x256xf32> to vector<2x128xf32>
    %669 = arith.addf %660, %484 : vector<2x128xf32>
    %670 = arith.mulf %667, %669 : vector<2x128xf32>
    %671 = arith.addf %516, %670 : vector<2x128xf32>
    %672 = math.tanh %671 : vector<2x128xf32>
    %cst_143 = arith.constant 1.000000e+00 : f32
    %673 = vector.broadcast %cst_143 : f32 to vector<2x128xf32>
    %674 = arith.subf %673, %668 : vector<2x128xf32>
    %675 = arith.mulf %674, %672 : vector<2x128xf32>
    %676 = arith.mulf %668, %657 : vector<2x128xf32>
    %677 = arith.addf %675, %676 : vector<2x128xf32>
    %678 = arith.select %32, %537, %677 : vector<2x128xi1>, vector<2x128xf32>
    %679 = arith.select %32, %557, %657 : vector<2x128xi1>, vector<2x128xf32>
    %680 = arith.select %32, %577, %637 : vector<2x128xi1>, vector<2x128xf32>
    %681 = arith.select %32, %597, %617 : vector<2x128xi1>, vector<2x128xf32>
    %682 = arith.select %32, %617, %597 : vector<2x128xi1>, vector<2x128xf32>
    %683 = arith.select %32, %637, %577 : vector<2x128xi1>, vector<2x128xf32>
    %684 = arith.select %32, %657, %557 : vector<2x128xi1>, vector<2x128xf32>
    %685 = arith.select %32, %677, %537 : vector<2x128xi1>, vector<2x128xf32>
    %686 = tpu.concatenate %678, %679, %680, %681, %682, %683, %684, %685 in 0 : vector<2x128xf32>, vector<2x128xf32>, vector<2x128xf32>, vector<2x128xf32>, vector<2x128xf32>, vector<2x128xf32>, vector<2x128xf32>, vector<2x128xf32> -> vector<16x128xf32>
    %c1_i32_144 = arith.constant 1 : i32
    %687 = vector.broadcast %c1_i32_144 : i32 to vector<16x1xi32>
    %688 = arith.cmpi eq, %0, %687 : vector<16x1xi32>
    %689 = arith.extui %688 : vector<16x1xi1> to vector<16x1xi32>
    %690 = arith.sitofp %689 : vector<16x1xi32> to vector<16x1xf32>
    %c0_145 = arith.constant 0 : index
    %c0_146 = arith.constant 0 : index
    %691 = vector.load %arg6[%c0_145, %c0_146] : memref<128x1xf32, #tpu.memory_space<vmem>>, vector<128x1xf32>
    %cst_147 = arith.constant dense<0.000000e+00> : vector<16x1xf32>
    %692 = tpu.matmul %686, %691, %cst_147 {dimension_numbers = #tpu.dot_dimension_numbers<[1], [0], [0], [1], [0, 0, 1, 1], [], []>} : vector<16x128xf32>, vector<128x1xf32>, vector<16x1xf32> -> vector<16x1xf32>
    %c0_148 = arith.constant 0 : index
    %c0_149 = arith.constant 0 : index
    %693 = vector.load %arg7[%c0_148, %c0_149] : memref<1x1xf32, #tpu.memory_space<vmem>>, vector<1x1xf32>
    %694 = vector.broadcast %693 : vector<1x1xf32> to vector<16x1xf32>
    %695 = arith.addf %692, %694 : vector<16x1xf32>
    %cst_150 = arith.constant 1.000000e+10 : f32
    %696 = vector.broadcast %cst_150 : f32 to vector<16x1xf32>
    %697 = arith.mulf %696, %690 : vector<16x1xf32>
    %698 = arith.subf %695, %697 : vector<16x1xf32>
    %cst_151 = arith.constant dense<0xFF800000> : vector<1xf32>
    %699 = vector.multi_reduction <maximumf>, %698, %cst_151 [0] : vector<16x1xf32> to vector<1xf32>
    %700 = vector.shape_cast %699 : vector<1xf32> to vector<1x1xf32>
    %701 = vector.broadcast %700 : vector<1x1xf32> to vector<16x1xf32>
    %702 = arith.subf %698, %701 : vector<16x1xf32>
    %703 = math.exp %702 : vector<16x1xf32>
    %704 = vector.broadcast %703 : vector<16x1xf32> to vector<16x128xf32>
    %705 = arith.mulf %704, %686 : vector<16x128xf32>
    %c0_152 = arith.constant 0 : index
    %c0_153 = arith.constant 0 : index
    %706 = vector.load %arg8[%c0_152, %c0_153] : memref<2x16xf32, #tpu.memory_space<vmem>>, vector<2x16xf32>
    %cst_154 = arith.constant dense<0.000000e+00> : vector<2x1xf32>
    %707 = tpu.matmul %706, %703, %cst_154 {dimension_numbers = #tpu.dot_dimension_numbers<[1], [0], [0], [1], [0, 0, 1, 1], [], []>} : vector<2x16xf32>, vector<16x1xf32>, vector<2x1xf32> -> vector<2x1xf32>
    %c0_155 = arith.constant 0 : index
    %c0_156 = arith.constant 0 : index
    %708 = vector.load %arg8[%c0_155, %c0_156] : memref<2x16xf32, #tpu.memory_space<vmem>>, vector<2x16xf32>
    %cst_157 = arith.constant dense<0.000000e+00> : vector<2x128xf32>
    %709 = tpu.matmul %708, %705, %cst_157 {dimension_numbers = #tpu.dot_dimension_numbers<[1], [0], [0], [1], [0, 0, 1, 1], [], []>} : vector<2x16xf32>, vector<16x128xf32>, vector<2x128xf32> -> vector<2x128xf32>
    %710 = tpu.reciprocal %707 : vector<2x1xf32> -> vector<2x1xf32>
    %711 = vector.broadcast %710 : vector<2x1xf32> to vector<2x128xf32>
    %712 = arith.mulf %709, %711 : vector<2x128xf32>
    %c0_158 = arith.constant 0 : index
    %c0_159 = arith.constant 0 : index
    %713 = vector.load %arg9[%c0_158, %c0_159] : memref<2x128xf32, #tpu.memory_space<vmem>>, vector<2x128xf32>
    tpu.vector_store %arg9[%c0_158, %c0_159], %712 {strides = array<i32>} : memref<2x128xf32, #tpu.memory_space<vmem>>, vector<2x128xf32>,
    return
  }
}

</mosaic_0001>

<bundles_post_ra>
// kernel: _lambda_.1
= control target key start
LH: loop header
LB: loop body
LE: loop exit
PB: predicated region body
PF: predicated region fallthrough
CT: control target
= control target key end

     0   :  { %s8959_s0 = inlined_call_operand.vmem [shape: s32[16,1], index: 0, kind: input, shape index: {}]   ;;  %s8960_s1 = inlined_call_operand.vmem [shape: bf16[128,128], index: 1, kind: input, shape index: {}]   ;;  %s8961_s2 = inlined_call_operand.vmem [shape: bf16[3,128,384], index: 2, kind: input, shape index: {}]   ;;  %s8962_s3 = inlined_call_operand.vmem [shape: bf16[3,128,384], index: 3, kind: input, shape index: {}]   ;;  %s8963_s4 = inlined_call_operand.vmem [shape: f32[3,1,384], index: 4, kind: input, shape index: {}]   ;;  %s8964_s5 = inlined_call_operand.vmem [shape: f32[3,1,128], index: 5, kind: input, shape index: {}]   ;;  %s8965_s6 = inlined_call_operand.vmem [shape: f32[128,1], index: 6, kind: input, shape index: {}]   ;;  %s8966_s7 = inlined_call_operand.<no memory space> [shape: f32[1,1], index: 7, kind: input, shape index: {}]   ;;  %s8967_s8 = inlined_call_operand.vmem [shape: f32[2,16], index: 8, kind: input, shape index: {}]   ;;  %s8968_s9 = inlined_call_operand.hbm [shape: f32[2,128], index: 9, kind: output, shape index: {}]  }
   0x1   :  { %v14_v0 = vstv %s8966_s7 }
   0x2   :  { %15 = vst [vmem:[#allocation2] sm:$0x1] %v14_v0 }
   0x3   :  { %v36_v1 = vld [vmem:[%s8959_s0] sm:$0xff]  ;;  %v6631_v2 = vmov 0   ;;  %v6632_v3 = vmov 0.0   ;;  %v37_v5 = vld [vmem:[%s8959_s0 + $0x8] sm:$0xff]  ;;  %v6086_v7 = vld [vmem:[%s8960_s1 + $0x10] sm:$0xff]   ;;  %vm6633_vm0 = vmmov 0  }
   0x4   :  { %6082 = vset.pattern.permute.xlu0 %v6631_v2  ;;  %5429 = vmatprep.subr.bf16.mxu0 %v6632_v3  ;;  %v6084_v4 = vld [vmem:[%s8960_s1] sm:$0xff]   ;;  %v6085_v6 = vld [vmem:[%s8960_s1 + $0x8] sm:$0xff]   ;;  %v6087_v8 = vld [vmem:[%s8960_s1 + $0x18] sm:$0xff]  }
   0x5   :  { %41 = vperm.xlu0 %6082, %v36_v1   ;;  %397 = vmatprep.mubr.bf16.mxu1 %v6631_v2  ;;  %v6092_v9 = vld [vmem:[%s8961_s2 + $0x4] ss:$12 sps:$4 sm:$0xff]   ;;  %v6094_v10 = vld [vmem:[%s8961_s2] ss:$12 sps:$4 sm:$0xff]   ;;  %v6096_v11 = vld [vmem:[%s8961_s2 + $0x1c] ss:$12 sps:$4 sm:$0xff]  }
   0x6   :  { %5430 = vmatpush3.bf16.msra.mxu0 %v6084_v4  ;;  %6083 = vset.pattern.permute.xlu1 %v6631_v2  ;;  %v6098_v12 = vld [vmem:[%s8961_s2 + $0x18] ss:$12 sps:$4 sm:$0xff]   ;;  %v6100_v14 = vld [vmem:[%s8961_s2 + $0x34] ss:$12 sps:$4 sm:$0xff]   ;;  %v6102_v15 = vld [vmem:[%s8961_s2 + $0x30] ss:$12 sps:$4 sm:$0xff]  }
   0x7   :  { %5431 = vmatprep.subr.bf16.mxu0 %v6632_v3  ;;  %5445 = vmatprep.mubr.msk.bf16.mxu0 %vm6633_vm0, %v6632_v3  ;;  %v6088_v13 = vld [vmem:[%s8960_s1 + $0x20] sm:$0xff]   ;;  %v6104_v16 = vld [vmem:[%s8961_s2 + $0x4c] ss:$12 sps:$4 sm:$0xff]   ;;  %v6090_v18 = vld [vmem:[%s8960_s1 + $0x30] sm:$0xff]  }
   0x8   :  { %365 = vmatprep.subr.bf16.mxu1 %v6092_v9  ;;  %v6089_v17 = vld [vmem:[%s8960_s1 + $0x28] sm:$0xff]   ;;  %v6108_v20 = vld [vmem:[%s8961_s2 + $0x64] ss:$12 sps:$4 sm:$0xff]   ;;  %v6091_v21 = vld [vmem:[%s8960_s1 + $0x38] sm:$0xff]  }
   0x9   :  { %44 = vperm.xlu0 %6082, %v37_v5   ;;  %366 = vmatpush1.bf16.msra.mxu1 %v6094_v10  ;;  %v6106_v19 = vld [vmem:[%s8961_s2 + $0x48] ss:$12 sps:$4 sm:$0xff]   ;;  %v6110_v22 = vld [vmem:[%s8961_s2 + $0x60] ss:$12 sps:$4 sm:$0xff]   ;;  %v6114_v24 = vld [vmem:[%s8961_s2 + $0x78] ss:$12 sps:$4 sm:$0xff]  }
   0xa   :  { %5432 = vmatpush3.bf16.msra.mxu0 %v6085_v6  ;;  %367 = vmatprep.subr.bf16.mxu1 %v6096_v11  ;;  %v6112_v23 = vld [vmem:[%s8961_s2 + $0x7c] ss:$12 sps:$4 sm:$0xff]   ;;  %v6116_v25 = vld [vmem:[%s8961_s2 + $0x94] ss:$12 sps:$4 sm:$0xff]  }
   0xb   :  { %5433 = vmatprep.subr.bf16.mxu0 %v6632_v3  ;;  %v6118_v26 = vld [vmem:[%s8961_s2 + $0x90] ss:$12 sps:$4 sm:$0xff]  }
   0xd   :  { %368 = vmatpush1.bf16.msra.mxu1 %v6098_v12 }
   0xe   :  { %5434 = vmatpush3.bf16.msra.mxu0 %v6086_v7  ;;  %369 = vmatprep.subr.bf16.mxu1 %v6100_v14 }
   0xf   :  { %5435 = vmatprep.subr.bf16.mxu0 %v6632_v3 }
  0x11   :  { %370 = vmatpush1.bf16.msra.mxu1 %v6102_v15 }
  0x12   :  { %5436 = vmatpush3.bf16.msra.mxu0 %v6087_v8  ;;  %371 = vmatprep.subr.bf16.mxu1 %v6104_v16 }
  0x13   :  { %5437 = vmatprep.subr.bf16.mxu0 %v6632_v3 }
  0x15   :  { %372 = vmatpush1.bf16.msra.mxu1 %v6106_v19 }
  0x16   :  { %5438 = vmatpush3.bf16.msra.mxu0 %v6088_v13  ;;  %373 = vmatprep.subr.bf16.mxu1 %v6108_v20 }
  0x17   :  { %5439 = vmatprep.subr.bf16.mxu0 %v6632_v3 }
  0x19   :  { %374 = vmatpush1.bf16.msra.mxu1 %v6110_v22 }
  0x1a   :  { %5440 = vmatpush3.bf16.msra.mxu0 %v6089_v17  ;;  %375 = vmatprep.subr.bf16.mxu1 %v6112_v23 }
  0x1b   :  { %5441 = vmatprep.subr.bf16.mxu0 %v6632_v3 }
  0x1d   :  { %376 = vmatpush1.bf16.msra.mxu1 %v6114_v24 }
  0x1e   :  { %5442 = vmatpush3.bf16.msra.mxu0 %v6090_v18  ;;  %377 = vmatprep.subr.bf16.mxu1 %v6116_v25 }
  0x1f   :  { %5443 = vmatprep.subr.bf16.mxu0 %v6632_v3 }
  0x21   :  { %378 = vmatpush1.bf16.msra.mxu1 %v6118_v26 }
  0x22   :  { %5444 = vmatpush3.bf16.msra.mxu0 %v6091_v21 }
  0x23   :  { %5449 = vmatprep.subr.bf16.mxu0 %v6632_v3 }
  0x24   :  { %16 = vsyncpa [#allocation4], 0  ;;  %v38_v27 = vlaneseq  ;;  %v6095_v31 = vld [vmem:[%s8961_s2 + $0x8] ss:$12 sps:$4 sm:$0xff]   ;;  %v6634_v32 = vmov 1.0|1.0  }
  0x25   :  { %v6099_v33 = vld [vmem:[%s8961_s2 + $0x20] ss:$12 sps:$4 sm:$0xff]   ;;  %v6103_v34 = vld [vmem:[%s8961_s2 + $0x38] ss:$12 sps:$4 sm:$0xff]   ;;  %v6107_v35 = vld [vmem:[%s8961_s2 + $0x50] ss:$12 sps:$4 sm:$0xff]  }
  0x26   :  { %v6777_v29 = vand.u32 127, %v38_v27  ;;  %v6111_v36 = vld [vmem:[%s8961_s2 + $0x68] ss:$12 sps:$4 sm:$0xff]   ;;  %v6115_v37 = vld [vmem:[%s8961_s2 + $0x80] ss:$12 sps:$4 sm:$0xff]   ;;  %v223_v9 = vshrl.u32 %v38_v27, 7 }
  0x27   :  { %v6119_v38 = vld [vmem:[%s8961_s2 + $0x98] ss:$12 sps:$4 sm:$0xff]   ;;  %v6122_v40 = vld [vmem:[%s8961_s2 + $0xa8] ss:$12 sps:$4 sm:$0xff]   ;;  %v6123_v41 = vld [vmem:[%s8961_s2 + $0xb0] ss:$12 sps:$4 sm:$0xff]  }
  0x28   :  { %v6120_v39 = vld [vmem:[%s8961_s2 + $0xac] ss:$12 sps:$4 sm:$0xff]   ;;  %v6823_v42 = vld [vmem:[%s8962_s3 + $0x4] ss:$12 sps:$4 sm:$0xff]   ;;  %v6835_v47 = vld [vmem:[%s8962_s3 + $0x8] ss:$12 sps:$4 sm:$0xff]  }
  0x29   :  { %379 = vmatprep.subr.bf16.mxu1 %v6120_v39  ;;  %v6830_v46 = vld [vmem:[%s8962_s3] ss:$12 sps:$4 sm:$0xff]   ;;  %v6840_v50 = vld [vmem:[%s8962_s3 + $0x1c] ss:$12 sps:$4 sm:$0xff]   ;;  %v6846_v51 = vld [vmem:[%s8962_s3 + $0x18] ss:$12 sps:$4 sm:$0xff]  }
  0x2a   :  { %380 = vmatpush1.bf16.msra.mxu1 %v6122_v40  ;;  %v6852_v52 = vld [vmem:[%s8962_s3 + $0x20] ss:$12 sps:$4 sm:$0xff]   ;;  %v6868_v54 = vld [vmem:[%s8962_s3 + $0x30] ss:$12 sps:$4 sm:$0xff]   ;;  %v6874_v55 = vld [vmem:[%s8962_s3 + $0x38] ss:$12 sps:$4 sm:$0xff]  }
  0x2b   :  { %610 = vmatprep.subr.bf16.mxu1 %v6823_v42  ;;  %v6858_v53 = vld [vmem:[%s8962_s3 + $0x34] ss:$12 sps:$4 sm:$0xff]   ;;  %v6880_v56 = vld [vmem:[%s8962_s3 + $0x4c] ss:$12 sps:$4 sm:$0xff]   ;;  %v6893_v58 = vld [vmem:[%s8962_s3 + $0x50] ss:$12 sps:$4 sm:$0xff]  }
  0x2c   :  { %v6887_v57 = vld [vmem:[%s8962_s3 + $0x48] ss:$12 sps:$4 sm:$0xff]   ;;  %v6899_v59 = vld [vmem:[%s8962_s3 + $0x64] ss:$12 sps:$4 sm:$0xff]   ;;  %v6906_v60 = vld [vmem:[%s8962_s3 + $0x60] ss:$12 sps:$4 sm:$0xff]  }
  0x2d   :  { %v6912_v61 = vld [vmem:[%s8962_s3 + $0x68] ss:$12 sps:$4 sm:$0xff]   ;;  %v6925_v63 = vld [vmem:[%s8962_s3 + $0x78] ss:$12 sps:$4 sm:$0xff]   ;;  %v6931_v0 = vld [vmem:[%s8962_s3 + $0x80] ss:$12 sps:$4 sm:$0xff]  }
  0x2e   :  { %v6918_v62 = vld [vmem:[%s8962_s3 + $0x7c] ss:$12 sps:$4 sm:$0xff]   ;;  %v6937_v1 = vld [vmem:[%s8962_s3 + $0x94] ss:$12 sps:$4 sm:$0xff]   ;;  %v6950_v5 = vld [vmem:[%s8962_s3 + $0x98] ss:$12 sps:$4 sm:$0xff]  }
  0x2f   :  { %v6944_v4 = vld [vmem:[%s8962_s3 + $0x90] ss:$12 sps:$4 sm:$0xff]   ;;  %v6956_v6 = vld [vmem:[%s8962_s3 + $0xac] ss:$12 sps:$4 sm:$0xff]   ;;  %v6963_v7 = vld [vmem:[%s8962_s3 + $0xa8] ss:$12 sps:$4 sm:$0xff]  }
  0x30   :  { %v6969_v8 = vld [vmem:[%s8962_s3 + $0xb0] ss:$12 sps:$4 sm:$0xff]   ;;  %v7015_v10 = vsub.s32 0, %v223_v9  ;;  %v7017_v11 = vsub.s32 2, %v223_v9  ;;  %v158_v12 = vadd.s32 128, %v6777_v29  ;;  %v7023_v14 = vsub.s32 1, %v223_v9 }
  0x31   :  { %v220_v13 = vld [vmem:[%s8963_s4] sm:$0x7]  ;;  %vm183_vm4 = vcmp.ge.s32.totalorder %v6777_v29, 64  ;;  %vm186_vm6 = vcmp.lt.s32.totalorder %v6777_v29, 64  ;;  %vm1617_vm7 = vcmask 1041408   ;;  %vm1619_vm8 = vcmask 1043456  }
  0x32   :  { %v225_v15 = vrot.slane %v220_v13, %v7015_v10  ;;  %v233_v16 = vrot.slane %v220_v13, %v7017_v11  ;;  %v170_v17 = vand.u32 127, %v158_v12  ;;  %v229_v18 = vrot.slane %v220_v13, %v7023_v14  ;;  %s6636_s21 = smov [#allocation3]  }
  0x33   :  { %vm1621_vm9 = vcmask 1045504   ;;  %vm4614_vm12 = vcmask 7168   ;;  %vm4643_vm13 = vcmask 130048   ;;  %s4801_s22 = sshll.u32 %s6636_s21, 4  ;;  %s4802_s22 = int_to_ptr.vmem [resolvable:$true] %s4801_s22 }
  0x34   :  { %vm7029_vm5 = vcmp.ge.s32.totalorder %v170_v17, 64  ;;  %p6612_p1 = scmp.lt.s32.totalorder %s4802_s22, %s4802_s22 }
  0x84   :  { %v42_v28 = vpop.permute.xlu0 %41 }
  0x85   :  { %vm46_vm1 = vcmp.eq.s32.totalorder %v42_v28, %v6777_v29 }
  0x88   :  { %v45_v30 = vpop.permute.xlu0 %44 }
  0x89   :  { %vm47_vm2 = vcmp.eq.s32.totalorder %v45_v30, %v6777_v29  ;;  %v6635_v29 = vmov 0.0|0.0  }
  0x8a   :  { %vm4819_vm3 = vmpackc.low %vm47_vm2, %vm46_vm1 }
  0x8b   :  { %5446 = vmatmul.mubr.msk.bf16.vlgmr.msra.gmra.mrb[0].mxu0 %vm4819_vm3, %v6634_v32 }
  0x8c   :  { %5450 = vmatpush3.bf16.msra.mxu0 %v6095_v31  ;;  %5465 = vmatprep.mubr.msk.bf16.mxu0 %vm6633_vm0, %v6632_v3 }
  0x8d   :  { %5451 = vmatprep.subr.bf16.mxu0 %v6632_v3 }
  0x90   :  { %5452 = vmatpush3.bf16.msra.mxu0 %v6099_v33 }
  0x91   :  { %5453 = vmatprep.subr.bf16.mxu0 %v6632_v3 }
  0x94   :  { %5454 = vmatpush3.bf16.msra.mxu0 %v6103_v34 }
  0x95   :  { %5455 = vmatprep.subr.bf16.mxu0 %v6632_v3 }
  0x98   :  { %5456 = vmatpush3.bf16.msra.mxu0 %v6107_v35 }
  0x99   :  { %5457 = vmatprep.subr.bf16.mxu0 %v6632_v3 }
  0x9c   :  { %5458 = vmatpush3.bf16.msra.mxu0 %v6111_v36 }
  0x9d   :  { %5459 = vmatprep.subr.bf16.mxu0 %v6632_v3 }
  0xa0   :  { %5460 = vmatpush3.bf16.msra.mxu0 %v6115_v37 }
  0xa1   :  { %5461 = vmatprep.subr.bf16.mxu0 %v6632_v3 }
  0xa4   :  { %5462 = vmatpush3.bf16.msra.mxu0 %v6119_v38 }
  0xa5   :  { %5463 = vmatprep.subr.bf16.mxu0 %v6632_v3 }
  0xa8   :  { %5464 = vmatpush3.bf16.msra.mxu0 %v6123_v41 }
  0xa9   :  { %5469 = vmatprep.subr.bf16.mxu0 %v6632_v3 }
 0x15e   :  { %v151_v43 = vpop.f32.mrb[0].mxu0 }
 0x15f   :  { %v5447_v44 = vpop.f32.mrb[1].mxu0 }
 0x160   :  { %v154_v45 = vpop.f32.mrb[2].mxu0 }
 0x161   :  { %v187_v48 = vpack.c.bf16 %v154_v45, %v151_v43  ;;  %v5448_v49 = vpop.f32.mrb[3].mxu0 }
 0x163   :  { %398 = vmatmul.mubr.bf16.vlgmr.msra.gmra.mrb[0].mxu1 %v187_v48  ;;  %5466 = vmatmul.mubr.bf16.vlgmr.msra.gmra.mrb[4].mxu0 %v187_v48 }
 0x164   :  { %611 = vmatpush1.bf16.msra.mxu1 %v6830_v46  ;;  %5470 = vmatpush3.bf16.msra.mxu0 %v6835_v47 }
 0x165   :  { %612 = vmatprep.subr.bf16.mxu1 %v6840_v50  ;;  %5471 = vmatprep.subr.bf16.mxu0 %v6632_v3 }
 0x166   :  { %642 = vmatprep.mubr.bf16.mxu1 %v6631_v2  ;;  %5485 = vmatprep.mubr.msk.bf16.mxu0 %vm6633_vm0, %v6632_v3 }
 0x168   :  { %613 = vmatpush1.bf16.msra.mxu1 %v6846_v51  ;;  %5472 = vmatpush3.bf16.msra.mxu0 %v6852_v52 }
 0x169   :  { %614 = vmatprep.subr.bf16.mxu1 %v6858_v53  ;;  %5473 = vmatprep.subr.bf16.mxu0 %v6632_v3 }
 0x16c   :  { %615 = vmatpush1.bf16.msra.mxu1 %v6868_v54  ;;  %5474 = vmatpush3.bf16.msra.mxu0 %v6874_v55 }
 0x16d   :  { %616 = vmatprep.subr.bf16.mxu1 %v6880_v56  ;;  %5475 = vmatprep.subr.bf16.mxu0 %v6632_v3 }
 0x170   :  { %617 = vmatpush1.bf16.msra.mxu1 %v6887_v57  ;;  %5476 = vmatpush3.bf16.msra.mxu0 %v6893_v58 }
 0x171   :  { %618 = vmatprep.subr.bf16.mxu1 %v6899_v59  ;;  %5477 = vmatprep.subr.bf16.mxu0 %v6632_v3 }
 0x174   :  { %619 = vmatpush1.bf16.msra.mxu1 %v6906_v60  ;;  %5478 = vmatpush3.bf16.msra.mxu0 %v6912_v61 }
 0x175   :  { %620 = vmatprep.subr.bf16.mxu1 %v6918_v62  ;;  %5479 = vmatprep.subr.bf16.mxu0 %v6632_v3 }
 0x178   :  { %621 = vmatpush1.bf16.msra.mxu1 %v6925_v63  ;;  %5480 = vmatpush3.bf16.msra.mxu0 %v6931_v0 }
 0x179   :  { %622 = vmatprep.subr.bf16.mxu1 %v6937_v1  ;;  %5481 = vmatprep.subr.bf16.mxu0 %v6632_v3 }
 0x17c   :  { %623 = vmatpush1.bf16.msra.mxu1 %v6944_v4  ;;  %5482 = vmatpush3.bf16.msra.mxu0 %v6950_v5 }
 0x17d   :  { %624 = vmatprep.subr.bf16.mxu1 %v6956_v6  ;;  %5483 = vmatprep.subr.bf16.mxu0 %v6632_v3 }
 0x180   :  { %625 = vmatpush1.bf16.msra.mxu1 %v6963_v7  ;;  %5484 = vmatpush3.bf16.msra.mxu0 %v6969_v8 }
 0x181   :  { %773 = vmatprep.subr.bf16.mxu1 %v6823_v42  ;;  %5489 = vmatprep.subr.bf16.mxu0 %v6632_v3 }
 0x183   :  { %643 = vmatmul.mubr.bf16.vlgmr.msra.gmra.mrb[4].mxu1 %v6631_v2  ;;  %5486 = vmatmul.mubr.bf16.vlgmr.msra.gmra.mrb[8].mxu0 %v6631_v2 }
 0x184   :  { %774 = vmatpush1.bf16.msra.mxu1 %v6830_v46  ;;  %5490 = vmatpush3.bf16.msra.mxu0 %v6835_v47 }
 0x185   :  { %775 = vmatprep.subr.bf16.mxu1 %v6840_v50  ;;  %5491 = vmatprep.subr.bf16.mxu0 %v6632_v3 }
 0x186   :  { %805 = vmatprep.mubr.bf16.mxu1 %v6631_v2  ;;  %5505 = vmatprep.mubr.msk.bf16.mxu0 %vm6633_vm0, %v6632_v3 }
 0x188   :  { %776 = vmatpush1.bf16.msra.mxu1 %v6846_v51  ;;  %5492 = vmatpush3.bf16.msra.mxu0 %v6852_v52 }
 0x189   :  { %777 = vmatprep.subr.bf16.mxu1 %v6858_v53  ;;  %5493 = vmatprep.subr.bf16.mxu0 %v6632_v3 }
 0x18c   :  { %778 = vmatpush1.bf16.msra.mxu1 %v6868_v54  ;;  %5494 = vmatpush3.bf16.msra.mxu0 %v6874_v55 }
 0x18d   :  { %779 = vmatprep.subr.bf16.mxu1 %v6880_v56  ;;  %5495 = vmatprep.subr.bf16.mxu0 %v6632_v3 }
 0x190   :  { %780 = vmatpush1.bf16.msra.mxu1 %v6887_v57  ;;  %5496 = vmatpush3.bf16.msra.mxu0 %v6893_v58 }
 0x191   :  { %781 = vmatprep.subr.bf16.mxu1 %v6899_v59  ;;  %5497 = vmatprep.subr.bf16.mxu0 %v6632_v3 }
 0x194   :  { %782 = vmatpush1.bf16.msra.mxu1 %v6906_v60  ;;  %5498 = vmatpush3.bf16.msra.mxu0 %v6912_v61 }
 0x195   :  { %783 = vmatprep.subr.bf16.mxu1 %v6918_v62  ;;  %5499 = vmatprep.subr.bf16.mxu0 %v6632_v3 }
 0x198   :  { %784 = vmatpush1.bf16.msra.mxu1 %v6925_v63  ;;  %5500 = vmatpush3.bf16.msra.mxu0 %v6931_v0 }
 0x199   :  { %785 = vmatprep.subr.bf16.mxu1 %v6937_v1  ;;  %5501 = vmatprep.subr.bf16.mxu0 %v6632_v3 }
 0x19c   :  { %786 = vmatpush1.bf16.msra.mxu1 %v6944_v4  ;;  %5502 = vmatpush3.bf16.msra.mxu0 %v6950_v5 }
 0x19d   :  { %787 = vmatprep.subr.bf16.mxu1 %v6956_v6  ;;  %5503 = vmatprep.subr.bf16.mxu0 %v6632_v3 }
 0x1a0   :  { %788 = vmatpush1.bf16.msra.mxu1 %v6963_v7  ;;  %5504 = vmatpush3.bf16.msra.mxu0 %v6969_v8 }
 0x1a1   :  { %891 = vmatprep.subr.bf16.mxu1 %v6823_v42  ;;  %5509 = vmatprep.subr.bf16.mxu0 %v6632_v3 }
 0x236   :  { %v399_v19 = vpop.f32.mrb[0].mxu1  ;;  %v442_v20 = vpop.f32.mrb[4].mxu0 }
 0x237   :  { %v400_v21 = vadd.f32 %v399_v19, %v225_v15  ;;  %v443_v22 = vadd.f32 %v442_v20, %v233_v16  ;;  %v401_v23 = vpop.f32.mrb[1].mxu1  ;;  %v5467_v24 = vpop.f32.mrb[5].mxu0 }
 0x238   :  { %v402_v26 = vadd.f32 %v401_v23, %v229_v18  ;;  %v403_v27 = vpop.f32.mrb[2].mxu1  ;;  %v445_v28 = vpop.f32.mrb[6].mxu0 }
 0x239   :  { %v517_v30 = vrot.slane %v443_v22, 2  ;;  %v520_v31 = vrot.slane %v443_v22, 6  ;;  %v404_v32 = vadd.f32 %v403_v27, %v225_v15  ;;  %v446_v33 = vadd.f32 %v445_v28, %v233_v16  ;;  %v405_v34 = vpop.f32.mrb[3].mxu1  ;;  %v5468_v35 = vpop.f32.mrb[7].mxu0 }
 0x23a   :  { %v406_v36 = vadd.f32 %v405_v34, %v229_v18  ;;  %v490_v37 = vrot.slane %v400_v21, 2  ;;  %v491_v38 = vrot.slane %v402_v26, 2  ;;  %v496_v39 = vrot.slane %v400_v21, 6 }
 0x23b   :  { %v524_v40 = vrot.slane %v446_v33, 2  ;;  %v527_v41 = vrot.slane %v446_v33, 6  ;;  %v7035_v43 = vsel %vm183_vm4, %v446_v33, %v517_v30  ;;  %v7039_v44 = vsel %vm183_vm4, %v446_v33, %v520_v31 }
 0x23c   :  { %v7043_v45 = vsel %vm183_vm4, %v404_v32, %v490_v37  ;;  %v7047_v48 = vsel %vm7029_vm5, %v406_v36, %v491_v38  ;;  %v7051_v49 = vsel %vm183_vm4, %v404_v32, %v496_v39  ;;  %v497_v9 = vrot.slane %v402_v26, 6 }
 0x23d   :  { %v504_v12 = vrot.slane %v404_v32, 2  ;;  %v7055_v13 = vsel %vm183_vm4, %v443_v22, %v524_v40  ;;  %v505_v15 = vrot.slane %v406_v36, 2  ;;  %v510_v16 = vrot.slane %v404_v32, 6 }
 0x23e   :  { %v7059_v17 = vsel %vm7029_vm5, %v406_v36, %v497_v9  ;;  %v7063_v18 = vsel %vm183_vm4, %v443_v22, %v527_v41  ;;  %v511_v19 = vrot.slane %v406_v36, 6  ;;  %v7086_v9 = vld [vmem:[%s8964_s5] ss:$0 sm:$0xff] }
 0x23f   :  { %v7067_v20 = vsel %vm183_vm4, %v400_v21, %v504_v12  ;;  %v7071_v23 = vsel %vm7029_vm5, %v402_v26, %v505_v15  ;;  %v7075_v24 = vsel %vm183_vm4, %v400_v21, %v510_v16 }
 0x240   :  { %v7079_v27 = vsel %vm7029_vm5, %v402_v26, %v511_v19 }
 0x256   :  { %v644_v28 = vpop.f32.mrb[4].mxu1  ;;  %v753_v22 = vpop.f32.mrb[8].mxu0 }
 0x257   :  { %v653_v30 = vrot.slane %v644_v28, 2  ;;  %v646_v31 = vpop.f32.mrb[5].mxu1  ;;  %v5487_v32 = vpop.f32.mrb[9].mxu0  ;;  %v754_v12 = vadd.f32 %v7086_v9, %v753_v22 }
 0x258   :  { %v654_v33 = vrot.slane %v646_v31, 2  ;;  %v648_v34 = vpop.f32.mrb[6].mxu1  ;;  %v756_v35 = vpop.f32.mrb[10].mxu0 }
 0x259   :  { %v657_v36 = vadd.f32 %v653_v30, %v7043_v45  ;;  %v649_v37 = vpop.f32.mrb[7].mxu1  ;;  %v5488_v38 = vpop.f32.mrb[11].mxu0  ;;  %v760_v19 = vrot.slane %v754_v12, 2 }
 0x25a   :  { %v658_v21 = vadd.f32 %v654_v33, %v7047_v48 }
 0x25b   :  { %v4862_v39 = vmul.f32 -1.442695, %v657_v36 }
 0x25c   :  { %v4863_v40 = vmul.f32 -1.442695, %v658_v21 }
 0x25d   :  { %6284 = vpow2.f32 %v4862_v39 }
 0x25e   :  { %6286 = vpow2.f32 %v4863_v40 }
 0x267   :  { %v6285_v26 = vpop.eup %6284 }
 0x268   :  { %v665_v41 = vadd.f32 1.0, %v6285_v26  ;;  %v6287_v15 = vpop.eup %6286 }
 0x269   :  { %v666_v16 = vadd.f32 1.0, %v6287_v15 }
 0x26a   :  { %6288 = vrcp.f32 %v665_v41 }
 0x26b   :  { %6290 = vrcp.f32 %v666_v16 }
 0x274   :  { %v6289_v28 = vpop.eup %6288 }
 0x275   :  { %v762_v30 = vmul.f32 %v6289_v28, %v760_v19  ;;  %v6291_v32 = vpop.eup %6290 }
 0x276   :  { %v765_v33 = vsub.f32 1.0, %v6291_v32  ;;  %v767_v35 = vmul.f32 0.0, %v6291_v32 }
 0x277   :  { %v763_v31 = vadd.f32 %v762_v30, %v7035_v43 }
 0x279   :  { %6292 = vtanh.f32 %v763_v31 }
 0x283   :  { %v6293_v34 = vpop.eup %6292 }
 0x284   :  { %v766_v36 = vmul.f32 %v6293_v34, %v765_v33 }
 0x286   :  { %v7090_v37 = vadd.f32 %v767_v35, %v766_v36 }
 0x288   :  { %v769_v38 = vpack.c.bf16 %v7090_v37, %v7090_v37 }
 0x28a   :  { %v771_v22 = vrot.slane %v769_v38, 3 }
 0x28c   :  { %806 = vmatmul.mubr.bf16.vlgmr.msra.gmra.mrb[8].mxu1 %v771_v22  ;;  %5506 = vmatmul.mubr.bf16.vlgmr.msra.gmra.mrb[12].mxu0 %v771_v22 }
 0x28d   :  { %892 = vmatpush1.bf16.msra.mxu1 %v6830_v46  ;;  %5510 = vmatpush3.bf16.msra.mxu0 %v6835_v47 }
 0x28e   :  { %893 = vmatprep.subr.bf16.mxu1 %v6840_v50  ;;  %5511 = vmatprep.subr.bf16.mxu0 %v6632_v3 }
 0x28f   :  { %923 = vmatprep.mubr.bf16.mxu1 %v6631_v2  ;;  %5525 = vmatprep.mubr.msk.bf16.mxu0 %vm6633_vm0, %v6632_v3 }
 0x291   :  { %894 = vmatpush1.bf16.msra.mxu1 %v6846_v51  ;;  %5512 = vmatpush3.bf16.msra.mxu0 %v6852_v52 }
 0x292   :  { %895 = vmatprep.subr.bf16.mxu1 %v6858_v53  ;;  %5513 = vmatprep.subr.bf16.mxu0 %v6632_v3 }
 0x295   :  { %896 = vmatpush1.bf16.msra.mxu1 %v6868_v54  ;;  %5514 = vmatpush3.bf16.msra.mxu0 %v6874_v55 }
 0x296   :  { %897 = vmatprep.subr.bf16.mxu1 %v6880_v56  ;;  %5515 = vmatprep.subr.bf16.mxu0 %v6632_v3 }
 0x299   :  { %898 = vmatpush1.bf16.msra.mxu1 %v6887_v57  ;;  %5516 = vmatpush3.bf16.msra.mxu0 %v6893_v58 }
 0x29a   :  { %899 = vmatprep.subr.bf16.mxu1 %v6899_v59  ;;  %5517 = vmatprep.subr.bf16.mxu0 %v6632_v3 }
 0x29d   :  { %900 = vmatpush1.bf16.msra.mxu1 %v6906_v60  ;;  %5518 = vmatpush3.bf16.msra.mxu0 %v6912_v61 }
 0x29e   :  { %901 = vmatprep.subr.bf16.mxu1 %v6918_v62  ;;  %5519 = vmatprep.subr.bf16.mxu0 %v6632_v3 }
 0x2a1   :  { %902 = vmatpush1.bf16.msra.mxu1 %v6925_v63  ;;  %5520 = vmatpush3.bf16.msra.mxu0 %v6931_v0 }
 0x2a2   :  { %903 = vmatprep.subr.bf16.mxu1 %v6937_v1  ;;  %5521 = vmatprep.subr.bf16.mxu0 %v6632_v3 }
 0x2a5   :  { %904 = vmatpush1.bf16.msra.mxu1 %v6944_v4  ;;  %5522 = vmatpush3.bf16.msra.mxu0 %v6950_v5 }
 0x2a6   :  { %905 = vmatprep.subr.bf16.mxu1 %v6956_v6  ;;  %5523 = vmatprep.subr.bf16.mxu0 %v6632_v3 }
 0x2a9   :  { %906 = vmatpush1.bf16.msra.mxu1 %v6963_v7  ;;  %5524 = vmatpush3.bf16.msra.mxu0 %v6969_v8 }
 0x2aa   :  { %1009 = vmatprep.subr.bf16.mxu1 %v6823_v42  ;;  %5529 = vmatprep.subr.bf16.mxu0 %v6632_v3 }
 0x35f   :  { %v807_v39 = vpop.f32.mrb[8].mxu1  ;;  %v868_v21 = vpop.f32.mrb[12].mxu0 }
 0x360   :  { %v816_v40 = vrot.slane %v807_v39, 4  ;;  %v809_v26 = vpop.f32.mrb[9].mxu1  ;;  %v5507_v41 = vpop.f32.mrb[13].mxu0  ;;  %v869_v38 = vadd.f32 %v7086_v9, %v868_v21 }
 0x361   :  { %v817_v12 = vrot.slane %v809_v26, 4  ;;  %v811_v15 = vpop.f32.mrb[10].mxu1  ;;  %v871_v16 = vpop.f32.mrb[14].mxu0 }
 0x362   :  { %v820_v19 = vadd.f32 %v816_v40, %v7051_v49  ;;  %v812_v28 = vpop.f32.mrb[11].mxu1  ;;  %v5508_v30 = vpop.f32.mrb[15].mxu0  ;;  %v875_v39 = vrot.slane %v869_v38, 4 }
 0x363   :  { %v821_v32 = vadd.f32 %v817_v12, %v7059_v17  ;;  %v883_v12 = vrot.slane %v7090_v37, 2 }
 0x364   :  { %v4872_v31 = vmul.f32 -1.442695, %v820_v19 }
 0x365   :  { %v4873_v33 = vmul.f32 -1.442695, %v821_v32 }
 0x366   :  { %6294 = vpow2.f32 %v4872_v31 }
 0x367   :  { %6296 = vpow2.f32 %v4873_v33 }
 0x370   :  { %v6295_v34 = vpop.eup %6294 }
 0x371   :  { %v828_v35 = vadd.f32 1.0, %v6295_v34  ;;  %v6297_v36 = vpop.eup %6296 }
 0x372   :  { %v829_v22 = vadd.f32 1.0, %v6297_v36 }
 0x373   :  { %6298 = vrcp.f32 %v828_v35 }
 0x374   :  { %6300 = vrcp.f32 %v829_v22 }
 0x37d   :  { %v6299_v26 = vpop.eup %6298 }
 0x37e   :  { %v877_v41 = vmul.f32 %v6299_v26, %v875_v39  ;;  %v6301_v15 = vpop.eup %6300 }
 0x37f   :  { %v880_v16 = vsub.f32 1.0, %v6301_v15  ;;  %v885_v30 = vmul.f32 %v6301_v15, %v883_v12 }
 0x380   :  { %v878_v40 = vadd.f32 %v877_v41, %v7039_v44 }
 0x382   :  { %6302 = vtanh.f32 %v878_v40 }
 0x38c   :  { %v6303_v19 = vpop.eup %6302 }
 0x38d   :  { %v881_v28 = vmul.f32 %v6303_v19, %v880_v16 }
 0x38f   :  { %v7134_v31 = vadd.f32 %v885_v30, %v881_v28 }
 0x391   :  { %v887_v21 = vpack.c.bf16 %v7134_v31, %v7134_v31 }
 0x393   :  { %v889_v32 = vrot.slane %v887_v21, 2 }
 0x395   :  { %924 = vmatmul.mubr.bf16.vlgmr.msra.gmra.mrb[12].mxu1 %v889_v32  ;;  %5526 = vmatmul.mubr.bf16.vlgmr.msra.gmra.mrb[16].mxu0 %v889_v32 }
 0x396   :  { %1010 = vmatpush1.bf16.msra.mxu1 %v6830_v46  ;;  %5530 = vmatpush3.bf16.msra.mxu0 %v6835_v47 }
 0x397   :  { %1011 = vmatprep.subr.bf16.mxu1 %v6840_v50  ;;  %5531 = vmatprep.subr.bf16.mxu0 %v6632_v3 }
 0x398   :  { %1041 = vmatprep.mubr.bf16.mxu1 %v6631_v2  ;;  %5545 = vmatprep.mubr.msk.bf16.mxu0 %vm6633_vm0, %v6632_v3 }
 0x39a   :  { %1012 = vmatpush1.bf16.msra.mxu1 %v6846_v51  ;;  %5532 = vmatpush3.bf16.msra.mxu0 %v6852_v52 }
 0x39b   :  { %1013 = vmatprep.subr.bf16.mxu1 %v6858_v53  ;;  %5533 = vmatprep.subr.bf16.mxu0 %v6632_v3 }
 0x39e   :  { %1014 = vmatpush1.bf16.msra.mxu1 %v6868_v54  ;;  %5534 = vmatpush3.bf16.msra.mxu0 %v6874_v55 }
 0x39f   :  { %1015 = vmatprep.subr.bf16.mxu1 %v6880_v56  ;;  %5535 = vmatprep.subr.bf16.mxu0 %v6632_v3 }
 0x3a2   :  { %1016 = vmatpush1.bf16.msra.mxu1 %v6887_v57  ;;  %5536 = vmatpush3.bf16.msra.mxu0 %v6893_v58 }
 0x3a3   :  { %1017 = vmatprep.subr.bf16.mxu1 %v6899_v59  ;;  %5537 = vmatprep.subr.bf16.mxu0 %v6632_v3 }
 0x3a6   :  { %1018 = vmatpush1.bf16.msra.mxu1 %v6906_v60  ;;  %5538 = vmatpush3.bf16.msra.mxu0 %v6912_v61 }
 0x3a7   :  { %1019 = vmatprep.subr.bf16.mxu1 %v6918_v62  ;;  %5539 = vmatprep.subr.bf16.mxu0 %v6632_v3 }
 0x3aa   :  { %1020 = vmatpush1.bf16.msra.mxu1 %v6925_v63  ;;  %5540 = vmatpush3.bf16.msra.mxu0 %v6931_v0 }
 0x3ab   :  { %1021 = vmatprep.subr.bf16.mxu1 %v6937_v1  ;;  %5541 = vmatprep.subr.bf16.mxu0 %v6632_v3 }
 0x3ae   :  { %1022 = vmatpush1.bf16.msra.mxu1 %v6944_v4  ;;  %5542 = vmatpush3.bf16.msra.mxu0 %v6950_v5 }
 0x3af   :  { %1023 = vmatprep.subr.bf16.mxu1 %v6956_v6  ;;  %5543 = vmatprep.subr.bf16.mxu0 %v6632_v3 }
 0x3b2   :  { %1024 = vmatpush1.bf16.msra.mxu1 %v6963_v7  ;;  %5544 = vmatpush3.bf16.msra.mxu0 %v6969_v8 }
 0x3b3   :  { %1115 = vmatprep.subr.bf16.mxu1 %v6823_v42  ;;  %5549 = vmatprep.subr.bf16.mxu0 %v6632_v3 }
 0x468   :  { %v925_v33 = vpop.f32.mrb[12].mxu1  ;;  %v986_v34 = vpop.f32.mrb[16].mxu0 }
 0x469   :  { %v934_v35 = vrot.slane %v925_v33, 6  ;;  %v927_v36 = vpop.f32.mrb[13].mxu1  ;;  %v5527_v38 = vpop.f32.mrb[17].mxu0  ;;  %v987_v32 = vadd.f32 %v7086_v9, %v986_v34 }
 0x46a   :  { %v935_v22 = vrot.slane %v927_v36, 6  ;;  %v929_v39 = vpop.f32.mrb[14].mxu1  ;;  %v989_v26 = vpop.f32.mrb[18].mxu0 }
 0x46b   :  { %v938_v41 = vadd.f32 %v934_v35, %v7043_v45  ;;  %v930_v40 = vpop.f32.mrb[15].mxu1  ;;  %v5528_v15 = vpop.f32.mrb[19].mxu0  ;;  %v993_v36 = vrot.slane %v987_v32, 6 }
 0x46c   :  { %v939_v12 = vadd.f32 %v935_v22, %v7047_v48  ;;  %v1001_v48 = vrot.slane %v7134_v31, 2 }
 0x46d   :  { %v4874_v16 = vmul.f32 -1.442695, %v938_v41 }
 0x46e   :  { %v4875_v19 = vmul.f32 -1.442695, %v939_v12 }
 0x46f   :  { %6304 = vpow2.f32 %v4874_v16 }
 0x470   :  { %6306 = vpow2.f32 %v4875_v19 }
 0x479   :  { %v6305_v28 = vpop.eup %6304 }
 0x47a   :  { %v946_v30 = vadd.f32 1.0, %v6305_v28  ;;  %v6307_v21 = vpop.eup %6306 }
 0x47b   :  { %v947_v33 = vadd.f32 1.0, %v6307_v21 }
 0x47c   :  { %6308 = vrcp.f32 %v946_v30 }
 0x47d   :  { %6310 = vrcp.f32 %v947_v33 }
 0x486   :  { %v6309_v38 = vpop.eup %6308 }
 0x487   :  { %v995_v39 = vmul.f32 %v6309_v38, %v993_v36  ;;  %v6311_v35 = vpop.eup %6310 }
 0x488   :  { %v998_v22 = vsub.f32 1.0, %v6311_v35  ;;  %v1003_v41 = vmul.f32 %v6311_v35, %v1001_v48 }
 0x489   :  { %v996_v45 = vadd.f32 %v995_v39, %v7035_v43 }
 0x48b   :  { %6312 = vtanh.f32 %v996_v45 }
 0x495   :  { %v6313_v26 = vpop.eup %6312 }
 0x496   :  { %v999_v40 = vmul.f32 %v6313_v26, %v998_v22 }
 0x498   :  { %v7180_v15 = vadd.f32 %v1003_v41, %v999_v40 }
 0x49a   :  { %v1005_v34 = vpack.c.bf16 %v7180_v15, %v7180_v15 }
 0x49c   :  { %v1007_v16 = vrot.slane %v1005_v34, 1 }
 0x49e   :  { %1042 = vmatmul.mubr.bf16.vlgmr.msra.gmra.mrb[16].mxu1 %v1007_v16  ;;  %5546 = vmatmul.mubr.bf16.vlgmr.msra.gmra.mrb[20].mxu0 %v1007_v16 }
 0x49f   :  { %1116 = vmatpush1.bf16.msra.mxu1 %v6830_v46  ;;  %5550 = vmatpush3.bf16.msra.mxu0 %v6835_v47 }
 0x4a0   :  { %1117 = vmatprep.subr.bf16.mxu1 %v6840_v50  ;;  %5551 = vmatprep.subr.bf16.mxu0 %v6632_v3 }
 0x4a1   :  { %1147 = vmatprep.mubr.bf16.mxu1 %v6631_v2  ;;  %5565 = vmatprep.mubr.msk.bf16.mxu0 %vm6633_vm0, %v6632_v3 }
 0x4a3   :  { %1118 = vmatpush1.bf16.msra.mxu1 %v6846_v51  ;;  %5552 = vmatpush3.bf16.msra.mxu0 %v6852_v52 }
 0x4a4   :  { %1119 = vmatprep.subr.bf16.mxu1 %v6858_v53  ;;  %5553 = vmatprep.subr.bf16.mxu0 %v6632_v3 }
 0x4a7   :  { %1120 = vmatpush1.bf16.msra.mxu1 %v6868_v54  ;;  %5554 = vmatpush3.bf16.msra.mxu0 %v6874_v55 }
 0x4a8   :  { %1121 = vmatprep.subr.bf16.mxu1 %v6880_v56  ;;  %5555 = vmatprep.subr.bf16.mxu0 %v6632_v3 }
 0x4ab   :  { %1122 = vmatpush1.bf16.msra.mxu1 %v6887_v57  ;;  %5556 = vmatpush3.bf16.msra.mxu0 %v6893_v58 }
 0x4ac   :  { %1123 = vmatprep.subr.bf16.mxu1 %v6899_v59  ;;  %5557 = vmatprep.subr.bf16.mxu0 %v6632_v3 }
 0x4af   :  { %1124 = vmatpush1.bf16.msra.mxu1 %v6906_v60  ;;  %5558 = vmatpush3.bf16.msra.mxu0 %v6912_v61 }
 0x4b0   :  { %1125 = vmatprep.subr.bf16.mxu1 %v6918_v62  ;;  %5559 = vmatprep.subr.bf16.mxu0 %v6632_v3 }
 0x4b3   :  { %1126 = vmatpush1.bf16.msra.mxu1 %v6925_v63  ;;  %5560 = vmatpush3.bf16.msra.mxu0 %v6931_v0 }
 0x4b4   :  { %1127 = vmatprep.subr.bf16.mxu1 %v6937_v1  ;;  %5561 = vmatprep.subr.bf16.mxu0 %v6632_v3 }
 0x4b7   :  { %1128 = vmatpush1.bf16.msra.mxu1 %v6944_v4  ;;  %5562 = vmatpush3.bf16.msra.mxu0 %v6950_v5 }
 0x4b8   :  { %1129 = vmatprep.subr.bf16.mxu1 %v6956_v6  ;;  %5563 = vmatprep.subr.bf16.mxu0 %v6632_v3 }
 0x4bb   :  { %1130 = vmatpush1.bf16.msra.mxu1 %v6963_v7  ;;  %5564 = vmatpush3.bf16.msra.mxu0 %v6969_v8 }
 0x4bc   :  { %1233 = vmatprep.subr.bf16.mxu1 %v6823_v42  ;;  %5569 = vmatprep.subr.bf16.mxu0 %v6632_v3 }
 0x571   :  { %v1043_v43 = vpop.f32.mrb[16].mxu1  ;;  %v1098_v12 = vpop.f32.mrb[20].mxu0 }
 0x572   :  { %v1050_v19 = vadd.f32 %v1043_v43, %v7051_v49  ;;  %v1045_v28 = vpop.f32.mrb[17].mxu1  ;;  %v5547_v30 = vpop.f32.mrb[21].mxu0  ;;  %v1099_v40 = vadd.f32 %v7086_v9, %v1098_v12 }
 0x573   :  { %v1047_v21 = vpop.f32.mrb[18].mxu1  ;;  %v1101_v32 = vpop.f32.mrb[22].mxu0  ;;  %v1051_v39 = vadd.f32 %v1045_v28, %v7059_v17  ;;  %v1110_v17 = vrot.slane %v7180_v15, 2 }
 0x574   :  { %v4876_v33 = vmul.f32 -1.442695, %v1050_v19  ;;  %v1048_v36 = vpop.f32.mrb[19].mxu1  ;;  %v5548_v38 = vpop.f32.mrb[23].mxu0 }
 0x575   :  { %v4877_v45 = vmul.f32 -1.442695, %v1051_v39 }
 0x576   :  { %6314 = vpow2.f32 %v4876_v33 }
 0x577   :  { %6316 = vpow2.f32 %v4877_v45 }
 0x580   :  { %v6315_v35 = vpop.eup %6314 }
 0x581   :  { %v1058_v22 = vadd.f32 1.0, %v6315_v35  ;;  %v6317_v26 = vpop.eup %6316 }
 0x582   :  { %v1059_v41 = vadd.f32 1.0, %v6317_v26 }
 0x583   :  { %6318 = vrcp.f32 %v1058_v22 }
 0x584   :  { %6320 = vrcp.f32 %v1059_v41 }
 0x58d   :  { %v6319_v49 = vpop.eup %6318 }
 0x58e   :  { %v1104_v34 = vmul.f32 %v6319_v49, %v1099_v40  ;;  %v6321_v43 = vpop.eup %6320 }
 0x58f   :  { %v1107_v19 = vsub.f32 1.0, %v6321_v43  ;;  %v1112_v21 = vmul.f32 %v6321_v43, %v1110_v17 }
 0x590   :  { %v1105_v16 = vadd.f32 %v1104_v34, %v7039_v44 }
 0x592   :  { %6322 = vtanh.f32 %v1105_v16 }
 0x59c   :  { %v6323_v28 = vpop.eup %6322 }
 0x59d   :  { %v1108_v30 = vmul.f32 %v6323_v28, %v1107_v19 }
 0x59f   :  { %v7224_v32 = vadd.f32 %v1112_v21, %v1108_v30 }
 0x5a1   :  { %v1114_v33 = vpack.c.bf16 %v7224_v32, %v7224_v32 }
 0x5a3   :  { %1148 = vmatmul.mubr.bf16.vlgmr.msra.gmra.mrb[20].mxu1 %v1114_v33  ;;  %5566 = vmatmul.mubr.bf16.vlgmr.msra.gmra.mrb[24].mxu0 %v1114_v33 }
 0x5a4   :  { %1234 = vmatpush1.bf16.msra.mxu1 %v6830_v46  ;;  %5570 = vmatpush3.bf16.msra.mxu0 %v6835_v47 }
 0x5a5   :  { %1235 = vmatprep.subr.bf16.mxu1 %v6840_v50  ;;  %5571 = vmatprep.subr.bf16.mxu0 %v6632_v3 }
 0x5a6   :  { %1265 = vmatprep.mubr.bf16.mxu1 %v6631_v2  ;;  %5585 = vmatprep.mubr.msk.bf16.mxu0 %vm6633_vm0, %v6632_v3 }
 0x5a8   :  { %1236 = vmatpush1.bf16.msra.mxu1 %v6846_v51  ;;  %5572 = vmatpush3.bf16.msra.mxu0 %v6852_v52 }
 0x5a9   :  { %1237 = vmatprep.subr.bf16.mxu1 %v6858_v53  ;;  %5573 = vmatprep.subr.bf16.mxu0 %v6632_v3 }
 0x5ac   :  { %1238 = vmatpush1.bf16.msra.mxu1 %v6868_v54  ;;  %5574 = vmatpush3.bf16.msra.mxu0 %v6874_v55 }
 0x5ad   :  { %1239 = vmatprep.subr.bf16.mxu1 %v6880_v56  ;;  %5575 = vmatprep.subr.bf16.mxu0 %v6632_v3 }
 0x5b0   :  { %1240 = vmatpush1.bf16.msra.mxu1 %v6887_v57  ;;  %5576 = vmatpush3.bf16.msra.mxu0 %v6893_v58 }
 0x5b1   :  { %1241 = vmatprep.subr.bf16.mxu1 %v6899_v59  ;;  %5577 = vmatprep.subr.bf16.mxu0 %v6632_v3 }
 0x5b4   :  { %1242 = vmatpush1.bf16.msra.mxu1 %v6906_v60  ;;  %5578 = vmatpush3.bf16.msra.mxu0 %v6912_v61 }
 0x5b5   :  { %1243 = vmatprep.subr.bf16.mxu1 %v6918_v62  ;;  %5579 = vmatprep.subr.bf16.mxu0 %v6632_v3 }
 0x5b8   :  { %1244 = vmatpush1.bf16.msra.mxu1 %v6925_v63  ;;  %5580 = vmatpush3.bf16.msra.mxu0 %v6931_v0 }
 0x5b9   :  { %1245 = vmatprep.subr.bf16.mxu1 %v6937_v1  ;;  %5581 = vmatprep.subr.bf16.mxu0 %v6632_v3 }
 0x5bc   :  { %1246 = vmatpush1.bf16.msra.mxu1 %v6944_v4  ;;  %5582 = vmatpush3.bf16.msra.mxu0 %v6950_v5 }
 0x5bd   :  { %1247 = vmatprep.subr.bf16.mxu1 %v6956_v6  ;;  %5583 = vmatprep.subr.bf16.mxu0 %v6632_v3 }
 0x5c0   :  { %1248 = vmatpush1.bf16.msra.mxu1 %v6963_v7  ;;  %5584 = vmatpush3.bf16.msra.mxu0 %v6969_v8 }
 0x5c1   :  { %1351 = vmatprep.subr.bf16.mxu1 %v6823_v42  ;;  %5589 = vmatprep.subr.bf16.mxu0 %v6632_v3 }
 0x676   :  { %v1149_v44 = vpop.f32.mrb[20].mxu1  ;;  %v1210_v12 = vpop.f32.mrb[24].mxu0 }
 0x677   :  { %v1158_v36 = vrot.slane %v1149_v44, 2  ;;  %v1151_v38 = vpop.f32.mrb[21].mxu1  ;;  %v5567_v39 = vpop.f32.mrb[25].mxu0  ;;  %v1211_v17 = vadd.f32 %v7086_v9, %v1210_v12 }
 0x678   :  { %v1159_v45 = vrot.slane %v1151_v38, 2  ;;  %v1153_v35 = vpop.f32.mrb[22].mxu1  ;;  %v1213_v22 = vpop.f32.mrb[26].mxu0  ;;  %v1225_v38 = vrot.slane %v7224_v32, 2 }
 0x679   :  { %v1162_v26 = vadd.f32 %v1158_v36, %v7067_v20  ;;  %v1154_v41 = vpop.f32.mrb[23].mxu1  ;;  %v5568_v40 = vpop.f32.mrb[27].mxu0  ;;  %v1217_v30 = vrot.slane %v1211_v17, 2 }
 0x67a   :  { %v1163_v34 = vadd.f32 %v1159_v45, %v7071_v23 }
 0x67b   :  { %v4878_v49 = vmul.f32 -1.442695, %v1162_v26 }
 0x67c   :  { %v4879_v16 = vmul.f32 -1.442695, %v1163_v34 }
 0x67d   :  { %6324 = vpow2.f32 %v4878_v49 }
 0x67e   :  { %6326 = vpow2.f32 %v4879_v16 }
 0x687   :  { %v6325_v42 = vpop.eup %6324 }
 0x688   :  { %v1170_v43 = vadd.f32 1.0, %v6325_v42  ;;  %v6327_v19 = vpop.eup %6326 }
 0x689   :  { %v1171_v28 = vadd.f32 1.0, %v6327_v19 }
 0x68a   :  { %6328 = vrcp.f32 %v1170_v43 }
 0x68b   :  { %6330 = vrcp.f32 %v1171_v28 }
 0x694   :  { %v6329_v21 = vpop.eup %6328 }
 0x695   :  { %v1219_v33 = vmul.f32 %v6329_v21, %v1217_v30  ;;  %v6331_v36 = vpop.eup %6330  ;;  %v1586_v30 = vrot.slane %v7180_v15, 6 }
 0x696   :  { %v1222_v39 = vsub.f32 1.0, %v6331_v36  ;;  %v1227_v35 = vmul.f32 %v6331_v36, %v1225_v38 }
 0x697   :  { %v1220_v44 = vadd.f32 %v1219_v33, %v7055_v13 }
 0x699   :  { %6332 = vtanh.f32 %v1220_v44 }
 0x6a3   :  { %v6333_v45 = vpop.eup %6332 }
 0x6a4   :  { %v1223_v22 = vmul.f32 %v6333_v45, %v1222_v39  ;;  %v6531_v45 = vld [vmem:[%s8962_s3] ss:$12 sps:$4 sm:$0xff]  }
 0x6a6   :  { %v7269_v26 = vadd.f32 %v1227_v35, %v1223_v22  ;;  %v6532_v35 = vld [vmem:[%s8962_s3 + $0x8] ss:$12 sps:$4 sm:$0xff]  }
 0x6a7   :  { %v6533_v22 = vld [vmem:[%s8962_s3 + $0x1c] ss:$12 sps:$4 sm:$0xff]  }
 0x6a8   :  { %v1229_v12 = vpack.c.bf16 %v7269_v26, %v7269_v26  ;;  %v7276_v41 = vsel %vm186_vm6, %v7269_v26, %v1225_v38 }
 0x6a9   :  { %v1606_v36 = vrot.slane %v7276_v41, 6  ;;  %v6535_v41 = vld [vmem:[%s8962_s3 + $0x20] ss:$12 sps:$4 sm:$0xff]  }
 0x6aa   :  { %v1231_v40 = vrot.slane %v1229_v12, 3  ;;  %v6534_v12 = vld [vmem:[%s8962_s3 + $0x18] ss:$12 sps:$4 sm:$0xff]  }
 0x6ac   :  { %1266 = vmatmul.mubr.bf16.vlgmr.msra.gmra.mrb[24].mxu1 %v1231_v40  ;;  %5586 = vmatmul.mubr.bf16.vlgmr.msra.gmra.mrb[28].mxu0 %v1231_v40  ;;  %v6536_v40 = vld [vmem:[%s8962_s3 + $0x34] ss:$12 sps:$4 sm:$0xff]  }
 0x6ad   :  { %1352 = vmatpush1.bf16.msra.mxu1 %v6830_v46  ;;  %5590 = vmatpush3.bf16.msra.mxu0 %v6835_v47  ;;  %v6530_v46 = vld [vmem:[%s8962_s3 + $0x4] ss:$12 sps:$4 sm:$0xff]  }
 0x6ae   :  { %1353 = vmatprep.subr.bf16.mxu1 %v6840_v50  ;;  %5591 = vmatprep.subr.bf16.mxu0 %v6632_v3 }
 0x6af   :  { %1383 = vmatprep.mubr.bf16.mxu1 %v6631_v2  ;;  %5605 = vmatprep.mubr.msk.bf16.mxu0 %vm6633_vm0, %v6632_v3 }
 0x6b1   :  { %1354 = vmatpush1.bf16.msra.mxu1 %v6846_v51  ;;  %5592 = vmatpush3.bf16.msra.mxu0 %v6852_v52 }
 0x6b2   :  { %1355 = vmatprep.subr.bf16.mxu1 %v6858_v53  ;;  %5593 = vmatprep.subr.bf16.mxu0 %v6632_v3 }
 0x6b5   :  { %1356 = vmatpush1.bf16.msra.mxu1 %v6868_v54  ;;  %5594 = vmatpush3.bf16.msra.mxu0 %v6874_v55 }
 0x6b6   :  { %1357 = vmatprep.subr.bf16.mxu1 %v6880_v56  ;;  %5595 = vmatprep.subr.bf16.mxu0 %v6632_v3 }
 0x6b9   :  { %1358 = vmatpush1.bf16.msra.mxu1 %v6887_v57  ;;  %5596 = vmatpush3.bf16.msra.mxu0 %v6893_v58 }
 0x6ba   :  { %1359 = vmatprep.subr.bf16.mxu1 %v6899_v59  ;;  %5597 = vmatprep.subr.bf16.mxu0 %v6632_v3 }
 0x6bd   :  { %1360 = vmatpush1.bf16.msra.mxu1 %v6906_v60  ;;  %5598 = vmatpush3.bf16.msra.mxu0 %v6912_v61 }
 0x6be   :  { %1361 = vmatprep.subr.bf16.mxu1 %v6918_v62  ;;  %5599 = vmatprep.subr.bf16.mxu0 %v6632_v3 }
 0x6c1   :  { %1362 = vmatpush1.bf16.msra.mxu1 %v6925_v63  ;;  %5600 = vmatpush3.bf16.msra.mxu0 %v6931_v0 }
 0x6c2   :  { %1363 = vmatprep.subr.bf16.mxu1 %v6937_v1  ;;  %5601 = vmatprep.subr.bf16.mxu0 %v6632_v3 }
 0x6c5   :  { %1364 = vmatpush1.bf16.msra.mxu1 %v6944_v4  ;;  %5602 = vmatpush3.bf16.msra.mxu0 %v6950_v5 }
 0x6c6   :  { %1365 = vmatprep.subr.bf16.mxu1 %v6956_v6  ;;  %5603 = vmatprep.subr.bf16.mxu0 %v6632_v3 }
 0x6c9   :  { %1366 = vmatpush1.bf16.msra.mxu1 %v6963_v7  ;;  %5604 = vmatpush3.bf16.msra.mxu0 %v6969_v8  ;;  %v1343_v8 = vrot.slane %v7269_v26, 2 }
 0x6ca   :  { %1469 = vmatprep.subr.bf16.mxu1 %v6530_v46  ;;  %5609 = vmatprep.subr.bf16.mxu0 %v6632_v3  ;;  %v6537_v46 = vld [vmem:[%s8962_s3 + $0x30] ss:$12 sps:$4 sm:$0xff]  }
 0x77f   :  { %v1267_v47 = vpop.f32.mrb[24].mxu1  ;;  %v1328_v50 = vpop.f32.mrb[28].mxu0 }
 0x780   :  { %v1276_v51 = vrot.slane %v1267_v47, 4  ;;  %v1269_v52 = vpop.f32.mrb[25].mxu1  ;;  %v5587_v53 = vpop.f32.mrb[29].mxu0  ;;  %v1329_v5 = vadd.f32 %v7086_v9, %v1328_v50  ;;  %v6538_v47 = vld [vmem:[%s8962_s3 + $0x38] ss:$12 sps:$4 sm:$0xff]  }
 0x781   :  { %v1277_v54 = vrot.slane %v1269_v52, 4  ;;  %v1271_v55 = vpop.f32.mrb[26].mxu1  ;;  %v1331_v56 = vpop.f32.mrb[30].mxu0  ;;  %v6539_v50 = vld [vmem:[%s8962_s3 + $0x4c] ss:$12 sps:$4 sm:$0xff]  }
 0x782   :  { %v1280_v57 = vadd.f32 %v1276_v51, %v7075_v24  ;;  %v1272_v58 = vpop.f32.mrb[27].mxu1  ;;  %v5588_v59 = vpop.f32.mrb[31].mxu0  ;;  %v1335_v6 = vrot.slane %v1329_v5, 4  ;;  %v6540_v51 = vld [vmem:[%s8962_s3 + $0x48] ss:$12 sps:$4 sm:$0xff]  }
 0x783   :  { %v1281_v60 = vadd.f32 %v1277_v54, %v7079_v27  ;;  %v6541_v52 = vld [vmem:[%s8962_s3 + $0x50] ss:$12 sps:$4 sm:$0xff]   ;;  %v6543_v54 = vld [vmem:[%s8962_s3 + $0x60] ss:$12 sps:$4 sm:$0xff]   ;;  %v6544_v55 = vld [vmem:[%s8962_s3 + $0x68] ss:$12 sps:$4 sm:$0xff]  }
 0x784   :  { %v4880_v61 = vmul.f32 -1.442695, %v1280_v57  ;;  %v6542_v53 = vld [vmem:[%s8962_s3 + $0x64] ss:$12 sps:$4 sm:$0xff]   ;;  %v6545_v56 = vld [vmem:[%s8962_s3 + $0x7c] ss:$12 sps:$4 sm:$0xff]  }
 0x785   :  { %v4881_v62 = vmul.f32 -1.442695, %v1281_v60  ;;  %v6546_v57 = vld [vmem:[%s8962_s3 + $0x78] ss:$12 sps:$4 sm:$0xff]   ;;  %v6547_v58 = vld [vmem:[%s8962_s3 + $0x80] ss:$12 sps:$4 sm:$0xff]  }
 0x786   :  { %6334 = vpow2.f32 %v4880_v61  ;;  %v6548_v59 = vld [vmem:[%s8962_s3 + $0x94] ss:$12 sps:$4 sm:$0xff]   ;;  %v6549_v60 = vld [vmem:[%s8962_s3 + $0x90] ss:$12 sps:$4 sm:$0xff]   ;;  %v6550_v61 = vld [vmem:[%s8962_s3 + $0x98] ss:$12 sps:$4 sm:$0xff]  }
 0x787   :  { %6336 = vpow2.f32 %v4881_v62  ;;  %v6551_v62 = vld [vmem:[%s8962_s3 + $0xac] ss:$12 sps:$4 sm:$0xff]  }
 0x790   :  { %v6335_v63 = vpop.eup %6334 }
 0x791   :  { %v6337_v0 = vpop.eup %6336  ;;  %v1288_v1 = vadd.f32 1.0, %v6335_v63  ;;  %v6552_v63 = vld [vmem:[%s8962_s3 + $0xa8] ss:$12 sps:$4 sm:$0xff]  }
 0x792   :  { %v1289_v4 = vadd.f32 1.0, %v6337_v0  ;;  %v6553_v0 = vld [vmem:[%s8962_s3 + $0xb0] ss:$12 sps:$4 sm:$0xff]  }
 0x793   :  { %6338 = vrcp.f32 %v1288_v1 }
 0x794   :  { %6340 = vrcp.f32 %v1289_v4 }
 0x79d   :  { %v6339_v7 = vpop.eup %6338 }
 0x79e   :  { %v6341_v49 = vpop.eup %6340  ;;  %v1337_v34 = vmul.f32 %v6339_v7, %v1335_v6 }
 0x79f   :  { %v1345_v16 = vmul.f32 %v6341_v49, %v1343_v8  ;;  %v1340_v43 = vsub.f32 1.0, %v6341_v49 }
 0x7a0   :  { %v1338_v42 = vadd.f32 %v1337_v34, %v7063_v18 }
 0x7a2   :  { %6342 = vtanh.f32 %v1338_v42 }
 0x7ac   :  { %v6343_v19 = vpop.eup %6342 }
 0x7ad   :  { %v1341_v17 = vmul.f32 %v6343_v19, %v1340_v43 }
 0x7af   :  { %v7320_v28 = vadd.f32 %v1345_v16, %v1341_v17 }
 0x7b1   :  { %v1347_v21 = vpack.c.bf16 %v7320_v28, %v7320_v28  ;;  %v1588_v33 = vsel %vm186_vm6, %v7320_v28, %v1586_v30 }
 0x7b2   :  { %v1609_v44 = vrot.slane %v1588_v33, 2 }
 0x7b3   :  { %v1349_v38 = vrot.slane %v1347_v21, 2 }
 0x7b4   :  { %v7330_v39 = vsel %vm1617_vm7, %v1606_v36, %v1609_v44 }
 0x7b5   :  { %1384 = vmatmul.mubr.bf16.vlgmr.msra.gmra.mrb[28].mxu1 %v1349_v38  ;;  %5606 = vmatmul.mubr.bf16.vlgmr.msra.gmra.mrb[32].mxu0 %v1349_v38 }
 0x7b6   :  { %1470 = vmatpush1.bf16.msra.mxu1 %v6531_v45  ;;  %5610 = vmatpush3.bf16.msra.mxu0 %v6532_v35 }
 0x7b7   :  { %1471 = vmatprep.subr.bf16.mxu1 %v6533_v22  ;;  %5611 = vmatprep.subr.bf16.mxu0 %v6632_v3 }
 0x7b8   :  { %1501 = vmatprep.mubr.bf16.mxu1 %v6631_v2  ;;  %5625 = vmatprep.mubr.msk.bf16.mxu0 %vm6633_vm0, %v6632_v3 }
 0x7ba   :  { %1472 = vmatpush1.bf16.msra.mxu1 %v6534_v12  ;;  %5612 = vmatpush3.bf16.msra.mxu0 %v6535_v41 }
 0x7bb   :  { %1473 = vmatprep.subr.bf16.mxu1 %v6536_v40  ;;  %5613 = vmatprep.subr.bf16.mxu0 %v6632_v3 }
 0x7be   :  { %1474 = vmatpush1.bf16.msra.mxu1 %v6537_v46  ;;  %5614 = vmatpush3.bf16.msra.mxu0 %v6538_v47 }
 0x7bf   :  { %1475 = vmatprep.subr.bf16.mxu1 %v6539_v50  ;;  %5615 = vmatprep.subr.bf16.mxu0 %v6632_v3 }
 0x7c2   :  { %1476 = vmatpush1.bf16.msra.mxu1 %v6540_v51  ;;  %5616 = vmatpush3.bf16.msra.mxu0 %v6541_v52 }
 0x7c3   :  { %1477 = vmatprep.subr.bf16.mxu1 %v6542_v53  ;;  %5617 = vmatprep.subr.bf16.mxu0 %v6632_v3 }
 0x7c6   :  { %1478 = vmatpush1.bf16.msra.mxu1 %v6543_v54  ;;  %5618 = vmatpush3.bf16.msra.mxu0 %v6544_v55  ;;  %v6158_v54 = vld [vmem:[%s8961_s2 + $0xc4] ss:$12 sps:$4 sm:$0xff]   ;;  %v6162_v55 = vld [vmem:[%s8961_s2 + $0xdc] ss:$12 sps:$4 sm:$0xff]  }
 0x7c7   :  { %1479 = vmatprep.subr.bf16.mxu1 %v6545_v56  ;;  %5619 = vmatprep.subr.bf16.mxu0 %v6632_v3  ;;  %v6160_v56 = vld [vmem:[%s8961_s2 + $0xd8] ss:$12 sps:$4 sm:$0xff]  }
 0x7ca   :  { %1480 = vmatpush1.bf16.msra.mxu1 %v6546_v57  ;;  %5620 = vmatpush3.bf16.msra.mxu0 %v6547_v58  ;;  %v6163_v57 = vld [vmem:[%s8961_s2 + $0xe0] ss:$12 sps:$4 sm:$0xff]  }
 0x7cb   :  { %1481 = vmatprep.subr.bf16.mxu1 %v6548_v59  ;;  %5621 = vmatprep.subr.bf16.mxu0 %v6632_v3  ;;  %v6166_v58 = vld [vmem:[%s8961_s2 + $0xf4] ss:$12 sps:$4 sm:$0xff]   ;;  %v6164_v59 = vld [vmem:[%s8961_s2 + $0xf0] ss:$12 sps:$4 sm:$0xff]  }
 0x7ce   :  { %1482 = vmatpush1.bf16.msra.mxu1 %v6549_v60  ;;  %5622 = vmatpush3.bf16.msra.mxu0 %v6550_v61  ;;  %v6167_v60 = vld [vmem:[%s8961_s2 + $0xf8] ss:$12 sps:$4 sm:$0xff]  }
 0x7cf   :  { %1483 = vmatprep.subr.bf16.mxu1 %v6551_v62  ;;  %5623 = vmatprep.subr.bf16.mxu0 %v6632_v3  ;;  %v6170_v61 = vld [vmem:[%s8961_s2 + $0x10c] ss:$12 sps:$4 sm:$0xff]   ;;  %v6168_v62 = vld [vmem:[%s8961_s2 + $0x108] ss:$12 sps:$4 sm:$0xff]  }
 0x7d2   :  { %1484 = vmatpush1.bf16.msra.mxu1 %v6552_v63  ;;  %5624 = vmatpush3.bf16.msra.mxu0 %v6553_v0  ;;  %v6171_v63 = vld [vmem:[%s8961_s2 + $0x110] ss:$12 sps:$4 sm:$0xff]  }
 0x7d3   :  { %5629 = vmatprep.subr.bf16.mxu0 %v6632_v3  ;;  %1806 = vmatprep.subr.bf16.mxu1 %v6158_v54  ;;  %v6174_v0 = vld [vmem:[%s8961_s2 + $0x124] ss:$12 sps:$4 sm:$0xff]  }
 0x888   :  { %v1385_v1 = vpop.f32.mrb[28].mxu1  ;;  %v1446_v4 = vpop.f32.mrb[32].mxu0 }
 0x889   :  { %v1394_v5 = vrot.slane %v1385_v1, 6  ;;  %v1387_v6 = vpop.f32.mrb[29].mxu1  ;;  %v5607_v7 = vpop.f32.mrb[33].mxu0  ;;  %v1447_v36 = vadd.f32 %v7086_v9, %v1446_v4  ;;  %v6172_v1 = vld [vmem:[%s8961_s2 + $0x120] ss:$12 sps:$4 sm:$0xff]  }
 0x88a   :  { %v1395_v8 = vrot.slane %v1387_v6, 6  ;;  %v1389_v49 = vpop.f32.mrb[30].mxu1  ;;  %v1449_v34 = vpop.f32.mrb[34].mxu0  ;;  %v6175_v4 = vld [vmem:[%s8961_s2 + $0x128] ss:$12 sps:$4 sm:$0xff]  }
 0x88b   :  { %v1398_v16 = vadd.f32 %v1394_v5, %v7067_v20  ;;  %v1390_v42 = vpop.f32.mrb[31].mxu1  ;;  %v5608_v43 = vpop.f32.mrb[35].mxu0  ;;  %v1453_v45 = vrot.slane %v1447_v36, 6  ;;  %v6176_v5 = vld [vmem:[%s8961_s2 + $0x138] ss:$12 sps:$4 sm:$0xff]  }
 0x88c   :  { %v1399_v17 = vadd.f32 %v1395_v8, %v7071_v23  ;;  %v1461_v23 = vrot.slane %v7320_v28, 2  ;;  %v6178_v6 = vld [vmem:[%s8961_s2 + $0x13c] ss:$12 sps:$4 sm:$0xff]   ;;  %v6179_v7 = vld [vmem:[%s8961_s2 + $0x140] ss:$12 sps:$4 sm:$0xff]  }
 0x88d   :  { %v4882_v19 = vmul.f32 -1.442695, %v1398_v16  ;;  %v6182_v8 = vld [vmem:[%s8961_s2 + $0x154] ss:$12 sps:$4 sm:$0xff]   ;;  %v6180_v49 = vld [vmem:[%s8961_s2 + $0x150] ss:$12 sps:$4 sm:$0xff]  }
 0x88e   :  { %v4883_v30 = vmul.f32 -1.442695, %v1399_v17  ;;  %v6183_v34 = vld [vmem:[%s8961_s2 + $0x158] ss:$12 sps:$4 sm:$0xff]   ;;  %v6184_v42 = vld [vmem:[%s8961_s2 + $0x168] ss:$12 sps:$4 sm:$0xff]  }
 0x88f   :  { %6344 = vpow2.f32 %v4882_v19  ;;  %v6186_v16 = vld [vmem:[%s8961_s2 + $0x16c] ss:$12 sps:$4 sm:$0xff]   ;;  %v6187_v43 = vld [vmem:[%s8961_s2 + $0x170] ss:$12 sps:$4 sm:$0xff]  }
 0x890   :  { %6346 = vpow2.f32 %v4883_v30  ;;  %v7516_v19 = vld [vmem:[%s8962_s3 + $0xc4] ss:$12 sps:$4 sm:$0xff]  }
 0x899   :  { %v6345_v21 = vpop.eup %6344 }
 0x89a   :  { %v1406_v33 = vadd.f32 1.0, %v6345_v21  ;;  %v6347_v44 = vpop.eup %6346 }
 0x89b   :  { %v1407_v38 = vadd.f32 1.0, %v6347_v44 }
 0x89c   :  { %6348 = vrcp.f32 %v1406_v33 }
 0x89d   :  { %6350 = vrcp.f32 %v1407_v38 }
 0x8a6   :  { %v6349_v35 = vpop.eup %6348 }
 0x8a7   :  { %v1455_v22 = vmul.f32 %v6349_v35, %v1453_v45  ;;  %v6351_v12 = vpop.eup %6350 }
 0x8a8   :  { %v1458_v41 = vsub.f32 1.0, %v6351_v12  ;;  %v1463_v46 = vmul.f32 %v6351_v12, %v1461_v23 }
 0x8a9   :  { %v1456_v20 = vadd.f32 %v1455_v22, %v7055_v13 }
 0x8ab   :  { %6352 = vtanh.f32 %v1456_v20 }
 0x8b5   :  { %v6353_v40 = vpop.eup %6352 }
 0x8b6   :  { %v1459_v47 = vmul.f32 %v6353_v40, %v1458_v41 }
 0x8b8   :  { %v7419_v50 = vadd.f32 %v1463_v46, %v1459_v47 }
 0x8ba   :  { %v1465_v9 = vpack.c.bf16 %v7419_v50, %v7419_v50  ;;  %v1589_v13 = vsel %vm186_vm6, %v7419_v50, %v1001_v48  ;;  %v6156_v48 = vld [vmem:[%s8961_s2 + $0xc0] ss:$12 sps:$4 sm:$0xff]  }
 0x8bb   :  { %v1612_v51 = vrot.slane %v1589_v13, 6  ;;  %v1570_v13 = vrot.slane %v7419_v50, 2 }
 0x8bc   :  { %v1467_v52 = vrot.slane %v1465_v9, 1 }
 0x8bd   :  { %v7430_v53 = vsel %vm1619_vm8, %v7330_v39, %v1612_v51  ;;  %v6159_v39 = vld [vmem:[%s8961_s2 + $0xc8] ss:$12 sps:$4 sm:$0xff]  }
 0x8be   :  { %1502 = vmatmul.mubr.bf16.vlgmr.msra.gmra.mrb[32].mxu1 %v1467_v52  ;;  %5626 = vmatmul.mubr.bf16.vlgmr.msra.gmra.mrb[36].mxu0 %v1467_v52 }
 0x8bf   :  { %1838 = vmatprep.mubr.bf16.mxu1 %v6631_v2  ;;  %5645 = vmatprep.mubr.msk.bf16.mxu0 %vm6633_vm0, %v6632_v3 }
 0x8c0   :  { %1807 = vmatpush1.bf16.msra.mxu1 %v6156_v48  ;;  %5630 = vmatpush3.bf16.msra.mxu0 %v6159_v39 }
 0x8c1   :  { %5631 = vmatprep.subr.bf16.mxu0 %v6632_v3  ;;  %1808 = vmatprep.subr.bf16.mxu1 %v6162_v55 }
 0x8c4   :  { %1809 = vmatpush1.bf16.msra.mxu1 %v6160_v56  ;;  %5632 = vmatpush3.bf16.msra.mxu0 %v6163_v57  ;;  %v1578_v57 = vrot.slane %v7419_v50, 6 }
 0x8c5   :  { %5633 = vmatprep.subr.bf16.mxu0 %v6632_v3  ;;  %1810 = vmatprep.subr.bf16.mxu1 %v6166_v58 }
 0x8c8   :  { %1811 = vmatpush1.bf16.msra.mxu1 %v6164_v59  ;;  %5634 = vmatpush3.bf16.msra.mxu0 %v6167_v60  ;;  %v1582_v59 = vrot.slane %v7269_v26, 6  ;;  %v1590_v60 = vrot.slane %v7090_v37, 6 }
 0x8c9   :  { %5635 = vmatprep.subr.bf16.mxu0 %v6632_v3  ;;  %1812 = vmatprep.subr.bf16.mxu1 %v6170_v61 }
 0x8cc   :  { %1813 = vmatpush1.bf16.msra.mxu1 %v6168_v62  ;;  %5636 = vmatpush3.bf16.msra.mxu0 %v6171_v63  ;;  %v1580_v62 = vsel %vm186_vm6, %v7134_v31, %v1578_v57 }
 0x8cd   :  { %5637 = vmatprep.subr.bf16.mxu0 %v6632_v3  ;;  %1814 = vmatprep.subr.bf16.mxu1 %v6174_v0  ;;  %v1584_v0 = vsel %vm186_vm6, %v7224_v32, %v1582_v59  ;;  %v7560_v32 = vld [vmem:[%s8962_s3 + $0xc8] ss:$12 sps:$4 sm:$0xff]  }
 0x8ce   :  { %v1603_v28 = vrot.slane %v1584_v0, 2 }
 0x8d0   :  { %1815 = vmatpush1.bf16.msra.mxu1 %v6172_v1  ;;  %5638 = vmatpush3.bf16.msra.mxu0 %v6175_v4  ;;  %v1597_v1 = vrot.slane %v1580_v62, 2 }
 0x8d1   :  { %5639 = vmatprep.subr.bf16.mxu0 %v6632_v3  ;;  %1816 = vmatprep.subr.bf16.mxu1 %v6178_v6 }
 0x8d4   :  { %1817 = vmatpush1.bf16.msra.mxu1 %v6176_v5  ;;  %5640 = vmatpush3.bf16.msra.mxu0 %v6179_v7 }
 0x8d5   :  { %1818 = vmatprep.subr.bf16.mxu1 %v6182_v8  ;;  %5641 = vmatprep.subr.bf16.mxu0 %v6632_v3  ;;  %v7571_v8 = vld [vmem:[%s8962_s3 + $0xd8] ss:$12 sps:$4 sm:$0xff]  }
 0x8d8   :  { %1819 = vmatpush1.bf16.msra.mxu1 %v6180_v49  ;;  %5642 = vmatpush3.bf16.msra.mxu0 %v6183_v34  ;;  %v7577_v49 = vld [vmem:[%s8962_s3 + $0xe0] ss:$12 sps:$4 sm:$0xff]  }
 0x8d9   :  { %1820 = vmatprep.subr.bf16.mxu1 %v6186_v16  ;;  %5643 = vmatprep.subr.bf16.mxu0 %v6632_v3  ;;  %v7583_v34 = vld [vmem:[%s8962_s3 + $0xf4] ss:$12 sps:$4 sm:$0xff]   ;;  %v7593_v16 = vld [vmem:[%s8962_s3 + $0xf0] ss:$12 sps:$4 sm:$0xff]  }
 0x8dc   :  { %1821 = vmatpush1.bf16.msra.mxu1 %v6184_v42  ;;  %5644 = vmatpush3.bf16.msra.mxu0 %v6187_v43  ;;  %v7599_v42 = vld [vmem:[%s8962_s3 + $0xf8] ss:$12 sps:$4 sm:$0xff]  }
 0x8dd   :  { %2053 = vmatprep.subr.bf16.mxu1 %v7516_v19  ;;  %5649 = vmatprep.subr.bf16.mxu0 %v6632_v3  ;;  %v7605_v43 = vld [vmem:[%s8962_s3 + $0x10c] ss:$12 sps:$4 sm:$0xff]  }
 0x991   :  { %v1503_v17 = vpop.f32.mrb[32].mxu1  ;;  %v1558_v30 = vpop.f32.mrb[36].mxu0 }
 0x992   :  { %v1510_v21 = vadd.f32 %v1503_v17, %v7075_v24  ;;  %v1505_v33 = vpop.f32.mrb[33].mxu1  ;;  %v5627_v44 = vpop.f32.mrb[37].mxu0  ;;  %v6554_v24 = vld [vmem:[%s8964_s5] ss:$0 sm:$0xff]  ;;  %v7612_v17 = vld [vmem:[%s8962_s3 + $0x108] ss:$12 sps:$4 sm:$0xff]  }
 0x993   :  { %v1511_v36 = vadd.f32 %v1505_v33, %v7079_v27  ;;  %v1507_v38 = vpop.f32.mrb[34].mxu1  ;;  %v1561_v45 = vpop.f32.mrb[38].mxu0  ;;  %v1559_v9 = vadd.f32 %v6554_v24, %v1558_v30  ;;  %v7618_v30 = vld [vmem:[%s8962_s3 + $0x110] ss:$12 sps:$4 sm:$0xff]   ;;  %v7631_v33 = vld [vmem:[%s8962_s3 + $0x120] ss:$12 sps:$4 sm:$0xff]  }
 0x994   :  { %v4884_v35 = vmul.f32 -1.442695, %v1510_v21  ;;  %v1508_v22 = vpop.f32.mrb[35].mxu1  ;;  %v5628_v20 = vpop.f32.mrb[39].mxu0  ;;  %v7624_v21 = vld [vmem:[%s8962_s3 + $0x124] ss:$12 sps:$4 sm:$0xff]  }
 0x995   :  { %v4885_v12 = vmul.f32 -1.442695, %v1511_v36  ;;  %v7637_v44 = vld [vmem:[%s8962_s3 + $0x128] ss:$12 sps:$4 sm:$0xff]   ;;  %v7650_v38 = vld [vmem:[%s8962_s3 + $0x138] ss:$12 sps:$4 sm:$0xff]  }
 0x996   :  { %6354 = vpow2.f32 %v4884_v35  ;;  %v7643_v36 = vld [vmem:[%s8962_s3 + $0x13c] ss:$12 sps:$4 sm:$0xff]   ;;  %v7656_v45 = vld [vmem:[%s8962_s3 + $0x140] ss:$12 sps:$4 sm:$0xff]   ;;  %v7675_v20 = vld [vmem:[%s8962_s3 + $0x158] ss:$12 sps:$4 sm:$0xff]  }
 0x997   :  { %6356 = vpow2.f32 %v4885_v12  ;;  %v7662_v35 = vld [vmem:[%s8962_s3 + $0x154] ss:$12 sps:$4 sm:$0xff]   ;;  %v7669_v22 = vld [vmem:[%s8962_s3 + $0x150] ss:$12 sps:$4 sm:$0xff]   ;;  %v7681_v12 = vld [vmem:[%s8962_s3 + $0x16c] ss:$12 sps:$4 sm:$0xff]  }
 0x9a0   :  { %v6355_v41 = vpop.eup %6354 }
 0x9a1   :  { %v6357_v40 = vpop.eup %6356  ;;  %v1518_v46 = vadd.f32 1.0, %v6355_v41  ;;  %v7688_v41 = vld [vmem:[%s8962_s3 + $0x168] ss:$12 sps:$4 sm:$0xff]  }
 0x9a2   :  { %v1519_v47 = vadd.f32 1.0, %v6357_v40  ;;  %v7694_v40 = vld [vmem:[%s8962_s3 + $0x170] ss:$12 sps:$4 sm:$0xff]  }
 0x9a3   :  { %6358 = vrcp.f32 %v1518_v46  ;;  %v4918_v46 = vld [vmem:[%s8963_s4 + $0x3] sm:$0x7] }
 0x9a4   :  { %6360 = vrcp.f32 %v1519_v47  ;;  %v1666_v47 = vrot.slane %v4918_v46, %v7015_v10  ;;  %v1674_v24 = vrot.slane %v4918_v46, %v7017_v11 }
 0x9ad   :  { %v6359_v27 = vpop.eup %6358 }
 0x9ae   :  { %v6361_v51 = vpop.eup %6360  ;;  %v1564_v52 = vmul.f32 %v6359_v27, %v1559_v9  ;;  %v1670_v9 = vrot.slane %v4918_v46, %v7023_v14 }
 0x9af   :  { %v1572_v54 = vmul.f32 %v6361_v51, %v1570_v13  ;;  %v1567_v39 = vsub.f32 1.0, %v6361_v51 }
 0x9b0   :  { %v1565_v48 = vadd.f32 %v1564_v52, %v7063_v18  ;;  %v1581_v18 = vsel %vm186_vm6, %v7180_v15, %v1461_v23 }
 0x9b1   :  { %v1600_v5 = vrot.slane %v1581_v18, 6 }
 0x9b2   :  { %6362 = vtanh.f32 %v1565_v48 }
 0x9bc   :  { %v6363_v55 = vpop.eup %6362 }
 0x9bd   :  { %v1568_v56 = vmul.f32 %v6363_v55, %v1567_v39 }
 0x9bf   :  { %v1573_v58 = vadd.f32 %v1572_v54, %v1568_v56 }
 0x9c1   :  { %v1575_v61 = vrot.slane %v1573_v58, 2  ;;  %v1592_v63 = vsel %vm186_vm6, %v1573_v58, %v1590_v60 }
 0x9c2   :  { %v1615_v50 = vrot.slane %v1592_v63, 2 }
 0x9c3   :  { %v1577_v26 = vsel %vm186_vm6, %v7090_v37, %v1575_v61  ;;  %v7555_v37 = vld [vmem:[%s8962_s3 + $0xc0] ss:$12 sps:$4 sm:$0xff]  }
 0x9c4   :  { %v1594_v31 = vrot.slane %v1577_v26, 6  ;;  %v1625_v4 = vsel %vm1621_vm9, %v7430_v53, %v1615_v50  ;;  %v7565_v53 = vld [vmem:[%s8962_s3 + $0xdc] ss:$12 sps:$4 sm:$0xff]  }
 0x9c6   :  { %v1618_v6 = vsel %vm1617_vm7, %v1594_v31, %v1597_v1 }
 0x9c7   :  { %v1620_v15 = vsel %vm1619_vm8, %v1618_v6, %v1600_v5 }
 0x9c8   :  { %v1622_v23 = vsel %vm1621_vm9, %v1620_v15, %v1603_v28 }
 0x9c9   :  { %v1626_v7 = vpack.c.bf16 %v1625_v4, %v1622_v23 }
 0x9cb   :  { %1839 = vmatmul.mubr.bf16.vlgmr.msra.gmra.mrb[36].mxu1 %v1626_v7  ;;  %5646 = vmatmul.mubr.bf16.vlgmr.msra.gmra.mrb[40].mxu0 %v1626_v7 }
 0x9cc   :  { %2054 = vmatpush1.bf16.msra.mxu1 %v7555_v37  ;;  %5650 = vmatpush3.bf16.msra.mxu0 %v7560_v32 }
 0x9cd   :  { %2055 = vmatprep.subr.bf16.mxu1 %v7565_v53  ;;  %5651 = vmatprep.subr.bf16.mxu0 %v6632_v3 }
 0x9ce   :  { %2085 = vmatprep.mubr.bf16.mxu1 %v6631_v2  ;;  %5665 = vmatprep.mubr.msk.bf16.mxu0 %vm6633_vm0, %v6632_v3 }
 0x9d0   :  { %2056 = vmatpush1.bf16.msra.mxu1 %v7571_v8  ;;  %5652 = vmatpush3.bf16.msra.mxu0 %v7577_v49 }
 0x9d1   :  { %2057 = vmatprep.subr.bf16.mxu1 %v7583_v34  ;;  %5653 = vmatprep.subr.bf16.mxu0 %v6632_v3 }
 0x9d4   :  { %2058 = vmatpush1.bf16.msra.mxu1 %v7593_v16  ;;  %5654 = vmatpush3.bf16.msra.mxu0 %v7599_v42 }
 0x9d5   :  { %2059 = vmatprep.subr.bf16.mxu1 %v7605_v43  ;;  %5655 = vmatprep.subr.bf16.mxu0 %v6632_v3 }
 0x9d8   :  { %2060 = vmatpush1.bf16.msra.mxu1 %v7612_v17  ;;  %5656 = vmatpush3.bf16.msra.mxu0 %v7618_v30 }
 0x9d9   :  { %2061 = vmatprep.subr.bf16.mxu1 %v7624_v21  ;;  %5657 = vmatprep.subr.bf16.mxu0 %v6632_v3 }
 0x9dc   :  { %2062 = vmatpush1.bf16.msra.mxu1 %v7631_v33  ;;  %5658 = vmatpush3.bf16.msra.mxu0 %v7637_v44 }
 0x9dd   :  { %2063 = vmatprep.subr.bf16.mxu1 %v7643_v36  ;;  %5659 = vmatprep.subr.bf16.mxu0 %v6632_v3 }
 0x9e0   :  { %2064 = vmatpush1.bf16.msra.mxu1 %v7650_v38  ;;  %5660 = vmatpush3.bf16.msra.mxu0 %v7656_v45 }
 0x9e1   :  { %2065 = vmatprep.subr.bf16.mxu1 %v7662_v35  ;;  %5661 = vmatprep.subr.bf16.mxu0 %v6632_v3 }
 0x9e4   :  { %2066 = vmatpush1.bf16.msra.mxu1 %v7669_v22  ;;  %5662 = vmatpush3.bf16.msra.mxu0 %v7675_v20 }
 0x9e5   :  { %2067 = vmatprep.subr.bf16.mxu1 %v7681_v12  ;;  %5663 = vmatprep.subr.bf16.mxu0 %v6632_v3 }
 0x9e8   :  { %2068 = vmatpush1.bf16.msra.mxu1 %v7688_v41  ;;  %5664 = vmatpush3.bf16.msra.mxu0 %v7694_v40 }
 0x9e9   :  { %2216 = vmatprep.subr.bf16.mxu1 %v7516_v19  ;;  %5669 = vmatprep.subr.bf16.mxu0 %v6632_v3 }
 0x9eb   :  { %2086 = vmatmul.mubr.bf16.vlgmr.msra.gmra.mrb[40].mxu1 %v6631_v2  ;;  %5666 = vmatmul.mubr.bf16.vlgmr.msra.gmra.mrb[44].mxu0 %v6631_v2 }
 0x9ec   :  { %2217 = vmatpush1.bf16.msra.mxu1 %v7555_v37  ;;  %5670 = vmatpush3.bf16.msra.mxu0 %v7560_v32 }
 0x9ed   :  { %2218 = vmatprep.subr.bf16.mxu1 %v7565_v53  ;;  %5671 = vmatprep.subr.bf16.mxu0 %v6632_v3 }
 0x9ee   :  { %2248 = vmatprep.mubr.bf16.mxu1 %v6631_v2  ;;  %5685 = vmatprep.mubr.msk.bf16.mxu0 %vm6633_vm0, %v6632_v3 }
 0x9f0   :  { %2219 = vmatpush1.bf16.msra.mxu1 %v7571_v8  ;;  %5672 = vmatpush3.bf16.msra.mxu0 %v7577_v49 }
 0x9f1   :  { %2220 = vmatprep.subr.bf16.mxu1 %v7583_v34  ;;  %5673 = vmatprep.subr.bf16.mxu0 %v6632_v3 }
 0x9f4   :  { %2221 = vmatpush1.bf16.msra.mxu1 %v7593_v16  ;;  %5674 = vmatpush3.bf16.msra.mxu0 %v7599_v42 }
 0x9f5   :  { %2222 = vmatprep.subr.bf16.mxu1 %v7605_v43  ;;  %5675 = vmatprep.subr.bf16.mxu0 %v6632_v3 }
 0x9f8   :  { %2223 = vmatpush1.bf16.msra.mxu1 %v7612_v17  ;;  %5676 = vmatpush3.bf16.msra.mxu0 %v7618_v30 }
 0x9f9   :  { %2224 = vmatprep.subr.bf16.mxu1 %v7624_v21  ;;  %5677 = vmatprep.subr.bf16.mxu0 %v6632_v3 }
 0x9fc   :  { %2225 = vmatpush1.bf16.msra.mxu1 %v7631_v33  ;;  %5678 = vmatpush3.bf16.msra.mxu0 %v7637_v44 }
 0x9fd   :  { %2226 = vmatprep.subr.bf16.mxu1 %v7643_v36  ;;  %5679 = vmatprep.subr.bf16.mxu0 %v6632_v3 }
 0xa00   :  { %2227 = vmatpush1.bf16.msra.mxu1 %v7650_v38  ;;  %5680 = vmatpush3.bf16.msra.mxu0 %v7656_v45 }
 0xa01   :  { %2228 = vmatprep.subr.bf16.mxu1 %v7662_v35  ;;  %5681 = vmatprep.subr.bf16.mxu0 %v6632_v3 }
 0xa04   :  { %2229 = vmatpush1.bf16.msra.mxu1 %v7669_v22  ;;  %5682 = vmatpush3.bf16.msra.mxu0 %v7675_v20 }
 0xa05   :  { %2230 = vmatprep.subr.bf16.mxu1 %v7681_v12  ;;  %5683 = vmatprep.subr.bf16.mxu0 %v6632_v3 }
 0xa08   :  { %2231 = vmatpush1.bf16.msra.mxu1 %v7688_v41  ;;  %5684 = vmatpush3.bf16.msra.mxu0 %v7694_v40 }
 0xa09   :  { %2334 = vmatprep.subr.bf16.mxu1 %v7516_v19  ;;  %5689 = vmatprep.subr.bf16.mxu0 %v6632_v3 }
 0xa9e   :  { %v1840_v27 = vpop.f32.mrb[36].mxu1  ;;  %v1883_v13 = vpop.f32.mrb[40].mxu0 }
 0xa9f   :  { %v1841_v51 = vadd.f32 %v1840_v27, %v1666_v47  ;;  %v1884_v52 = vadd.f32 %v1883_v13, %v1674_v24  ;;  %v1842_v54 = vpop.f32.mrb[37].mxu1  ;;  %v5647_v48 = vpop.f32.mrb[41].mxu0 }
 0xaa0   :  { %v1843_v39 = vadd.f32 %v1842_v54, %v1670_v9  ;;  %v1844_v55 = vpop.f32.mrb[38].mxu1  ;;  %v1886_v56 = vpop.f32.mrb[42].mxu0 }
 0xaa1   :  { %v1960_v57 = vrot.slane %v1884_v52, 2  ;;  %v1963_v58 = vrot.slane %v1884_v52, 6  ;;  %v1845_v59 = vadd.f32 %v1844_v55, %v1666_v47  ;;  %v1887_v60 = vadd.f32 %v1886_v56, %v1674_v24  ;;  %v1846_v61 = vpop.f32.mrb[39].mxu1  ;;  %v5648_v62 = vpop.f32.mrb[43].mxu0 }
 0xaa2   :  { %v1847_v63 = vadd.f32 %v1846_v61, %v1670_v9  ;;  %v1933_v18 = vrot.slane %v1841_v51, 2  ;;  %v1934_v50 = vrot.slane %v1843_v39, 2  ;;  %v1939_v26 = vrot.slane %v1841_v51, 6 }
 0xaa3   :  { %v1967_v0 = vrot.slane %v1887_v60, 2  ;;  %v1970_v31 = vrot.slane %v1887_v60, 6  ;;  %v7747_v1 = vsel %vm183_vm4, %v1887_v60, %v1960_v57  ;;  %v7751_v4 = vsel %vm183_vm4, %v1887_v60, %v1963_v58 }
 0xaa4   :  { %v7755_v5 = vsel %vm183_vm4, %v1845_v59, %v1933_v18  ;;  %v7759_v28 = vsel %vm7029_vm5, %v1847_v63, %v1934_v50  ;;  %v7763_v6 = vsel %vm183_vm4, %v1845_v59, %v1939_v26  ;;  %v1940_v15 = vrot.slane %v1843_v39, 6 }
 0xaa5   :  { %v1947_v23 = vrot.slane %v1845_v59, 2  ;;  %v7767_v7 = vsel %vm183_vm4, %v1884_v52, %v1967_v0  ;;  %v1948_v46 = vrot.slane %v1847_v63, 2  ;;  %v1953_v47 = vrot.slane %v1845_v59, 6 }
 0xaa6   :  { %v7771_v24 = vsel %vm7029_vm5, %v1847_v63, %v1940_v15  ;;  %v7775_v9 = vsel %vm183_vm4, %v1884_v52, %v1970_v31  ;;  %v1954_v27 = vrot.slane %v1847_v63, 6  ;;  %v7798_v15 = vld [vmem:[%s8964_s5 + $0x1] ss:$0 sm:$0xff] }
 0xaa7   :  { %v7779_v13 = vsel %vm183_vm4, %v1841_v51, %v1947_v23  ;;  %v7783_v54 = vsel %vm7029_vm5, %v1843_v39, %v1948_v46  ;;  %v7787_v48 = vsel %vm183_vm4, %v1841_v51, %v1953_v47 }
 0xaa8   :  { %v7791_v55 = vsel %vm7029_vm5, %v1843_v39, %v1954_v27 }
 0xabe   :  { %v2087_v56 = vpop.f32.mrb[40].mxu1  ;;  %v2196_v52 = vpop.f32.mrb[44].mxu0 }
 0xabf   :  { %v2096_v57 = vrot.slane %v2087_v56, 2  ;;  %v2089_v58 = vpop.f32.mrb[41].mxu1  ;;  %v5667_v59 = vpop.f32.mrb[45].mxu0  ;;  %v2197_v23 = vadd.f32 %v7798_v15, %v2196_v52 }
 0xac0   :  { %v2097_v60 = vrot.slane %v2089_v58, 2  ;;  %v2091_v61 = vpop.f32.mrb[42].mxu1  ;;  %v2199_v62 = vpop.f32.mrb[46].mxu0 }
 0xac1   :  { %v2100_v63 = vadd.f32 %v2096_v57, %v7755_v5  ;;  %v2092_v18 = vpop.f32.mrb[43].mxu1  ;;  %v5668_v50 = vpop.f32.mrb[47].mxu0  ;;  %v2203_v27 = vrot.slane %v2197_v23, 2 }
 0xac2   :  { %v2101_v51 = vadd.f32 %v2097_v60, %v7759_v28 }
 0xac3   :  { %v4993_v26 = vmul.f32 -1.442695, %v2100_v63 }
 0xac4   :  { %v4994_v0 = vmul.f32 -1.442695, %v2101_v51 }
 0xac5   :  { %6364 = vpow2.f32 %v4993_v26 }
 0xac6   :  { %6366 = vpow2.f32 %v4994_v0 }
 0xacf   :  { %v6365_v39 = vpop.eup %6364 }
 0xad0   :  { %v2108_v31 = vadd.f32 1.0, %v6365_v39  ;;  %v6367_v46 = vpop.eup %6366 }
 0xad1   :  { %v2109_v47 = vadd.f32 1.0, %v6367_v46 }
 0xad2   :  { %6368 = vrcp.f32 %v2108_v31 }
 0xad3   :  { %6370 = vrcp.f32 %v2109_v47 }
 0xadc   :  { %v6369_v56 = vpop.eup %6368 }
 0xadd   :  { %v2205_v57 = vmul.f32 %v6369_v56, %v2203_v27  ;;  %v6371_v59 = vpop.eup %6370 }
 0xade   :  { %v2208_v60 = vsub.f32 1.0, %v6371_v59  ;;  %v2210_v62 = vmul.f32 0.0, %v6371_v59 }
 0xadf   :  { %v2206_v58 = vadd.f32 %v2205_v57, %v7747_v1 }
 0xae1   :  { %6372 = vtanh.f32 %v2206_v58 }
 0xaeb   :  { %v6373_v61 = vpop.eup %6372 }
 0xaec   :  { %v2209_v63 = vmul.f32 %v6373_v61, %v2208_v60 }
 0xaee   :  { %v7802_v18 = vadd.f32 %v2210_v62, %v2209_v63 }
 0xaf0   :  { %v2212_v50 = vpack.c.bf16 %v7802_v18, %v7802_v18 }
 0xaf2   :  { %v2214_v52 = vrot.slane %v2212_v50, 3 }
 0xaf4   :  { %2249 = vmatmul.mubr.bf16.vlgmr.msra.gmra.mrb[44].mxu1 %v2214_v52  ;;  %5686 = vmatmul.mubr.bf16.vlgmr.msra.gmra.mrb[48].mxu0 %v2214_v52 }
 0xaf5   :  { %2335 = vmatpush1.bf16.msra.mxu1 %v7555_v37  ;;  %5690 = vmatpush3.bf16.msra.mxu0 %v7560_v32 }
 0xaf6   :  { %2336 = vmatprep.subr.bf16.mxu1 %v7565_v53  ;;  %5691 = vmatprep.subr.bf16.mxu0 %v6632_v3 }
 0xaf7   :  { %2366 = vmatprep.mubr.bf16.mxu1 %v6631_v2  ;;  %5705 = vmatprep.mubr.msk.bf16.mxu0 %vm6633_vm0, %v6632_v3 }
 0xaf9   :  { %2337 = vmatpush1.bf16.msra.mxu1 %v7571_v8  ;;  %5692 = vmatpush3.bf16.msra.mxu0 %v7577_v49 }
 0xafa   :  { %2338 = vmatprep.subr.bf16.mxu1 %v7583_v34  ;;  %5693 = vmatprep.subr.bf16.mxu0 %v6632_v3 }
 0xafd   :  { %2339 = vmatpush1.bf16.msra.mxu1 %v7593_v16  ;;  %5694 = vmatpush3.bf16.msra.mxu0 %v7599_v42 }
 0xafe   :  { %2340 = vmatprep.subr.bf16.mxu1 %v7605_v43  ;;  %5695 = vmatprep.subr.bf16.mxu0 %v6632_v3 }
 0xb01   :  { %2341 = vmatpush1.bf16.msra.mxu1 %v7612_v17  ;;  %5696 = vmatpush3.bf16.msra.mxu0 %v7618_v30 }
 0xb02   :  { %2342 = vmatprep.subr.bf16.mxu1 %v7624_v21  ;;  %5697 = vmatprep.subr.bf16.mxu0 %v6632_v3 }
 0xb05   :  { %2343 = vmatpush1.bf16.msra.mxu1 %v7631_v33  ;;  %5698 = vmatpush3.bf16.msra.mxu0 %v7637_v44 }
 0xb06   :  { %2344 = vmatprep.subr.bf16.mxu1 %v7643_v36  ;;  %5699 = vmatprep.subr.bf16.mxu0 %v6632_v3 }
 0xb09   :  { %2345 = vmatpush1.bf16.msra.mxu1 %v7650_v38  ;;  %5700 = vmatpush3.bf16.msra.mxu0 %v7656_v45 }
 0xb0a   :  { %2346 = vmatprep.subr.bf16.mxu1 %v7662_v35  ;;  %5701 = vmatprep.subr.bf16.mxu0 %v6632_v3 }
 0xb0d   :  { %2347 = vmatpush1.bf16.msra.mxu1 %v7669_v22  ;;  %5702 = vmatpush3.bf16.msra.mxu0 %v7675_v20 }
 0xb0e   :  { %2348 = vmatprep.subr.bf16.mxu1 %v7681_v12  ;;  %5703 = vmatprep.subr.bf16.mxu0 %v6632_v3 }
 0xb11   :  { %2349 = vmatpush1.bf16.msra.mxu1 %v7688_v41  ;;  %5704 = vmatpush3.bf16.msra.mxu0 %v7694_v40 }
 0xb12   :  { %2452 = vmatprep.subr.bf16.mxu1 %v7516_v19  ;;  %5709 = vmatprep.subr.bf16.mxu0 %v6632_v3 }
 0xbc7   :  { %v2250_v26 = vpop.f32.mrb[44].mxu1  ;;  %v2311_v51 = vpop.f32.mrb[48].mxu0 }
 0xbc8   :  { %v2259_v0 = vrot.slane %v2250_v26, 4  ;;  %v2252_v39 = vpop.f32.mrb[45].mxu1  ;;  %v5687_v31 = vpop.f32.mrb[49].mxu0  ;;  %v2312_v50 = vadd.f32 %v7798_v15, %v2311_v51 }
 0xbc9   :  { %v2260_v23 = vrot.slane %v2252_v39, 4  ;;  %v2254_v46 = vpop.f32.mrb[46].mxu1  ;;  %v2314_v47 = vpop.f32.mrb[50].mxu0 }
 0xbca   :  { %v2263_v27 = vadd.f32 %v2259_v0, %v7763_v6  ;;  %v2255_v56 = vpop.f32.mrb[47].mxu1  ;;  %v5688_v57 = vpop.f32.mrb[51].mxu0  ;;  %v2318_v26 = vrot.slane %v2312_v50, 4 }
 0xbcb   :  { %v2264_v59 = vadd.f32 %v2260_v23, %v7771_v24  ;;  %v2326_v23 = vrot.slane %v7802_v18, 2 }
 0xbcc   :  { %v5003_v58 = vmul.f32 -1.442695, %v2263_v27 }
 0xbcd   :  { %v5004_v60 = vmul.f32 -1.442695, %v2264_v59 }
 0xbce   :  { %6374 = vpow2.f32 %v5003_v58 }
 0xbcf   :  { %6376 = vpow2.f32 %v5004_v60 }
 0xbd8   :  { %v6375_v61 = vpop.eup %6374 }
 0xbd9   :  { %v2271_v62 = vadd.f32 1.0, %v6375_v61  ;;  %v6377_v63 = vpop.eup %6376 }
 0xbda   :  { %v2272_v52 = vadd.f32 1.0, %v6377_v63 }
 0xbdb   :  { %6378 = vrcp.f32 %v2271_v62 }
 0xbdc   :  { %6380 = vrcp.f32 %v2272_v52 }
 0xbe5   :  { %v6379_v39 = vpop.eup %6378 }
 0xbe6   :  { %v2320_v31 = vmul.f32 %v6379_v39, %v2318_v26  ;;  %v6381_v46 = vpop.eup %6380 }
 0xbe7   :  { %v2323_v47 = vsub.f32 1.0, %v6381_v46  ;;  %v2328_v57 = vmul.f32 %v6381_v46, %v2326_v23 }
 0xbe8   :  { %v2321_v0 = vadd.f32 %v2320_v31, %v7751_v4 }
 0xbea   :  { %6382 = vtanh.f32 %v2321_v0 }
 0xbf4   :  { %v6383_v27 = vpop.eup %6382 }
 0xbf5   :  { %v2324_v56 = vmul.f32 %v6383_v27, %v2323_v47 }
 0xbf7   :  { %v7846_v58 = vadd.f32 %v2328_v57, %v2324_v56 }
 0xbf9   :  { %v2330_v51 = vpack.c.bf16 %v7846_v58, %v7846_v58 }
 0xbfb   :  { %v2332_v59 = vrot.slane %v2330_v51, 2 }
 0xbfd   :  { %2367 = vmatmul.mubr.bf16.vlgmr.msra.gmra.mrb[48].mxu1 %v2332_v59  ;;  %5706 = vmatmul.mubr.bf16.vlgmr.msra.gmra.mrb[52].mxu0 %v2332_v59 }
 0xbfe   :  { %2453 = vmatpush1.bf16.msra.mxu1 %v7555_v37  ;;  %5710 = vmatpush3.bf16.msra.mxu0 %v7560_v32 }
 0xbff   :  { %2454 = vmatprep.subr.bf16.mxu1 %v7565_v53  ;;  %5711 = vmatprep.subr.bf16.mxu0 %v6632_v3 }
 0xc00   :  { %2484 = vmatprep.mubr.bf16.mxu1 %v6631_v2  ;;  %5725 = vmatprep.mubr.msk.bf16.mxu0 %vm6633_vm0, %v6632_v3 }
 0xc02   :  { %2455 = vmatpush1.bf16.msra.mxu1 %v7571_v8  ;;  %5712 = vmatpush3.bf16.msra.mxu0 %v7577_v49 }
 0xc03   :  { %2456 = vmatprep.subr.bf16.mxu1 %v7583_v34  ;;  %5713 = vmatprep.subr.bf16.mxu0 %v6632_v3 }
 0xc06   :  { %2457 = vmatpush1.bf16.msra.mxu1 %v7593_v16  ;;  %5714 = vmatpush3.bf16.msra.mxu0 %v7599_v42 }
 0xc07   :  { %2458 = vmatprep.subr.bf16.mxu1 %v7605_v43  ;;  %5715 = vmatprep.subr.bf16.mxu0 %v6632_v3 }
 0xc0a   :  { %2459 = vmatpush1.bf16.msra.mxu1 %v7612_v17  ;;  %5716 = vmatpush3.bf16.msra.mxu0 %v7618_v30 }
 0xc0b   :  { %2460 = vmatprep.subr.bf16.mxu1 %v7624_v21  ;;  %5717 = vmatprep.subr.bf16.mxu0 %v6632_v3 }
 0xc0e   :  { %2461 = vmatpush1.bf16.msra.mxu1 %v7631_v33  ;;  %5718 = vmatpush3.bf16.msra.mxu0 %v7637_v44 }
 0xc0f   :  { %2462 = vmatprep.subr.bf16.mxu1 %v7643_v36  ;;  %5719 = vmatprep.subr.bf16.mxu0 %v6632_v3 }
 0xc12   :  { %2463 = vmatpush1.bf16.msra.mxu1 %v7650_v38  ;;  %5720 = vmatpush3.bf16.msra.mxu0 %v7656_v45 }
 0xc13   :  { %2464 = vmatprep.subr.bf16.mxu1 %v7662_v35  ;;  %5721 = vmatprep.subr.bf16.mxu0 %v6632_v3 }
 0xc16   :  { %2465 = vmatpush1.bf16.msra.mxu1 %v7669_v22  ;;  %5722 = vmatpush3.bf16.msra.mxu0 %v7675_v20 }
 0xc17   :  { %2466 = vmatprep.subr.bf16.mxu1 %v7681_v12  ;;  %5723 = vmatprep.subr.bf16.mxu0 %v6632_v3 }
 0xc1a   :  { %2467 = vmatpush1.bf16.msra.mxu1 %v7688_v41  ;;  %5724 = vmatpush3.bf16.msra.mxu0 %v7694_v40 }
 0xc1b   :  { %2558 = vmatprep.subr.bf16.mxu1 %v7516_v19  ;;  %5729 = vmatprep.subr.bf16.mxu0 %v6632_v3 }
 0xcd0   :  { %v2368_v60 = vpop.f32.mrb[48].mxu1  ;;  %v2429_v61 = vpop.f32.mrb[52].mxu0 }
 0xcd1   :  { %v2377_v62 = vrot.slane %v2368_v60, 6  ;;  %v2370_v63 = vpop.f32.mrb[49].mxu1  ;;  %v5707_v50 = vpop.f32.mrb[53].mxu0  ;;  %v2430_v59 = vadd.f32 %v7798_v15, %v2429_v61 }
 0xcd2   :  { %v2378_v52 = vrot.slane %v2370_v63, 6  ;;  %v2372_v26 = vpop.f32.mrb[50].mxu1  ;;  %v2432_v39 = vpop.f32.mrb[54].mxu0 }
 0xcd3   :  { %v2381_v31 = vadd.f32 %v2377_v62, %v7755_v5  ;;  %v2373_v0 = vpop.f32.mrb[51].mxu1  ;;  %v5708_v46 = vpop.f32.mrb[55].mxu0  ;;  %v2436_v63 = vrot.slane %v2430_v59, 6 }
 0xcd4   :  { %v2382_v23 = vadd.f32 %v2378_v52, %v7759_v28  ;;  %v2444_v28 = vrot.slane %v7846_v58, 2 }
 0xcd5   :  { %v5005_v47 = vmul.f32 -1.442695, %v2381_v31 }
 0xcd6   :  { %v5006_v27 = vmul.f32 -1.442695, %v2382_v23 }
 0xcd7   :  { %6384 = vpow2.f32 %v5005_v47 }
 0xcd8   :  { %6386 = vpow2.f32 %v5006_v27 }
 0xce1   :  { %v6385_v56 = vpop.eup %6384 }
 0xce2   :  { %v2389_v57 = vadd.f32 1.0, %v6385_v56  ;;  %v6387_v51 = vpop.eup %6386 }
 0xce3   :  { %v2390_v60 = vadd.f32 1.0, %v6387_v51 }
 0xce4   :  { %6388 = vrcp.f32 %v2389_v57 }
 0xce5   :  { %6390 = vrcp.f32 %v2390_v60 }
 0xcee   :  { %v6389_v50 = vpop.eup %6388 }
 0xcef   :  { %v2438_v26 = vmul.f32 %v6389_v50, %v2436_v63  ;;  %v6391_v62 = vpop.eup %6390 }
 0xcf0   :  { %v2441_v52 = vsub.f32 1.0, %v6391_v62  ;;  %v2446_v31 = vmul.f32 %v6391_v62, %v2444_v28 }
 0xcf1   :  { %v2439_v5 = vadd.f32 %v2438_v26, %v7747_v1 }
 0xcf3   :  { %6392 = vtanh.f32 %v2439_v5 }
 0xcfd   :  { %v6393_v39 = vpop.eup %6392 }
 0xcfe   :  { %v2442_v0 = vmul.f32 %v6393_v39, %v2441_v52 }
 0xd00   :  { %v7892_v46 = vadd.f32 %v2446_v31, %v2442_v0 }
 0xd02   :  { %v2448_v61 = vpack.c.bf16 %v7892_v46, %v7892_v46 }
 0xd04   :  { %v2450_v47 = vrot.slane %v2448_v61, 1 }
 0xd06   :  { %2485 = vmatmul.mubr.bf16.vlgmr.msra.gmra.mrb[52].mxu1 %v2450_v47  ;;  %5726 = vmatmul.mubr.bf16.vlgmr.msra.gmra.mrb[56].mxu0 %v2450_v47 }
 0xd07   :  { %2559 = vmatpush1.bf16.msra.mxu1 %v7555_v37  ;;  %5730 = vmatpush3.bf16.msra.mxu0 %v7560_v32 }
 0xd08   :  { %2560 = vmatprep.subr.bf16.mxu1 %v7565_v53  ;;  %5731 = vmatprep.subr.bf16.mxu0 %v6632_v3 }
 0xd09   :  { %2590 = vmatprep.mubr.bf16.mxu1 %v6631_v2  ;;  %5745 = vmatprep.mubr.msk.bf16.mxu0 %vm6633_vm0, %v6632_v3 }
 0xd0b   :  { %2561 = vmatpush1.bf16.msra.mxu1 %v7571_v8  ;;  %5732 = vmatpush3.bf16.msra.mxu0 %v7577_v49 }
 0xd0c   :  { %2562 = vmatprep.subr.bf16.mxu1 %v7583_v34  ;;  %5733 = vmatprep.subr.bf16.mxu0 %v6632_v3 }
 0xd0f   :  { %2563 = vmatpush1.bf16.msra.mxu1 %v7593_v16  ;;  %5734 = vmatpush3.bf16.msra.mxu0 %v7599_v42 }
 0xd10   :  { %2564 = vmatprep.subr.bf16.mxu1 %v7605_v43  ;;  %5735 = vmatprep.subr.bf16.mxu0 %v6632_v3 }
 0xd13   :  { %2565 = vmatpush1.bf16.msra.mxu1 %v7612_v17  ;;  %5736 = vmatpush3.bf16.msra.mxu0 %v7618_v30 }
 0xd14   :  { %2566 = vmatprep.subr.bf16.mxu1 %v7624_v21  ;;  %5737 = vmatprep.subr.bf16.mxu0 %v6632_v3 }
 0xd17   :  { %2567 = vmatpush1.bf16.msra.mxu1 %v7631_v33  ;;  %5738 = vmatpush3.bf16.msra.mxu0 %v7637_v44 }
 0xd18   :  { %2568 = vmatprep.subr.bf16.mxu1 %v7643_v36  ;;  %5739 = vmatprep.subr.bf16.mxu0 %v6632_v3 }
 0xd1b   :  { %2569 = vmatpush1.bf16.msra.mxu1 %v7650_v38  ;;  %5740 = vmatpush3.bf16.msra.mxu0 %v7656_v45 }
 0xd1c   :  { %2570 = vmatprep.subr.bf16.mxu1 %v7662_v35  ;;  %5741 = vmatprep.subr.bf16.mxu0 %v6632_v3 }
 0xd1f   :  { %2571 = vmatpush1.bf16.msra.mxu1 %v7669_v22  ;;  %5742 = vmatpush3.bf16.msra.mxu0 %v7675_v20 }
 0xd20   :  { %2572 = vmatprep.subr.bf16.mxu1 %v7681_v12  ;;  %5743 = vmatprep.subr.bf16.mxu0 %v6632_v3 }
 0xd23   :  { %2573 = vmatpush1.bf16.msra.mxu1 %v7688_v41  ;;  %5744 = vmatpush3.bf16.msra.mxu0 %v7694_v40 }
 0xd24   :  { %2676 = vmatprep.subr.bf16.mxu1 %v7516_v19  ;;  %5749 = vmatprep.subr.bf16.mxu0 %v6632_v3 }
 0xdd9   :  { %v2486_v1 = vpop.f32.mrb[52].mxu1  ;;  %v2541_v23 = vpop.f32.mrb[56].mxu0 }
 0xdda   :  { %v2493_v27 = vadd.f32 %v2486_v1, %v7763_v6  ;;  %v2488_v56 = vpop.f32.mrb[53].mxu1  ;;  %v5727_v57 = vpop.f32.mrb[57].mxu0  ;;  %v2542_v0 = vadd.f32 %v7798_v15, %v2541_v23 }
 0xddb   :  { %v2490_v51 = vpop.f32.mrb[54].mxu1  ;;  %v2544_v59 = vpop.f32.mrb[58].mxu0  ;;  %v2494_v26 = vadd.f32 %v2488_v56, %v7771_v24  ;;  %v2553_v24 = vrot.slane %v7892_v46, 2 }
 0xddc   :  { %v5007_v60 = vmul.f32 -1.442695, %v2493_v27  ;;  %v2491_v63 = vpop.f32.mrb[55].mxu1  ;;  %v5728_v50 = vpop.f32.mrb[59].mxu0 }
 0xddd   :  { %v5008_v5 = vmul.f32 -1.442695, %v2494_v26 }
 0xdde   :  { %6394 = vpow2.f32 %v5007_v60 }
 0xddf   :  { %6396 = vpow2.f32 %v5008_v5 }
 0xde8   :  { %v6395_v62 = vpop.eup %6394 }
 0xde9   :  { %v2501_v52 = vadd.f32 1.0, %v6395_v62  ;;  %v6397_v39 = vpop.eup %6396 }
 0xdea   :  { %v2502_v31 = vadd.f32 1.0, %v6397_v39 }
 0xdeb   :  { %6398 = vrcp.f32 %v2501_v52 }
 0xdec   :  { %6400 = vrcp.f32 %v2502_v31 }
 0xdf5   :  { %v6399_v6 = vpop.eup %6398 }
 0xdf6   :  { %v2547_v61 = vmul.f32 %v6399_v6, %v2542_v0  ;;  %v6401_v1 = vpop.eup %6400 }
 0xdf7   :  { %v2550_v27 = vsub.f32 1.0, %v6401_v1  ;;  %v2555_v51 = vmul.f32 %v6401_v1, %v2553_v24 }
 0xdf8   :  { %v2548_v47 = vadd.f32 %v2547_v61, %v7751_v4 }
 0xdfa   :  { %6402 = vtanh.f32 %v2548_v47 }
 0xe04   :  { %v6403_v56 = vpop.eup %6402 }
 0xe05   :  { %v2551_v57 = vmul.f32 %v6403_v56, %v2550_v27 }
 0xe07   :  { %v7936_v59 = vadd.f32 %v2555_v51, %v2551_v57 }
 0xe09   :  { %v2557_v60 = vpack.c.bf16 %v7936_v59, %v7936_v59 }
 0xe0b   :  { %2591 = vmatmul.mubr.bf16.vlgmr.msra.gmra.mrb[56].mxu1 %v2557_v60  ;;  %5746 = vmatmul.mubr.bf16.vlgmr.msra.gmra.mrb[60].mxu0 %v2557_v60 }
 0xe0c   :  { %2677 = vmatpush1.bf16.msra.mxu1 %v7555_v37  ;;  %5750 = vmatpush3.bf16.msra.mxu0 %v7560_v32 }
 0xe0d   :  { %2678 = vmatprep.subr.bf16.mxu1 %v7565_v53  ;;  %5751 = vmatprep.subr.bf16.mxu0 %v6632_v3 }
 0xe0e   :  { %2708 = vmatprep.mubr.bf16.mxu1 %v6631_v2  ;;  %5765 = vmatprep.mubr.msk.bf16.mxu0 %vm6633_vm0, %v6632_v3 }
 0xe10   :  { %2679 = vmatpush1.bf16.msra.mxu1 %v7571_v8  ;;  %5752 = vmatpush3.bf16.msra.mxu0 %v7577_v49 }
 0xe11   :  { %2680 = vmatprep.subr.bf16.mxu1 %v7583_v34  ;;  %5753 = vmatprep.subr.bf16.mxu0 %v6632_v3 }
 0xe14   :  { %2681 = vmatpush1.bf16.msra.mxu1 %v7593_v16  ;;  %5754 = vmatpush3.bf16.msra.mxu0 %v7599_v42 }
 0xe15   :  { %2682 = vmatprep.subr.bf16.mxu1 %v7605_v43  ;;  %5755 = vmatprep.subr.bf16.mxu0 %v6632_v3 }
 0xe18   :  { %2683 = vmatpush1.bf16.msra.mxu1 %v7612_v17  ;;  %5756 = vmatpush3.bf16.msra.mxu0 %v7618_v30 }
 0xe19   :  { %2684 = vmatprep.subr.bf16.mxu1 %v7624_v21  ;;  %5757 = vmatprep.subr.bf16.mxu0 %v6632_v3 }
 0xe1c   :  { %2685 = vmatpush1.bf16.msra.mxu1 %v7631_v33  ;;  %5758 = vmatpush3.bf16.msra.mxu0 %v7637_v44 }
 0xe1d   :  { %2686 = vmatprep.subr.bf16.mxu1 %v7643_v36  ;;  %5759 = vmatprep.subr.bf16.mxu0 %v6632_v3 }
 0xe20   :  { %2687 = vmatpush1.bf16.msra.mxu1 %v7650_v38  ;;  %5760 = vmatpush3.bf16.msra.mxu0 %v7656_v45 }
 0xe21   :  { %2688 = vmatprep.subr.bf16.mxu1 %v7662_v35  ;;  %5761 = vmatprep.subr.bf16.mxu0 %v6632_v3 }
 0xe24   :  { %2689 = vmatpush1.bf16.msra.mxu1 %v7669_v22  ;;  %5762 = vmatpush3.bf16.msra.mxu0 %v7675_v20 }
 0xe25   :  { %2690 = vmatprep.subr.bf16.mxu1 %v7681_v12  ;;  %5763 = vmatprep.subr.bf16.mxu0 %v6632_v3 }
 0xe28   :  { %2691 = vmatpush1.bf16.msra.mxu1 %v7688_v41  ;;  %5764 = vmatpush3.bf16.msra.mxu0 %v7694_v40 }
 0xe29   :  { %2794 = vmatprep.subr.bf16.mxu1 %v7516_v19  ;;  %5769 = vmatprep.subr.bf16.mxu0 %v6632_v3 }
 0xede   :  { %v2592_v4 = vpop.f32.mrb[56].mxu1  ;;  %v2653_v23 = vpop.f32.mrb[60].mxu0 }
 0xedf   :  { %v2601_v63 = vrot.slane %v2592_v4, 2  ;;  %v2594_v50 = vpop.f32.mrb[57].mxu1  ;;  %v5747_v26 = vpop.f32.mrb[61].mxu0  ;;  %v2654_v24 = vadd.f32 %v7798_v15, %v2653_v23 }
 0xee0   :  { %v2602_v5 = vrot.slane %v2594_v50, 2  ;;  %v2596_v62 = vpop.f32.mrb[58].mxu1  ;;  %v2656_v52 = vpop.f32.mrb[62].mxu0  ;;  %v2668_v50 = vrot.slane %v7936_v59, 2 }
 0xee1   :  { %v2605_v39 = vadd.f32 %v2601_v63, %v7779_v13  ;;  %v2597_v31 = vpop.f32.mrb[59].mxu1  ;;  %v5748_v0 = vpop.f32.mrb[63].mxu0  ;;  %v2660_v57 = vrot.slane %v2654_v24, 2 }
 0xee2   :  { %v2606_v61 = vadd.f32 %v2602_v5, %v7783_v54 }
 0xee3   :  { %v5009_v6 = vmul.f32 -1.442695, %v2605_v39 }
 0xee4   :  { %v5010_v47 = vmul.f32 -1.442695, %v2606_v61 }
 0xee5   :  { %6404 = vpow2.f32 %v5009_v6 }
 0xee6   :  { %6406 = vpow2.f32 %v5010_v47 }
 0xeef   :  { %v6405_v19 = vpop.eup %6404 }
 0xef0   :  { %v2613_v1 = vadd.f32 1.0, %v6405_v19  ;;  %v6407_v27 = vpop.eup %6406 }
 0xef1   :  { %v2614_v56 = vadd.f32 1.0, %v6407_v27 }
 0xef2   :  { %6408 = vrcp.f32 %v2613_v1 }
 0xef3   :  { %6410 = vrcp.f32 %v2614_v56 }
 0xefc   :  { %v6409_v51 = vpop.eup %6408 }
 0xefd   :  { %v2662_v60 = vmul.f32 %v6409_v51, %v2660_v57  ;;  %v6411_v63 = vpop.eup %6410  ;;  %v3029_v57 = vrot.slane %v7892_v46, 6 }
 0xefe   :  { %v2665_v26 = vsub.f32 1.0, %v6411_v63  ;;  %v2670_v62 = vmul.f32 %v6411_v63, %v2668_v50 }
 0xeff   :  { %v2663_v4 = vadd.f32 %v2662_v60, %v7767_v7 }
 0xf01   :  { %6412 = vtanh.f32 %v2663_v4 }
 0xf0b   :  { %v6413_v5 = vpop.eup %6412 }
 0xf0c   :  { %v2666_v52 = vmul.f32 %v6413_v5, %v2665_v26  ;;  %v6556_v5 = vld [vmem:[%s8962_s3 + $0xc0] ss:$12 sps:$4 sm:$0xff]  }
 0xf0e   :  { %v7980_v39 = vadd.f32 %v2670_v62, %v2666_v52  ;;  %v6557_v62 = vld [vmem:[%s8962_s3 + $0xc8] ss:$12 sps:$4 sm:$0xff]  }
 0xf0f   :  { %v6558_v52 = vld [vmem:[%s8962_s3 + $0xdc] ss:$12 sps:$4 sm:$0xff]  }
 0xf10   :  { %v2672_v23 = vpack.c.bf16 %v7980_v39, %v7980_v39  ;;  %v7987_v31 = vsel %vm186_vm6, %v7980_v39, %v2668_v50 }
 0xf11   :  { %v3049_v63 = vrot.slane %v7987_v31, 6  ;;  %v6560_v31 = vld [vmem:[%s8962_s3 + $0xe0] ss:$12 sps:$4 sm:$0xff]  }
 0xf12   :  { %v2674_v0 = vrot.slane %v2672_v23, 3  ;;  %v6559_v23 = vld [vmem:[%s8962_s3 + $0xd8] ss:$12 sps:$4 sm:$0xff]  }
 0xf14   :  { %2709 = vmatmul.mubr.bf16.vlgmr.msra.gmra.mrb[60].mxu1 %v2674_v0  ;;  %5766 = vmatmul.mubr.bf16.vlgmr.msra.gmra.mrb[64].mxu0 %v2674_v0  ;;  %v6561_v0 = vld [vmem:[%s8962_s3 + $0xf4] ss:$12 sps:$4 sm:$0xff]  }
 0xf15   :  { %2795 = vmatpush1.bf16.msra.mxu1 %v7555_v37  ;;  %5770 = vmatpush3.bf16.msra.mxu0 %v7560_v32  ;;  %v6555_v37 = vld [vmem:[%s8962_s3 + $0xc4] ss:$12 sps:$4 sm:$0xff]  }
 0xf16   :  { %2796 = vmatprep.subr.bf16.mxu1 %v7565_v53  ;;  %5771 = vmatprep.subr.bf16.mxu0 %v6632_v3 }
 0xf17   :  { %2826 = vmatprep.mubr.bf16.mxu1 %v6631_v2  ;;  %5785 = vmatprep.mubr.msk.bf16.mxu0 %vm6633_vm0, %v6632_v3 }
 0xf19   :  { %2797 = vmatpush1.bf16.msra.mxu1 %v7571_v8  ;;  %5772 = vmatpush3.bf16.msra.mxu0 %v7577_v49 }
 0xf1a   :  { %2798 = vmatprep.subr.bf16.mxu1 %v7583_v34  ;;  %5773 = vmatprep.subr.bf16.mxu0 %v6632_v3 }
 0xf1d   :  { %2799 = vmatpush1.bf16.msra.mxu1 %v7593_v16  ;;  %5774 = vmatpush3.bf16.msra.mxu0 %v7599_v42 }
 0xf1e   :  { %2800 = vmatprep.subr.bf16.mxu1 %v7605_v43  ;;  %5775 = vmatprep.subr.bf16.mxu0 %v6632_v3 }
 0xf21   :  { %2801 = vmatpush1.bf16.msra.mxu1 %v7612_v17  ;;  %5776 = vmatpush3.bf16.msra.mxu0 %v7618_v30 }
 0xf22   :  { %2802 = vmatprep.subr.bf16.mxu1 %v7624_v21  ;;  %5777 = vmatprep.subr.bf16.mxu0 %v6632_v3 }
 0xf25   :  { %2803 = vmatpush1.bf16.msra.mxu1 %v7631_v33  ;;  %5778 = vmatpush3.bf16.msra.mxu0 %v7637_v44 }
 0xf26   :  { %2804 = vmatprep.subr.bf16.mxu1 %v7643_v36  ;;  %5779 = vmatprep.subr.bf16.mxu0 %v6632_v3 }
 0xf29   :  { %2805 = vmatpush1.bf16.msra.mxu1 %v7650_v38  ;;  %5780 = vmatpush3.bf16.msra.mxu0 %v7656_v45 }
 0xf2a   :  { %2806 = vmatprep.subr.bf16.mxu1 %v7662_v35  ;;  %5781 = vmatprep.subr.bf16.mxu0 %v6632_v3 }
 0xf2d   :  { %2807 = vmatpush1.bf16.msra.mxu1 %v7669_v22  ;;  %5782 = vmatpush3.bf16.msra.mxu0 %v7675_v20 }
 0xf2e   :  { %2808 = vmatprep.subr.bf16.mxu1 %v7681_v12  ;;  %5783 = vmatprep.subr.bf16.mxu0 %v6632_v3 }
 0xf31   :  { %2809 = vmatpush1.bf16.msra.mxu1 %v7688_v41  ;;  %5784 = vmatpush3.bf16.msra.mxu0 %v7694_v40  ;;  %v2786_v40 = vrot.slane %v7980_v39, 2 }
 0xf32   :  { %2912 = vmatprep.subr.bf16.mxu1 %v6555_v37  ;;  %5789 = vmatprep.subr.bf16.mxu0 %v6632_v3  ;;  %v6562_v37 = vld [vmem:[%s8962_s3 + $0xf0] ss:$12 sps:$4 sm:$0xff]  }
 0xfe7   :  { %v2710_v32 = vpop.f32.mrb[60].mxu1  ;;  %v2771_v53 = vpop.f32.mrb[64].mxu0 }
 0xfe8   :  { %v2719_v8 = vrot.slane %v2710_v32, 4  ;;  %v2712_v49 = vpop.f32.mrb[61].mxu1  ;;  %v5767_v34 = vpop.f32.mrb[65].mxu0  ;;  %v2772_v20 = vadd.f32 %v7798_v15, %v2771_v53  ;;  %v6563_v32 = vld [vmem:[%s8962_s3 + $0xf8] ss:$12 sps:$4 sm:$0xff]  }
 0xfe9   :  { %v2720_v16 = vrot.slane %v2712_v49, 4  ;;  %v2714_v42 = vpop.f32.mrb[62].mxu1  ;;  %v2774_v43 = vpop.f32.mrb[66].mxu0  ;;  %v6564_v53 = vld [vmem:[%s8962_s3 + $0x10c] ss:$12 sps:$4 sm:$0xff]  }
 0xfea   :  { %v2723_v17 = vadd.f32 %v2719_v8, %v7787_v48  ;;  %v2715_v30 = vpop.f32.mrb[63].mxu1  ;;  %v5768_v21 = vpop.f32.mrb[67].mxu0  ;;  %v2778_v12 = vrot.slane %v2772_v20, 4  ;;  %v6565_v8 = vld [vmem:[%s8962_s3 + $0x108] ss:$12 sps:$4 sm:$0xff]  }
 0xfeb   :  { %v2724_v33 = vadd.f32 %v2720_v16, %v7791_v55  ;;  %v6566_v49 = vld [vmem:[%s8962_s3 + $0x110] ss:$12 sps:$4 sm:$0xff]   ;;  %v6568_v16 = vld [vmem:[%s8962_s3 + $0x120] ss:$12 sps:$4 sm:$0xff]   ;;  %v6569_v42 = vld [vmem:[%s8962_s3 + $0x128] ss:$12 sps:$4 sm:$0xff]  }
 0xfec   :  { %v5011_v44 = vmul.f32 -1.442695, %v2723_v17  ;;  %v6567_v34 = vld [vmem:[%s8962_s3 + $0x124] ss:$12 sps:$4 sm:$0xff]   ;;  %v6570_v43 = vld [vmem:[%s8962_s3 + $0x13c] ss:$12 sps:$4 sm:$0xff]  }
 0xfed   :  { %v5012_v36 = vmul.f32 -1.442695, %v2724_v33  ;;  %v6571_v17 = vld [vmem:[%s8962_s3 + $0x138] ss:$12 sps:$4 sm:$0xff]   ;;  %v6572_v30 = vld [vmem:[%s8962_s3 + $0x140] ss:$12 sps:$4 sm:$0xff]  }
 0xfee   :  { %6414 = vpow2.f32 %v5011_v44  ;;  %v6573_v21 = vld [vmem:[%s8962_s3 + $0x154] ss:$12 sps:$4 sm:$0xff]   ;;  %v6574_v33 = vld [vmem:[%s8962_s3 + $0x150] ss:$12 sps:$4 sm:$0xff]   ;;  %v6575_v44 = vld [vmem:[%s8962_s3 + $0x158] ss:$12 sps:$4 sm:$0xff]  }
 0xfef   :  { %6416 = vpow2.f32 %v5012_v36  ;;  %v6576_v36 = vld [vmem:[%s8962_s3 + $0x16c] ss:$12 sps:$4 sm:$0xff]  }
 0xff8   :  { %v6415_v38 = vpop.eup %6414 }
 0xff9   :  { %v6417_v45 = vpop.eup %6416  ;;  %v2731_v35 = vadd.f32 1.0, %v6415_v38  ;;  %v6577_v38 = vld [vmem:[%s8962_s3 + $0x168] ss:$12 sps:$4 sm:$0xff]  }
 0xffa   :  { %v2732_v22 = vadd.f32 1.0, %v6417_v45  ;;  %v6578_v45 = vld [vmem:[%s8962_s3 + $0x170] ss:$12 sps:$4 sm:$0xff]  }
 0xffb   :  { %6418 = vrcp.f32 %v2731_v35 }
 0xffc   :  { %6420 = vrcp.f32 %v2732_v22 }
0x1005   :  { %v6419_v41 = vpop.eup %6418 }
0x1006   :  { %v6421_v6 = vpop.eup %6420  ;;  %v2780_v61 = vmul.f32 %v6419_v41, %v2778_v12 }
0x1007   :  { %v2788_v47 = vmul.f32 %v6421_v6, %v2786_v40  ;;  %v2783_v1 = vsub.f32 1.0, %v6421_v6 }
0x1008   :  { %v2781_v19 = vadd.f32 %v2780_v61, %v7775_v9 }
0x100a   :  { %6422 = vtanh.f32 %v2781_v19 }
0x1014   :  { %v6423_v27 = vpop.eup %6422 }
0x1015   :  { %v2784_v24 = vmul.f32 %v6423_v27, %v2783_v1 }
0x1017   :  { %v8031_v56 = vadd.f32 %v2788_v47, %v2784_v24 }
0x1019   :  { %v2790_v51 = vpack.c.bf16 %v8031_v56, %v8031_v56  ;;  %v3031_v60 = vsel %vm186_vm6, %v8031_v56, %v3029_v57 }
0x101a   :  { %v3052_v4 = vrot.slane %v3031_v60, 2 }
0x101b   :  { %v2792_v50 = vrot.slane %v2790_v51, 2 }
0x101c   :  { %v8041_v26 = vsel %vm1617_vm7, %v3049_v63, %v3052_v4 }
0x101d   :  { %2827 = vmatmul.mubr.bf16.vlgmr.msra.gmra.mrb[64].mxu1 %v2792_v50  ;;  %5786 = vmatmul.mubr.bf16.vlgmr.msra.gmra.mrb[68].mxu0 %v2792_v50 }
0x101e   :  { %2913 = vmatpush1.bf16.msra.mxu1 %v6556_v5  ;;  %5790 = vmatpush3.bf16.msra.mxu0 %v6557_v62 }
0x101f   :  { %2914 = vmatprep.subr.bf16.mxu1 %v6558_v52  ;;  %5791 = vmatprep.subr.bf16.mxu0 %v6632_v3 }
0x1020   :  { %2944 = vmatprep.mubr.bf16.mxu1 %v6631_v2  ;;  %5805 = vmatprep.mubr.msk.bf16.mxu0 %vm6633_vm0, %v6632_v3 }
0x1022   :  { %2915 = vmatpush1.bf16.msra.mxu1 %v6559_v23  ;;  %5792 = vmatpush3.bf16.msra.mxu0 %v6560_v31 }
0x1023   :  { %2916 = vmatprep.subr.bf16.mxu1 %v6561_v0  ;;  %5793 = vmatprep.subr.bf16.mxu0 %v6632_v3 }
0x1026   :  { %2917 = vmatpush1.bf16.msra.mxu1 %v6562_v37  ;;  %5794 = vmatpush3.bf16.msra.mxu0 %v6563_v32 }
0x1027   :  { %2918 = vmatprep.subr.bf16.mxu1 %v6564_v53  ;;  %5795 = vmatprep.subr.bf16.mxu0 %v6632_v3 }
0x102a   :  { %2919 = vmatpush1.bf16.msra.mxu1 %v6565_v8  ;;  %5796 = vmatpush3.bf16.msra.mxu0 %v6566_v49 }
0x102b   :  { %2920 = vmatprep.subr.bf16.mxu1 %v6567_v34  ;;  %5797 = vmatprep.subr.bf16.mxu0 %v6632_v3 }
0x102e   :  { %2921 = vmatpush1.bf16.msra.mxu1 %v6568_v16  ;;  %5798 = vmatpush3.bf16.msra.mxu0 %v6569_v42  ;;  %v6222_v16 = vld [vmem:[%s8961_s2 + $0x184] ss:$12 sps:$4 sm:$0xff]   ;;  %v6226_v42 = vld [vmem:[%s8961_s2 + $0x19c] ss:$12 sps:$4 sm:$0xff]  }
0x102f   :  { %2922 = vmatprep.subr.bf16.mxu1 %v6570_v43  ;;  %5799 = vmatprep.subr.bf16.mxu0 %v6632_v3  ;;  %v6224_v43 = vld [vmem:[%s8961_s2 + $0x198] ss:$12 sps:$4 sm:$0xff]  }
0x1032   :  { %2923 = vmatpush1.bf16.msra.mxu1 %v6571_v17  ;;  %5800 = vmatpush3.bf16.msra.mxu0 %v6572_v30  ;;  %v6227_v17 = vld [vmem:[%s8961_s2 + $0x1a0] ss:$12 sps:$4 sm:$0xff]  }
0x1033   :  { %2924 = vmatprep.subr.bf16.mxu1 %v6573_v21  ;;  %5801 = vmatprep.subr.bf16.mxu0 %v6632_v3  ;;  %v6230_v30 = vld [vmem:[%s8961_s2 + $0x1b4] ss:$12 sps:$4 sm:$0xff]   ;;  %v6228_v21 = vld [vmem:[%s8961_s2 + $0x1b0] ss:$12 sps:$4 sm:$0xff]  }
0x1036   :  { %2925 = vmatpush1.bf16.msra.mxu1 %v6574_v33  ;;  %5802 = vmatpush3.bf16.msra.mxu0 %v6575_v44  ;;  %v6231_v33 = vld [vmem:[%s8961_s2 + $0x1b8] ss:$12 sps:$4 sm:$0xff]  }
0x1037   :  { %2926 = vmatprep.subr.bf16.mxu1 %v6576_v36  ;;  %5803 = vmatprep.subr.bf16.mxu0 %v6632_v3  ;;  %v6234_v44 = vld [vmem:[%s8961_s2 + $0x1cc] ss:$12 sps:$4 sm:$0xff]   ;;  %v6232_v36 = vld [vmem:[%s8961_s2 + $0x1c8] ss:$12 sps:$4 sm:$0xff]  }
0x103a   :  { %2927 = vmatpush1.bf16.msra.mxu1 %v6577_v38  ;;  %5804 = vmatpush3.bf16.msra.mxu0 %v6578_v45  ;;  %v6235_v38 = vld [vmem:[%s8961_s2 + $0x1d0] ss:$12 sps:$4 sm:$0xff]  }
0x103b   :  { %5809 = vmatprep.subr.bf16.mxu0 %v6632_v3  ;;  %3246 = vmatprep.subr.bf16.mxu1 %v6222_v16  ;;  %v6238_v45 = vld [vmem:[%s8961_s2 + $0x1e4] ss:$12 sps:$4 sm:$0xff]  }
0x10f0   :  { %v2828_v35 = vpop.f32.mrb[64].mxu1  ;;  %v2889_v22 = vpop.f32.mrb[68].mxu0 }
0x10f1   :  { %v2837_v20 = vrot.slane %v2828_v35, 6  ;;  %v2830_v12 = vpop.f32.mrb[65].mxu1  ;;  %v5787_v41 = vpop.f32.mrb[69].mxu0  ;;  %v2890_v63 = vadd.f32 %v7798_v15, %v2889_v22  ;;  %v6236_v35 = vld [vmem:[%s8961_s2 + $0x1e0] ss:$12 sps:$4 sm:$0xff]  }
0x10f2   :  { %v2838_v40 = vrot.slane %v2830_v12, 6  ;;  %v2832_v6 = vpop.f32.mrb[66].mxu1  ;;  %v2892_v61 = vpop.f32.mrb[70].mxu0  ;;  %v6239_v22 = vld [vmem:[%s8961_s2 + $0x1e8] ss:$12 sps:$4 sm:$0xff]  }
0x10f3   :  { %v2841_v47 = vadd.f32 %v2837_v20, %v7779_v13  ;;  %v2833_v19 = vpop.f32.mrb[67].mxu1  ;;  %v5788_v1 = vpop.f32.mrb[71].mxu0  ;;  %v2896_v5 = vrot.slane %v2890_v63, 6  ;;  %v6240_v20 = vld [vmem:[%s8961_s2 + $0x1f8] ss:$12 sps:$4 sm:$0xff]  }
0x10f4   :  { %v2842_v24 = vadd.f32 %v2838_v40, %v7783_v54  ;;  %v2904_v54 = vrot.slane %v8031_v56, 2  ;;  %v6242_v12 = vld [vmem:[%s8961_s2 + $0x1fc] ss:$12 sps:$4 sm:$0xff]   ;;  %v6243_v41 = vld [vmem:[%s8961_s2 + $0x200] ss:$12 sps:$4 sm:$0xff]  }
0x10f5   :  { %v5013_v27 = vmul.f32 -1.442695, %v2841_v47  ;;  %v6246_v40 = vld [vmem:[%s8961_s2 + $0x214] ss:$12 sps:$4 sm:$0xff]   ;;  %v6244_v6 = vld [vmem:[%s8961_s2 + $0x210] ss:$12 sps:$4 sm:$0xff]  }
0x10f6   :  { %v5014_v57 = vmul.f32 -1.442695, %v2842_v24  ;;  %v6247_v61 = vld [vmem:[%s8961_s2 + $0x218] ss:$12 sps:$4 sm:$0xff]   ;;  %v6248_v19 = vld [vmem:[%s8961_s2 + $0x228] ss:$12 sps:$4 sm:$0xff]  }
0x10f7   :  { %6424 = vpow2.f32 %v5013_v27  ;;  %v6250_v47 = vld [vmem:[%s8961_s2 + $0x22c] ss:$12 sps:$4 sm:$0xff]   ;;  %v6251_v1 = vld [vmem:[%s8961_s2 + $0x230] ss:$12 sps:$4 sm:$0xff]  }
0x10f8   :  { %6426 = vpow2.f32 %v5014_v57  ;;  %v8227_v27 = vld [vmem:[%s8962_s3 + $0x184] ss:$12 sps:$4 sm:$0xff]  }
0x1101   :  { %v6425_v51 = vpop.eup %6424 }
0x1102   :  { %v2849_v60 = vadd.f32 1.0, %v6425_v51  ;;  %v6427_v4 = vpop.eup %6426 }
0x1103   :  { %v2850_v50 = vadd.f32 1.0, %v6427_v4 }
0x1104   :  { %6428 = vrcp.f32 %v2849_v60 }
0x1105   :  { %6430 = vrcp.f32 %v2850_v50 }
0x110e   :  { %v6429_v62 = vpop.eup %6428 }
0x110f   :  { %v2898_v52 = vmul.f32 %v6429_v62, %v2896_v5  ;;  %v6431_v23 = vpop.eup %6430 }
0x1110   :  { %v2901_v31 = vsub.f32 1.0, %v6431_v23  ;;  %v2906_v37 = vmul.f32 %v6431_v23, %v2904_v54 }
0x1111   :  { %v2899_v13 = vadd.f32 %v2898_v52, %v7767_v7 }
0x1113   :  { %6432 = vtanh.f32 %v2899_v13 }
0x111d   :  { %v6433_v0 = vpop.eup %6432 }
0x111e   :  { %v2902_v32 = vmul.f32 %v6433_v0, %v2901_v31 }
0x1120   :  { %v8130_v53 = vadd.f32 %v2906_v37, %v2902_v32 }
0x1122   :  { %v2908_v15 = vpack.c.bf16 %v8130_v53, %v8130_v53  ;;  %v3032_v7 = vsel %vm186_vm6, %v8130_v53, %v2444_v28  ;;  %v6220_v28 = vld [vmem:[%s8961_s2 + $0x180] ss:$12 sps:$4 sm:$0xff]  }
0x1123   :  { %v3055_v8 = vrot.slane %v3032_v7, 6  ;;  %v3013_v7 = vrot.slane %v8130_v53, 2 }
0x1124   :  { %v2910_v49 = vrot.slane %v2908_v15, 1 }
0x1125   :  { %v8141_v34 = vsel %vm1619_vm8, %v8041_v26, %v3055_v8  ;;  %v6223_v26 = vld [vmem:[%s8961_s2 + $0x188] ss:$12 sps:$4 sm:$0xff]  }
0x1126   :  { %2945 = vmatmul.mubr.bf16.vlgmr.msra.gmra.mrb[68].mxu1 %v2910_v49  ;;  %5806 = vmatmul.mubr.bf16.vlgmr.msra.gmra.mrb[72].mxu0 %v2910_v49 }
0x1127   :  { %3278 = vmatprep.mubr.bf16.mxu1 %v6631_v2  ;;  %5825 = vmatprep.mubr.msk.bf16.mxu0 %vm6633_vm0, %v6632_v3 }
0x1128   :  { %3247 = vmatpush1.bf16.msra.mxu1 %v6220_v28  ;;  %5810 = vmatpush3.bf16.msra.mxu0 %v6223_v26 }
0x1129   :  { %5811 = vmatprep.subr.bf16.mxu0 %v6632_v3  ;;  %3248 = vmatprep.subr.bf16.mxu1 %v6226_v42 }
0x112c   :  { %3249 = vmatpush1.bf16.msra.mxu1 %v6224_v43  ;;  %5812 = vmatpush3.bf16.msra.mxu0 %v6227_v17  ;;  %v3021_v17 = vrot.slane %v8130_v53, 6 }
0x112d   :  { %5813 = vmatprep.subr.bf16.mxu0 %v6632_v3  ;;  %3250 = vmatprep.subr.bf16.mxu1 %v6230_v30 }
0x1130   :  { %3251 = vmatpush1.bf16.msra.mxu1 %v6228_v21  ;;  %5814 = vmatpush3.bf16.msra.mxu0 %v6231_v33  ;;  %v3025_v21 = vrot.slane %v7980_v39, 6  ;;  %v3033_v33 = vrot.slane %v7802_v18, 6 }
0x1131   :  { %5815 = vmatprep.subr.bf16.mxu0 %v6632_v3  ;;  %3252 = vmatprep.subr.bf16.mxu1 %v6234_v44 }
0x1134   :  { %3253 = vmatpush1.bf16.msra.mxu1 %v6232_v36  ;;  %5816 = vmatpush3.bf16.msra.mxu0 %v6235_v38  ;;  %v3023_v36 = vsel %vm186_vm6, %v7846_v58, %v3021_v17 }
0x1135   :  { %5817 = vmatprep.subr.bf16.mxu0 %v6632_v3  ;;  %3254 = vmatprep.subr.bf16.mxu1 %v6238_v45  ;;  %v3027_v45 = vsel %vm186_vm6, %v7936_v59, %v3025_v21  ;;  %v3040_v58 = vrot.slane %v3023_v36, 2  ;;  %v8271_v59 = vld [vmem:[%s8962_s3 + $0x188] ss:$12 sps:$4 sm:$0xff]  }
0x1136   :  { %v3046_v56 = vrot.slane %v3027_v45, 2 }
0x1138   :  { %3255 = vmatpush1.bf16.msra.mxu1 %v6236_v35  ;;  %5818 = vmatpush3.bf16.msra.mxu0 %v6239_v22 }
0x1139   :  { %5819 = vmatprep.subr.bf16.mxu0 %v6632_v3  ;;  %3256 = vmatprep.subr.bf16.mxu1 %v6242_v12 }
0x113c   :  { %3257 = vmatpush1.bf16.msra.mxu1 %v6240_v20  ;;  %5820 = vmatpush3.bf16.msra.mxu0 %v6243_v41 }
0x113d   :  { %3258 = vmatprep.subr.bf16.mxu1 %v6246_v40  ;;  %5821 = vmatprep.subr.bf16.mxu0 %v6632_v3  ;;  %v8282_v40 = vld [vmem:[%s8962_s3 + $0x198] ss:$12 sps:$4 sm:$0xff]  }
0x1140   :  { %3259 = vmatpush1.bf16.msra.mxu1 %v6244_v6  ;;  %5822 = vmatpush3.bf16.msra.mxu0 %v6247_v61  ;;  %v8288_v6 = vld [vmem:[%s8962_s3 + $0x1a0] ss:$12 sps:$4 sm:$0xff]  }
0x1141   :  { %3260 = vmatprep.subr.bf16.mxu1 %v6250_v47  ;;  %5823 = vmatprep.subr.bf16.mxu0 %v6632_v3  ;;  %v8294_v61 = vld [vmem:[%s8962_s3 + $0x1b4] ss:$12 sps:$4 sm:$0xff]   ;;  %v8304_v47 = vld [vmem:[%s8962_s3 + $0x1b0] ss:$12 sps:$4 sm:$0xff]  }
0x1144   :  { %3261 = vmatpush1.bf16.msra.mxu1 %v6248_v19  ;;  %5824 = vmatpush3.bf16.msra.mxu0 %v6251_v1  ;;  %v8310_v19 = vld [vmem:[%s8962_s3 + $0x1b8] ss:$12 sps:$4 sm:$0xff]  }
0x1145   :  { %3493 = vmatprep.subr.bf16.mxu1 %v8227_v27  ;;  %5829 = vmatprep.subr.bf16.mxu0 %v6632_v3  ;;  %v8316_v1 = vld [vmem:[%s8962_s3 + $0x1cc] ss:$12 sps:$4 sm:$0xff]  }
0x11f9   :  { %v2946_v24 = vpop.f32.mrb[68].mxu1  ;;  %v3001_v57 = vpop.f32.mrb[72].mxu0 }
0x11fa   :  { %v2953_v51 = vadd.f32 %v2946_v24, %v7787_v48  ;;  %v2948_v60 = vpop.f32.mrb[69].mxu1  ;;  %v5807_v4 = vpop.f32.mrb[73].mxu0  ;;  %v6579_v48 = vld [vmem:[%s8964_s5 + $0x1] ss:$0 sm:$0xff]  ;;  %v8323_v24 = vld [vmem:[%s8962_s3 + $0x1c8] ss:$12 sps:$4 sm:$0xff]  }
0x11fb   :  { %v2954_v63 = vadd.f32 %v2948_v60, %v7791_v55  ;;  %v2950_v50 = vpop.f32.mrb[70].mxu1  ;;  %v3004_v5 = vpop.f32.mrb[74].mxu0  ;;  %v3002_v15 = vadd.f32 %v6579_v48, %v3001_v57  ;;  %v8329_v57 = vld [vmem:[%s8962_s3 + $0x1d0] ss:$12 sps:$4 sm:$0xff]   ;;  %v8342_v60 = vld [vmem:[%s8962_s3 + $0x1e0] ss:$12 sps:$4 sm:$0xff]  }
0x11fc   :  { %v5015_v62 = vmul.f32 -1.442695, %v2953_v51  ;;  %v2951_v52 = vpop.f32.mrb[71].mxu1  ;;  %v5808_v13 = vpop.f32.mrb[75].mxu0  ;;  %v8335_v51 = vld [vmem:[%s8962_s3 + $0x1e4] ss:$12 sps:$4 sm:$0xff]  }
0x11fd   :  { %v5016_v23 = vmul.f32 -1.442695, %v2954_v63  ;;  %v8348_v4 = vld [vmem:[%s8962_s3 + $0x1e8] ss:$12 sps:$4 sm:$0xff]   ;;  %v8361_v50 = vld [vmem:[%s8962_s3 + $0x1f8] ss:$12 sps:$4 sm:$0xff]  }
0x11fe   :  { %6434 = vpow2.f32 %v5015_v62  ;;  %v8354_v63 = vld [vmem:[%s8962_s3 + $0x1fc] ss:$12 sps:$4 sm:$0xff]   ;;  %v8367_v5 = vld [vmem:[%s8962_s3 + $0x200] ss:$12 sps:$4 sm:$0xff]   ;;  %v8386_v13 = vld [vmem:[%s8962_s3 + $0x218] ss:$12 sps:$4 sm:$0xff]  }
0x11ff   :  { %6436 = vpow2.f32 %v5016_v23  ;;  %v8373_v62 = vld [vmem:[%s8962_s3 + $0x214] ss:$12 sps:$4 sm:$0xff]   ;;  %v8380_v52 = vld [vmem:[%s8962_s3 + $0x210] ss:$12 sps:$4 sm:$0xff]   ;;  %v8392_v23 = vld [vmem:[%s8962_s3 + $0x22c] ss:$12 sps:$4 sm:$0xff]  }
0x1208   :  { %v6435_v31 = vpop.eup %6434 }
0x1209   :  { %v6437_v0 = vpop.eup %6436  ;;  %v2961_v37 = vadd.f32 1.0, %v6435_v31  ;;  %v8399_v31 = vld [vmem:[%s8962_s3 + $0x228] ss:$12 sps:$4 sm:$0xff]  }
0x120a   :  { %v2962_v32 = vadd.f32 1.0, %v6437_v0  ;;  %v8405_v0 = vld [vmem:[%s8962_s3 + $0x230] ss:$12 sps:$4 sm:$0xff]  }
0x120b   :  { %6438 = vrcp.f32 %v2961_v37  ;;  %v5049_v37 = vld [vmem:[%s8963_s4 + $0x6] sm:$0x7] }
0x120c   :  { %6440 = vrcp.f32 %v2962_v32  ;;  %v3106_v32 = vrot.slane %v5049_v37, %v7015_v10  ;;  %v3114_v48 = vrot.slane %v5049_v37, %v7017_v11 }
0x1215   :  { %v6439_v55 = vpop.eup %6438 }
0x1216   :  { %v6441_v8 = vpop.eup %6440  ;;  %v3007_v49 = vmul.f32 %v6439_v55, %v3002_v15  ;;  %v3110_v15 = vrot.slane %v5049_v37, %v7023_v14 }
0x1217   :  { %v3015_v16 = vmul.f32 %v6441_v8, %v3013_v7  ;;  %v3010_v26 = vsub.f32 1.0, %v6441_v8 }
0x1218   :  { %v3008_v28 = vadd.f32 %v3007_v49, %v7775_v9  ;;  %v3024_v9 = vsel %vm186_vm6, %v7892_v46, %v2904_v54 }
0x1219   :  { %v3043_v20 = vrot.slane %v3024_v9, 6 }
0x121a   :  { %6442 = vtanh.f32 %v3008_v28 }
0x1224   :  { %v6443_v42 = vpop.eup %6442 }
0x1225   :  { %v3011_v43 = vmul.f32 %v6443_v42, %v3010_v26 }
0x1227   :  { %v3016_v30 = vadd.f32 %v3015_v16, %v3011_v43 }
0x1229   :  { %v3018_v44 = vrot.slane %v3016_v30, 2  ;;  %v3035_v38 = vsel %vm186_vm6, %v3016_v30, %v3033_v33 }
0x122a   :  { %v3058_v53 = vrot.slane %v3035_v38, 2 }
0x122b   :  { %v3020_v39 = vsel %vm186_vm6, %v7802_v18, %v3018_v44  ;;  %v8266_v18 = vld [vmem:[%s8962_s3 + $0x180] ss:$12 sps:$4 sm:$0xff]  }
0x122c   :  { %v3037_v35 = vrot.slane %v3020_v39, 6  ;;  %v3065_v22 = vsel %vm1621_vm9, %v8141_v34, %v3058_v53  ;;  %v8276_v34 = vld [vmem:[%s8962_s3 + $0x19c] ss:$12 sps:$4 sm:$0xff]  }
0x122e   :  { %v3060_v12 = vsel %vm1617_vm7, %v3037_v35, %v3040_v58 }
0x122f   :  { %v3061_v46 = vsel %vm1619_vm8, %v3060_v12, %v3043_v20 }
0x1230   :  { %v3062_v54 = vsel %vm1621_vm9, %v3061_v46, %v3046_v56 }
0x1231   :  { %v3066_v41 = vpack.c.bf16 %v3065_v22, %v3062_v54 }
0x1233   :  { %3279 = vmatmul.mubr.bf16.vlgmr.msra.gmra.mrb[72].mxu1 %v3066_v41  ;;  %5826 = vmatmul.mubr.bf16.vlgmr.msra.gmra.mrb[76].mxu0 %v3066_v41 }
0x1234   :  { %3494 = vmatpush1.bf16.msra.mxu1 %v8266_v18  ;;  %5830 = vmatpush3.bf16.msra.mxu0 %v8271_v59 }
0x1235   :  { %3495 = vmatprep.subr.bf16.mxu1 %v8276_v34  ;;  %5831 = vmatprep.subr.bf16.mxu0 %v6632_v3 }
0x1236   :  { %3525 = vmatprep.mubr.bf16.mxu1 %v6631_v2  ;;  %5845 = vmatprep.mubr.msk.bf16.mxu0 %vm6633_vm0, %v6632_v3 }
0x1238   :  { %3496 = vmatpush1.bf16.msra.mxu1 %v8282_v40  ;;  %5832 = vmatpush3.bf16.msra.mxu0 %v8288_v6 }
0x1239   :  { %3497 = vmatprep.subr.bf16.mxu1 %v8294_v61  ;;  %5833 = vmatprep.subr.bf16.mxu0 %v6632_v3 }
0x123c   :  { %3498 = vmatpush1.bf16.msra.mxu1 %v8304_v47  ;;  %5834 = vmatpush3.bf16.msra.mxu0 %v8310_v19 }
0x123d   :  { %3499 = vmatprep.subr.bf16.mxu1 %v8316_v1  ;;  %5835 = vmatprep.subr.bf16.mxu0 %v6632_v3 }
0x1240   :  { %3500 = vmatpush1.bf16.msra.mxu1 %v8323_v24  ;;  %5836 = vmatpush3.bf16.msra.mxu0 %v8329_v57 }
0x1241   :  { %3501 = vmatprep.subr.bf16.mxu1 %v8335_v51  ;;  %5837 = vmatprep.subr.bf16.mxu0 %v6632_v3 }
0x1244   :  { %3502 = vmatpush1.bf16.msra.mxu1 %v8342_v60  ;;  %5838 = vmatpush3.bf16.msra.mxu0 %v8348_v4 }
0x1245   :  { %3503 = vmatprep.subr.bf16.mxu1 %v8354_v63  ;;  %5839 = vmatprep.subr.bf16.mxu0 %v6632_v3 }
0x1248   :  { %3504 = vmatpush1.bf16.msra.mxu1 %v8361_v50  ;;  %5840 = vmatpush3.bf16.msra.mxu0 %v8367_v5 }
0x1249   :  { %3505 = vmatprep.subr.bf16.mxu1 %v8373_v62  ;;  %5841 = vmatprep.subr.bf16.mxu0 %v6632_v3 }
0x124c   :  { %3506 = vmatpush1.bf16.msra.mxu1 %v8380_v52  ;;  %5842 = vmatpush3.bf16.msra.mxu0 %v8386_v13 }
0x124d   :  { %3507 = vmatprep.subr.bf16.mxu1 %v8392_v23  ;;  %5843 = vmatprep.subr.bf16.mxu0 %v6632_v3 }
0x1250   :  { %3508 = vmatpush1.bf16.msra.mxu1 %v8399_v31  ;;  %5844 = vmatpush3.bf16.msra.mxu0 %v8405_v0 }
0x1251   :  { %3656 = vmatprep.subr.bf16.mxu1 %v8227_v27  ;;  %5849 = vmatprep.subr.bf16.mxu0 %v6632_v3 }
0x1253   :  { %3526 = vmatmul.mubr.bf16.vlgmr.msra.gmra.mrb[76].mxu1 %v6631_v2  ;;  %5846 = vmatmul.mubr.bf16.vlgmr.msra.gmra.mrb[80].mxu0 %v6631_v2 }
0x1254   :  { %3657 = vmatpush1.bf16.msra.mxu1 %v8266_v18  ;;  %5850 = vmatpush3.bf16.msra.mxu0 %v8271_v59 }
0x1255   :  { %3658 = vmatprep.subr.bf16.mxu1 %v8276_v34  ;;  %5851 = vmatprep.subr.bf16.mxu0 %v6632_v3 }
0x1256   :  { %3688 = vmatprep.mubr.bf16.mxu1 %v6631_v2  ;;  %5865 = vmatprep.mubr.msk.bf16.mxu0 %vm6633_vm0, %v6632_v3 }
0x1258   :  { %3659 = vmatpush1.bf16.msra.mxu1 %v8282_v40  ;;  %5852 = vmatpush3.bf16.msra.mxu0 %v8288_v6 }
0x1259   :  { %3660 = vmatprep.subr.bf16.mxu1 %v8294_v61  ;;  %5853 = vmatprep.subr.bf16.mxu0 %v6632_v3 }
0x125c   :  { %3661 = vmatpush1.bf16.msra.mxu1 %v8304_v47  ;;  %5854 = vmatpush3.bf16.msra.mxu0 %v8310_v19 }
0x125d   :  { %3662 = vmatprep.subr.bf16.mxu1 %v8316_v1  ;;  %5855 = vmatprep.subr.bf16.mxu0 %v6632_v3 }
0x1260   :  { %3663 = vmatpush1.bf16.msra.mxu1 %v8323_v24  ;;  %5856 = vmatpush3.bf16.msra.mxu0 %v8329_v57 }
0x1261   :  { %3664 = vmatprep.subr.bf16.mxu1 %v8335_v51  ;;  %5857 = vmatprep.subr.bf16.mxu0 %v6632_v3 }
0x1264   :  { %3665 = vmatpush1.bf16.msra.mxu1 %v8342_v60  ;;  %5858 = vmatpush3.bf16.msra.mxu0 %v8348_v4 }
0x1265   :  { %3666 = vmatprep.subr.bf16.mxu1 %v8354_v63  ;;  %5859 = vmatprep.subr.bf16.mxu0 %v6632_v3 }
0x1268   :  { %3667 = vmatpush1.bf16.msra.mxu1 %v8361_v50  ;;  %5860 = vmatpush3.bf16.msra.mxu0 %v8367_v5 }
0x1269   :  { %3668 = vmatprep.subr.bf16.mxu1 %v8373_v62  ;;  %5861 = vmatprep.subr.bf16.mxu0 %v6632_v3 }
0x126c   :  { %3669 = vmatpush1.bf16.msra.mxu1 %v8380_v52  ;;  %5862 = vmatpush3.bf16.msra.mxu0 %v8386_v13 }
0x126d   :  { %3670 = vmatprep.subr.bf16.mxu1 %v8392_v23  ;;  %5863 = vmatprep.subr.bf16.mxu0 %v6632_v3 }
0x1270   :  { %3671 = vmatpush1.bf16.msra.mxu1 %v8399_v31  ;;  %5864 = vmatpush3.bf16.msra.mxu0 %v8405_v0 }
0x1271   :  { %3774 = vmatprep.subr.bf16.mxu1 %v8227_v27  ;;  %5869 = vmatprep.subr.bf16.mxu0 %v6632_v3 }
0x1306   :  { %v3280_v55 = vpop.f32.mrb[72].mxu1  ;;  %v3323_v7 = vpop.f32.mrb[76].mxu0 }
0x1307   :  { %v3281_v8 = vadd.f32 %v3280_v55, %v3106_v32  ;;  %v3324_v49 = vadd.f32 %v3323_v7, %v3114_v48  ;;  %v3282_v16 = vpop.f32.mrb[73].mxu1  ;;  %v5827_v28 = vpop.f32.mrb[77].mxu0 }
0x1308   :  { %v3283_v26 = vadd.f32 %v3282_v16, %v3110_v15  ;;  %v3284_v42 = vpop.f32.mrb[74].mxu1  ;;  %v3326_v43 = vpop.f32.mrb[78].mxu0 }
0x1309   :  { %v3400_v17 = vrot.slane %v3324_v49, 2  ;;  %v3403_v30 = vrot.slane %v3324_v49, 6  ;;  %v3285_v21 = vadd.f32 %v3284_v42, %v3106_v32  ;;  %v3327_v33 = vadd.f32 %v3326_v43, %v3114_v48  ;;  %v3286_v44 = vpop.f32.mrb[75].mxu1  ;;  %v5828_v36 = vpop.f32.mrb[79].mxu0 }
0x130a   :  { %v3287_v10 = vadd.f32 %v3286_v44, %v3110_v15  ;;  %v3373_v38 = vrot.slane %v3281_v8, 2  ;;  %v3374_v11 = vrot.slane %v3283_v26, 2  ;;  %v3379_v9 = vrot.slane %v3281_v8, 6 }
0x130b   :  { %v3407_v14 = vrot.slane %v3327_v33, 2  ;;  %v3410_v53 = vrot.slane %v3327_v33, 6  ;;  %v8458_v39 = vsel %vm183_vm4, %v3327_v33, %v3400_v17  ;;  %v8462_v45 = vsel %vm183_vm4, %v3327_v33, %v3403_v30 }
0x130c   :  { %v8466_v35 = vsel %vm183_vm4, %v3285_v21, %v3373_v38  ;;  %v8470_v58 = vsel %vm7029_vm5, %v3287_v10, %v3374_v11  ;;  %v8474_v22 = vsel %vm183_vm4, %v3285_v21, %v3379_v9  ;;  %v3380_v20 = vrot.slane %v3283_v26, 6  ;;  %v8509_v11 = vld [vmem:[%s8964_s5 + $0x2] ss:$0 sm:$0xff] }
0x130d   :  { %v3387_v56 = vrot.slane %v3285_v21, 2  ;;  %v8478_v12 = vsel %vm183_vm4, %v3324_v49, %v3407_v14  ;;  %v3388_v46 = vrot.slane %v3287_v10, 2  ;;  %v3393_v54 = vrot.slane %v3285_v21, 6 }
0x130e   :  { %v8482_v41 = vsel %vm7029_vm5, %v3287_v10, %v3380_v20  ;;  %v8486_v37 = vsel %vm183_vm4, %v3324_v49, %v3410_v53  ;;  %v3394_v32 = vrot.slane %v3287_v10, 6 }
0x130f   :  { %v8490_v48 = vsel %vm183_vm4, %v3281_v8, %v3387_v56  ;;  %v8494_v15 = vsel %vm7029_vm5, %v3283_v26, %v3388_v46  ;;  %v8498_v55 = vsel %vm183_vm4, %v3281_v8, %v3393_v54 }
0x1310   :  { %v8502_v7 = vsel %vm7029_vm5, %v3283_v26, %v3394_v32 }
0x1326   :  { %v3527_v16 = vpop.f32.mrb[76].mxu1  ;;  %v3636_v49 = vpop.f32.mrb[80].mxu0 }
0x1327   :  { %v3536_v28 = vrot.slane %v3527_v16, 2  ;;  %v3529_v42 = vpop.f32.mrb[77].mxu1  ;;  %v5847_v43 = vpop.f32.mrb[81].mxu0  ;;  %v3637_v9 = vadd.f32 %v8509_v11, %v3636_v49 }
0x1328   :  { %v3537_v17 = vrot.slane %v3529_v42, 2  ;;  %v3531_v30 = vpop.f32.mrb[78].mxu1  ;;  %v3639_v21 = vpop.f32.mrb[82].mxu0 }
0x1329   :  { %v3540_v33 = vadd.f32 %v3536_v28, %v8466_v35  ;;  %v3532_v44 = vpop.f32.mrb[79].mxu1  ;;  %v5848_v36 = vpop.f32.mrb[83].mxu0  ;;  %v3643_v20 = vrot.slane %v3637_v9, 2 }
0x132a   :  { %v3541_v8 = vadd.f32 %v3537_v17, %v8470_v58 }
0x132b   :  { %v5124_v10 = vmul.f32 -1.442695, %v3540_v33 }
0x132c   :  { %v5125_v38 = vmul.f32 -1.442695, %v3541_v8 }
0x132d   :  { %6444 = vpow2.f32 %v5124_v10 }
0x132e   :  { %6446 = vpow2.f32 %v5125_v38 }
0x1337   :  { %v6445_v25 = vpop.eup %6444 }
0x1338   :  { %v3548_v26 = vadd.f32 1.0, %v6445_v25  ;;  %v6447_v14 = vpop.eup %6446 }
0x1339   :  { %v3549_v53 = vadd.f32 1.0, %v6447_v14 }
0x133a   :  { %6448 = vrcp.f32 %v3548_v26 }
0x133b   :  { %6450 = vrcp.f32 %v3549_v53 }
0x1344   :  { %v6449_v56 = vpop.eup %6448 }
0x1345   :  { %v3645_v46 = vmul.f32 %v6449_v56, %v3643_v20  ;;  %v6451_v32 = vpop.eup %6450 }
0x1346   :  { %v3648_v16 = vsub.f32 1.0, %v6451_v32  ;;  %v3650_v42 = vmul.f32 0.0, %v6451_v32 }
0x1347   :  { %v3646_v54 = vadd.f32 %v3645_v46, %v8458_v39 }
0x1349   :  { %6452 = vtanh.f32 %v3646_v54 }
0x1353   :  { %v6453_v28 = vpop.eup %6452 }
0x1354   :  { %v3649_v43 = vmul.f32 %v6453_v28, %v3648_v16 }
0x1356   :  { %v8513_v17 = vadd.f32 %v3650_v42, %v3649_v43 }
0x1358   :  { %v3652_v30 = vpack.c.bf16 %v8513_v17, %v8513_v17 }
0x135a   :  { %v3654_v49 = vrot.slane %v3652_v30, 3 }
0x135c   :  { %3689 = vmatmul.mubr.bf16.vlgmr.msra.gmra.mrb[80].mxu1 %v3654_v49  ;;  %5866 = vmatmul.mubr.bf16.vlgmr.msra.gmra.mrb[84].mxu0 %v3654_v49 }
0x135d   :  { %3775 = vmatpush1.bf16.msra.mxu1 %v8266_v18  ;;  %5870 = vmatpush3.bf16.msra.mxu0 %v8271_v59 }
0x135e   :  { %3776 = vmatprep.subr.bf16.mxu1 %v8276_v34  ;;  %5871 = vmatprep.subr.bf16.mxu0 %v6632_v3 }
0x135f   :  { %3806 = vmatprep.mubr.bf16.mxu1 %v6631_v2  ;;  %5885 = vmatprep.mubr.msk.bf16.mxu0 %vm6633_vm0, %v6632_v3 }
0x1361   :  { %3777 = vmatpush1.bf16.msra.mxu1 %v8282_v40  ;;  %5872 = vmatpush3.bf16.msra.mxu0 %v8288_v6 }
0x1362   :  { %3778 = vmatprep.subr.bf16.mxu1 %v8294_v61  ;;  %5873 = vmatprep.subr.bf16.mxu0 %v6632_v3 }
0x1365   :  { %3779 = vmatpush1.bf16.msra.mxu1 %v8304_v47  ;;  %5874 = vmatpush3.bf16.msra.mxu0 %v8310_v19 }
0x1366   :  { %3780 = vmatprep.subr.bf16.mxu1 %v8316_v1  ;;  %5875 = vmatprep.subr.bf16.mxu0 %v6632_v3 }
0x1369   :  { %3781 = vmatpush1.bf16.msra.mxu1 %v8323_v24  ;;  %5876 = vmatpush3.bf16.msra.mxu0 %v8329_v57 }
0x136a   :  { %3782 = vmatprep.subr.bf16.mxu1 %v8335_v51  ;;  %5877 = vmatprep.subr.bf16.mxu0 %v6632_v3 }
0x136d   :  { %3783 = vmatpush1.bf16.msra.mxu1 %v8342_v60  ;;  %5878 = vmatpush3.bf16.msra.mxu0 %v8348_v4 }
0x136e   :  { %3784 = vmatprep.subr.bf16.mxu1 %v8354_v63  ;;  %5879 = vmatprep.subr.bf16.mxu0 %v6632_v3 }
0x1371   :  { %3785 = vmatpush1.bf16.msra.mxu1 %v8361_v50  ;;  %5880 = vmatpush3.bf16.msra.mxu0 %v8367_v5 }
0x1372   :  { %3786 = vmatprep.subr.bf16.mxu1 %v8373_v62  ;;  %5881 = vmatprep.subr.bf16.mxu0 %v6632_v3 }
0x1375   :  { %3787 = vmatpush1.bf16.msra.mxu1 %v8380_v52  ;;  %5882 = vmatpush3.bf16.msra.mxu0 %v8386_v13 }
0x1376   :  { %3788 = vmatprep.subr.bf16.mxu1 %v8392_v23  ;;  %5883 = vmatprep.subr.bf16.mxu0 %v6632_v3 }
0x1379   :  { %3789 = vmatpush1.bf16.msra.mxu1 %v8399_v31  ;;  %5884 = vmatpush3.bf16.msra.mxu0 %v8405_v0 }
0x137a   :  { %3892 = vmatprep.subr.bf16.mxu1 %v8227_v27  ;;  %5889 = vmatprep.subr.bf16.mxu0 %v6632_v3 }
0x142f   :  { %v3690_v21 = vpop.f32.mrb[80].mxu1  ;;  %v3751_v33 = vpop.f32.mrb[84].mxu0 }
0x1430   :  { %v3699_v44 = vrot.slane %v3690_v21, 4  ;;  %v3692_v36 = vpop.f32.mrb[81].mxu1  ;;  %v5867_v10 = vpop.f32.mrb[85].mxu0  ;;  %v3752_v16 = vadd.f32 %v8509_v11, %v3751_v33 }
0x1431   :  { %v3700_v8 = vrot.slane %v3692_v36, 4  ;;  %v3694_v38 = vpop.f32.mrb[82].mxu1  ;;  %v3754_v25 = vpop.f32.mrb[86].mxu0  ;;  %v3766_v36 = vrot.slane %v8513_v17, 2 }
0x1432   :  { %v3703_v26 = vadd.f32 %v3699_v44, %v8474_v22  ;;  %v3695_v9 = vpop.f32.mrb[83].mxu1  ;;  %v5868_v14 = vpop.f32.mrb[87].mxu0  ;;  %v3758_v42 = vrot.slane %v3752_v16, 4 }
0x1433   :  { %v3704_v20 = vadd.f32 %v3700_v8, %v8482_v41 }
0x1434   :  { %v5134_v53 = vmul.f32 -1.442695, %v3703_v26 }
0x1435   :  { %v5135_v56 = vmul.f32 -1.442695, %v3704_v20 }
0x1436   :  { %6454 = vpow2.f32 %v5134_v53 }
0x1437   :  { %6456 = vpow2.f32 %v5135_v56 }
0x1440   :  { %v6455_v46 = vpop.eup %6454 }
0x1441   :  { %v3711_v54 = vadd.f32 1.0, %v6455_v46  ;;  %v6457_v32 = vpop.eup %6456 }
0x1442   :  { %v3712_v28 = vadd.f32 1.0, %v6457_v32 }
0x1443   :  { %6458 = vrcp.f32 %v3711_v54 }
0x1444   :  { %6460 = vrcp.f32 %v3712_v28 }
0x144d   :  { %v6459_v43 = vpop.eup %6458 }
0x144e   :  { %v3760_v30 = vmul.f32 %v6459_v43, %v3758_v42  ;;  %v6461_v21 = vpop.eup %6460 }
0x144f   :  { %v3763_v44 = vsub.f32 1.0, %v6461_v21  ;;  %v3768_v38 = vmul.f32 %v6461_v21, %v3766_v36 }
0x1450   :  { %v3761_v49 = vadd.f32 %v3760_v30, %v8462_v45 }
0x1452   :  { %6462 = vtanh.f32 %v3761_v49 }
0x145c   :  { %v6463_v10 = vpop.eup %6462 }
0x145d   :  { %v3764_v8 = vmul.f32 %v6463_v10, %v3763_v44 }
0x145f   :  { %v8557_v25 = vadd.f32 %v3768_v38, %v3764_v8 }
0x1461   :  { %v3770_v33 = vpack.c.bf16 %v8557_v25, %v8557_v25 }
0x1463   :  { %v3772_v26 = vrot.slane %v3770_v33, 2 }
0x1465   :  { %3807 = vmatmul.mubr.bf16.vlgmr.msra.gmra.mrb[84].mxu1 %v3772_v26  ;;  %5886 = vmatmul.mubr.bf16.vlgmr.msra.gmra.mrb[88].mxu0 %v3772_v26 }
0x1466   :  { %3893 = vmatpush1.bf16.msra.mxu1 %v8266_v18  ;;  %5890 = vmatpush3.bf16.msra.mxu0 %v8271_v59 }
0x1467   :  { %3894 = vmatprep.subr.bf16.mxu1 %v8276_v34  ;;  %5891 = vmatprep.subr.bf16.mxu0 %v6632_v3 }
0x1468   :  { %3924 = vmatprep.mubr.bf16.mxu1 %v6631_v2  ;;  %5905 = vmatprep.mubr.msk.bf16.mxu0 %vm6633_vm0, %v6632_v3 }
0x146a   :  { %3895 = vmatpush1.bf16.msra.mxu1 %v8282_v40  ;;  %5892 = vmatpush3.bf16.msra.mxu0 %v8288_v6 }
0x146b   :  { %3896 = vmatprep.subr.bf16.mxu1 %v8294_v61  ;;  %5893 = vmatprep.subr.bf16.mxu0 %v6632_v3 }
0x146e   :  { %3897 = vmatpush1.bf16.msra.mxu1 %v8304_v47  ;;  %5894 = vmatpush3.bf16.msra.mxu0 %v8310_v19 }
0x146f   :  { %3898 = vmatprep.subr.bf16.mxu1 %v8316_v1  ;;  %5895 = vmatprep.subr.bf16.mxu0 %v6632_v3 }
0x1472   :  { %3899 = vmatpush1.bf16.msra.mxu1 %v8323_v24  ;;  %5896 = vmatpush3.bf16.msra.mxu0 %v8329_v57 }
0x1473   :  { %3900 = vmatprep.subr.bf16.mxu1 %v8335_v51  ;;  %5897 = vmatprep.subr.bf16.mxu0 %v6632_v3 }
0x1476   :  { %3901 = vmatpush1.bf16.msra.mxu1 %v8342_v60  ;;  %5898 = vmatpush3.bf16.msra.mxu0 %v8348_v4 }
0x1477   :  { %3902 = vmatprep.subr.bf16.mxu1 %v8354_v63  ;;  %5899 = vmatprep.subr.bf16.mxu0 %v6632_v3 }
0x147a   :  { %3903 = vmatpush1.bf16.msra.mxu1 %v8361_v50  ;;  %5900 = vmatpush3.bf16.msra.mxu0 %v8367_v5 }
0x147b   :  { %3904 = vmatprep.subr.bf16.mxu1 %v8373_v62  ;;  %5901 = vmatprep.subr.bf16.mxu0 %v6632_v3 }
0x147e   :  { %3905 = vmatpush1.bf16.msra.mxu1 %v8380_v52  ;;  %5902 = vmatpush3.bf16.msra.mxu0 %v8386_v13 }
0x147f   :  { %3906 = vmatprep.subr.bf16.mxu1 %v8392_v23  ;;  %5903 = vmatprep.subr.bf16.mxu0 %v6632_v3 }
0x1482   :  { %3907 = vmatpush1.bf16.msra.mxu1 %v8399_v31  ;;  %5904 = vmatpush3.bf16.msra.mxu0 %v8405_v0 }
0x1483   :  { %3998 = vmatprep.subr.bf16.mxu1 %v8227_v27  ;;  %5909 = vmatprep.subr.bf16.mxu0 %v6632_v3 }
0x1538   :  { %v3808_v9 = vpop.f32.mrb[84].mxu1  ;;  %v3869_v14 = vpop.f32.mrb[88].mxu0 }
0x1539   :  { %v3817_v53 = vrot.slane %v3808_v9, 6  ;;  %v3810_v20 = vpop.f32.mrb[85].mxu1  ;;  %v5887_v56 = vpop.f32.mrb[89].mxu0  ;;  %v3870_v10 = vadd.f32 %v8509_v11, %v3869_v14 }
0x153a   :  { %v3818_v46 = vrot.slane %v3810_v20, 6  ;;  %v3812_v54 = vpop.f32.mrb[86].mxu1  ;;  %v3872_v32 = vpop.f32.mrb[90].mxu0 }
0x153b   :  { %v3821_v16 = vadd.f32 %v3817_v53, %v8466_v35  ;;  %v3813_v28 = vpop.f32.mrb[87].mxu1  ;;  %v5888_v42 = vpop.f32.mrb[91].mxu0  ;;  %v3876_v38 = vrot.slane %v3870_v10, 6 }
0x153c   :  { %v3822_v30 = vadd.f32 %v3818_v46, %v8470_v58  ;;  %v3884_v58 = vrot.slane %v8557_v25, 2 }
0x153d   :  { %v5136_v43 = vmul.f32 -1.442695, %v3821_v16 }
0x153e   :  { %v5137_v49 = vmul.f32 -1.442695, %v3822_v30 }
0x153f   :  { %6464 = vpow2.f32 %v5136_v43 }
0x1540   :  { %6466 = vpow2.f32 %v5137_v49 }
0x1549   :  { %v6465_v21 = vpop.eup %6464 }
0x154a   :  { %v3829_v44 = vadd.f32 1.0, %v6465_v21  ;;  %v6467_v36 = vpop.eup %6466 }
0x154b   :  { %v3830_v8 = vadd.f32 1.0, %v6467_v36 }
0x154c   :  { %6468 = vrcp.f32 %v3829_v44 }
0x154d   :  { %6470 = vrcp.f32 %v3830_v8 }
0x1556   :  { %v6469_v33 = vpop.eup %6468 }
0x1557   :  { %v3878_v26 = vmul.f32 %v6469_v33, %v3876_v38  ;;  %v6471_v9 = vpop.eup %6470 }
0x1558   :  { %v3881_v53 = vsub.f32 1.0, %v6471_v9  ;;  %v3886_v56 = vmul.f32 %v6471_v9, %v3884_v58 }
0x1559   :  { %v3879_v35 = vadd.f32 %v3878_v26, %v8458_v39 }
0x155b   :  { %6472 = vtanh.f32 %v3879_v35 }
0x1565   :  { %v6473_v20 = vpop.eup %6472 }
0x1566   :  { %v3882_v46 = vmul.f32 %v6473_v20, %v3881_v53 }
0x1568   :  { %v8603_v54 = vadd.f32 %v3886_v56, %v3882_v46 }
0x156a   :  { %v3888_v14 = vpack.c.bf16 %v8603_v54, %v8603_v54 }
0x156c   :  { %v3890_v32 = vrot.slane %v3888_v14, 1 }
0x156e   :  { %3925 = vmatmul.mubr.bf16.vlgmr.msra.gmra.mrb[88].mxu1 %v3890_v32  ;;  %5906 = vmatmul.mubr.bf16.vlgmr.msra.gmra.mrb[92].mxu0 %v3890_v32 }
0x156f   :  { %3999 = vmatpush1.bf16.msra.mxu1 %v8266_v18  ;;  %5910 = vmatpush3.bf16.msra.mxu0 %v8271_v59 }
0x1570   :  { %4000 = vmatprep.subr.bf16.mxu1 %v8276_v34  ;;  %5911 = vmatprep.subr.bf16.mxu0 %v6632_v3 }
0x1571   :  { %4030 = vmatprep.mubr.bf16.mxu1 %v6631_v2  ;;  %5925 = vmatprep.mubr.msk.bf16.mxu0 %vm6633_vm0, %v6632_v3 }
0x1573   :  { %4001 = vmatpush1.bf16.msra.mxu1 %v8282_v40  ;;  %5912 = vmatpush3.bf16.msra.mxu0 %v8288_v6 }
0x1574   :  { %4002 = vmatprep.subr.bf16.mxu1 %v8294_v61  ;;  %5913 = vmatprep.subr.bf16.mxu0 %v6632_v3 }
0x1577   :  { %4003 = vmatpush1.bf16.msra.mxu1 %v8304_v47  ;;  %5914 = vmatpush3.bf16.msra.mxu0 %v8310_v19 }
0x1578   :  { %4004 = vmatprep.subr.bf16.mxu1 %v8316_v1  ;;  %5915 = vmatprep.subr.bf16.mxu0 %v6632_v3 }
0x157b   :  { %4005 = vmatpush1.bf16.msra.mxu1 %v8323_v24  ;;  %5916 = vmatpush3.bf16.msra.mxu0 %v8329_v57 }
0x157c   :  { %4006 = vmatprep.subr.bf16.mxu1 %v8335_v51  ;;  %5917 = vmatprep.subr.bf16.mxu0 %v6632_v3 }
0x157f   :  { %4007 = vmatpush1.bf16.msra.mxu1 %v8342_v60  ;;  %5918 = vmatpush3.bf16.msra.mxu0 %v8348_v4 }
0x1580   :  { %4008 = vmatprep.subr.bf16.mxu1 %v8354_v63  ;;  %5919 = vmatprep.subr.bf16.mxu0 %v6632_v3 }
0x1583   :  { %4009 = vmatpush1.bf16.msra.mxu1 %v8361_v50  ;;  %5920 = vmatpush3.bf16.msra.mxu0 %v8367_v5 }
0x1584   :  { %4010 = vmatprep.subr.bf16.mxu1 %v8373_v62  ;;  %5921 = vmatprep.subr.bf16.mxu0 %v6632_v3 }
0x1587   :  { %4011 = vmatpush1.bf16.msra.mxu1 %v8380_v52  ;;  %5922 = vmatpush3.bf16.msra.mxu0 %v8386_v13 }
0x1588   :  { %4012 = vmatprep.subr.bf16.mxu1 %v8392_v23  ;;  %5923 = vmatprep.subr.bf16.mxu0 %v6632_v3 }
0x158b   :  { %4013 = vmatpush1.bf16.msra.mxu1 %v8399_v31  ;;  %5924 = vmatpush3.bf16.msra.mxu0 %v8405_v0 }
0x158c   :  { %4116 = vmatprep.subr.bf16.mxu1 %v8227_v27  ;;  %5929 = vmatprep.subr.bf16.mxu0 %v6632_v3 }
0x1641   :  { %v3926_v39 = vpop.f32.mrb[88].mxu1  ;;  %v3981_v16 = vpop.f32.mrb[92].mxu0 }
0x1642   :  { %v3933_v28 = vadd.f32 %v3926_v39, %v8474_v22  ;;  %v3928_v42 = vpop.f32.mrb[89].mxu1  ;;  %v5907_v43 = vpop.f32.mrb[93].mxu0  ;;  %v3982_v9 = vadd.f32 %v8509_v11, %v3981_v16 }
0x1643   :  { %v3930_v30 = vpop.f32.mrb[90].mxu1  ;;  %v3984_v49 = vpop.f32.mrb[94].mxu0  ;;  %v3934_v10 = vadd.f32 %v3928_v42, %v8482_v41  ;;  %v3993_v41 = vrot.slane %v8603_v54, 2 }
0x1644   :  { %v5138_v21 = vmul.f32 -1.442695, %v3933_v28  ;;  %v3931_v44 = vpop.f32.mrb[91].mxu1  ;;  %v5908_v36 = vpop.f32.mrb[95].mxu0 }
0x1645   :  { %v5139_v8 = vmul.f32 -1.442695, %v3934_v10 }
0x1646   :  { %6474 = vpow2.f32 %v5138_v21 }
0x1647   :  { %6476 = vpow2.f32 %v5139_v8 }
0x1650   :  { %v6475_v38 = vpop.eup %6474 }
0x1651   :  { %v3941_v33 = vadd.f32 1.0, %v6475_v38  ;;  %v6477_v26 = vpop.eup %6476 }
0x1652   :  { %v3942_v35 = vadd.f32 1.0, %v6477_v26 }
0x1653   :  { %6478 = vrcp.f32 %v3941_v33 }
0x1654   :  { %6480 = vrcp.f32 %v3942_v35 }
0x165d   :  { %v6479_v22 = vpop.eup %6478 }
0x165e   :  { %v3987_v53 = vmul.f32 %v6479_v22, %v3982_v9  ;;  %v6481_v56 = vpop.eup %6480 }
0x165f   :  { %v3990_v46 = vsub.f32 1.0, %v6481_v56  ;;  %v3995_v39 = vmul.f32 %v6481_v56, %v3993_v41 }
0x1660   :  { %v3988_v20 = vadd.f32 %v3987_v53, %v8462_v45 }
0x1662   :  { %6482 = vtanh.f32 %v3988_v20 }
0x166c   :  { %v6483_v14 = vpop.eup %6482 }
0x166d   :  { %v3991_v32 = vmul.f32 %v6483_v14, %v3990_v46 }
0x166f   :  { %v8647_v28 = vadd.f32 %v3995_v39, %v3991_v32 }
0x1671   :  { %v3997_v42 = vpack.c.bf16 %v8647_v28, %v8647_v28  ;;  %v4108_v39 = vrot.slane %v8647_v28, 2 }
0x1673   :  { %4031 = vmatmul.mubr.bf16.vlgmr.msra.gmra.mrb[92].mxu1 %v3997_v42  ;;  %5926 = vmatmul.mubr.bf16.vlgmr.msra.gmra.mrb[96].mxu0 %v3997_v42 }
0x1674   :  { %4117 = vmatpush1.bf16.msra.mxu1 %v8266_v18  ;;  %5930 = vmatpush3.bf16.msra.mxu0 %v8271_v59 }
0x1675   :  { %4118 = vmatprep.subr.bf16.mxu1 %v8276_v34  ;;  %5931 = vmatprep.subr.bf16.mxu0 %v6632_v3 }
0x1676   :  { %4148 = vmatprep.mubr.bf16.mxu1 %v6631_v2  ;;  %5945 = vmatprep.mubr.msk.bf16.mxu0 %vm6633_vm0, %v6632_v3 }
0x1678   :  { %4119 = vmatpush1.bf16.msra.mxu1 %v8282_v40  ;;  %5932 = vmatpush3.bf16.msra.mxu0 %v8288_v6 }
0x1679   :  { %4120 = vmatprep.subr.bf16.mxu1 %v8294_v61  ;;  %5933 = vmatprep.subr.bf16.mxu0 %v6632_v3 }
0x167c   :  { %4121 = vmatpush1.bf16.msra.mxu1 %v8304_v47  ;;  %5934 = vmatpush3.bf16.msra.mxu0 %v8310_v19 }
0x167d   :  { %4122 = vmatprep.subr.bf16.mxu1 %v8316_v1  ;;  %5935 = vmatprep.subr.bf16.mxu0 %v6632_v3 }
0x1680   :  { %4123 = vmatpush1.bf16.msra.mxu1 %v8323_v24  ;;  %5936 = vmatpush3.bf16.msra.mxu0 %v8329_v57 }
0x1681   :  { %4124 = vmatprep.subr.bf16.mxu1 %v8335_v51  ;;  %5937 = vmatprep.subr.bf16.mxu0 %v6632_v3 }
0x1684   :  { %4125 = vmatpush1.bf16.msra.mxu1 %v8342_v60  ;;  %5938 = vmatpush3.bf16.msra.mxu0 %v8348_v4 }
0x1685   :  { %4126 = vmatprep.subr.bf16.mxu1 %v8354_v63  ;;  %5939 = vmatprep.subr.bf16.mxu0 %v6632_v3 }
0x1688   :  { %4127 = vmatpush1.bf16.msra.mxu1 %v8361_v50  ;;  %5940 = vmatpush3.bf16.msra.mxu0 %v8367_v5 }
0x1689   :  { %4128 = vmatprep.subr.bf16.mxu1 %v8373_v62  ;;  %5941 = vmatprep.subr.bf16.mxu0 %v6632_v3 }
0x168c   :  { %4129 = vmatpush1.bf16.msra.mxu1 %v8380_v52  ;;  %5942 = vmatpush3.bf16.msra.mxu0 %v8386_v13 }
0x168d   :  { %4130 = vmatprep.subr.bf16.mxu1 %v8392_v23  ;;  %5943 = vmatprep.subr.bf16.mxu0 %v6632_v3 }
0x1690   :  { %4131 = vmatpush1.bf16.msra.mxu1 %v8399_v31  ;;  %5944 = vmatpush3.bf16.msra.mxu0 %v8405_v0 }
0x1691   :  { %4234 = vmatprep.subr.bf16.mxu1 %v8227_v27  ;;  %5949 = vmatprep.subr.bf16.mxu0 %v6632_v3 }
0x1746   :  { %v4032_v45 = vpop.f32.mrb[92].mxu1  ;;  %v4093_v16 = vpop.f32.mrb[96].mxu0 }
0x1747   :  { %v4041_v43 = vrot.slane %v4032_v45, 2  ;;  %v4034_v30 = vpop.f32.mrb[93].mxu1  ;;  %v5927_v49 = vpop.f32.mrb[97].mxu0  ;;  %v4094_v53 = vadd.f32 %v8509_v11, %v4093_v16 }
0x1748   :  { %v4042_v21 = vrot.slane %v4034_v30, 2  ;;  %v4036_v44 = vpop.f32.mrb[94].mxu1  ;;  %v4096_v36 = vpop.f32.mrb[98].mxu0 }
0x1749   :  { %v4045_v10 = vadd.f32 %v4041_v43, %v8490_v48  ;;  %v4037_v8 = vpop.f32.mrb[95].mxu1  ;;  %v5928_v38 = vpop.f32.mrb[99].mxu0  ;;  %v4100_v56 = vrot.slane %v4094_v53, 2 }
0x174a   :  { %v4046_v26 = vadd.f32 %v4042_v21, %v8494_v15 }
0x174b   :  { %v5140_v33 = vmul.f32 -1.442695, %v4045_v10 }
0x174c   :  { %v5141_v35 = vmul.f32 -1.442695, %v4046_v26 }
0x174d   :  { %6484 = vpow2.f32 %v5140_v33 }
0x174e   :  { %6486 = vpow2.f32 %v5141_v35 }
0x1757   :  { %v6485_v27 = vpop.eup %6484 }
0x1758   :  { %v4053_v9 = vadd.f32 1.0, %v6485_v27  ;;  %v6487_v22 = vpop.eup %6486 }
0x1759   :  { %v4054_v20 = vadd.f32 1.0, %v6487_v22 }
0x175a   :  { %6488 = vrcp.f32 %v4053_v9  ;;  %v4469_v9 = vrot.slane %v8603_v54, 6 }
0x175b   :  { %6490 = vrcp.f32 %v4054_v20 }
0x1764   :  { %v6489_v46 = vpop.eup %6488 }
0x1765   :  { %v4102_v41 = vmul.f32 %v6489_v46, %v4100_v56  ;;  %v6491_v32 = vpop.eup %6490 }
0x1766   :  { %v4105_v42 = vsub.f32 1.0, %v6491_v32  ;;  %v4110_v43 = vmul.f32 %v6491_v32, %v4108_v39  ;;  %v6582_v32 = vld [vmem:[%s8962_s3 + $0x188] ss:$12 sps:$4 sm:$0xff]  }
0x1767   :  { %v4103_v14 = vadd.f32 %v4102_v41, %v8478_v12 }
0x1769   :  { %6492 = vtanh.f32 %v4103_v14  ;;  %v6581_v14 = vld [vmem:[%s8962_s3 + $0x180] ss:$12 sps:$4 sm:$0xff]  }
0x1773   :  { %v6493_v45 = vpop.eup %6492 }
0x1774   :  { %v4106_v30 = vmul.f32 %v6493_v45, %v4105_v42  ;;  %v6584_v42 = vld [vmem:[%s8962_s3 + $0x198] ss:$12 sps:$4 sm:$0xff]   ;;  %v6585_v45 = vld [vmem:[%s8962_s3 + $0x1a0] ss:$12 sps:$4 sm:$0xff]  }
0x1776   :  { %v8691_v49 = vadd.f32 %v4110_v43, %v4106_v30  ;;  %v6586_v43 = vld [vmem:[%s8962_s3 + $0x1b4] ss:$12 sps:$4 sm:$0xff]   ;;  %v6588_v30 = vld [vmem:[%s8962_s3 + $0x1b8] ss:$12 sps:$4 sm:$0xff]  }
0x1778   :  { %v4112_v16 = vpack.c.bf16 %v8691_v49, %v8691_v49  ;;  %v8698_v21 = vsel %vm186_vm6, %v8691_v49, %v4108_v39  ;;  %v6583_v39 = vld [vmem:[%s8962_s3 + $0x19c] ss:$12 sps:$4 sm:$0xff]  }
0x1779   :  { %v4489_v20 = vrot.slane %v8698_v21, 6  ;;  %v6590_v21 = vld [vmem:[%s8962_s3 + $0x1c8] ss:$12 sps:$4 sm:$0xff]  }
0x177a   :  { %v4114_v44 = vrot.slane %v4112_v16, 3  ;;  %v6589_v16 = vld [vmem:[%s8962_s3 + $0x1cc] ss:$12 sps:$4 sm:$0xff]  }
0x177c   :  { %4149 = vmatmul.mubr.bf16.vlgmr.msra.gmra.mrb[96].mxu1 %v4114_v44  ;;  %5946 = vmatmul.mubr.bf16.vlgmr.msra.gmra.mrb[100].mxu0 %v4114_v44  ;;  %v6591_v44 = vld [vmem:[%s8962_s3 + $0x1d0] ss:$12 sps:$4 sm:$0xff]  }
0x177d   :  { %4235 = vmatpush1.bf16.msra.mxu1 %v8266_v18  ;;  %5950 = vmatpush3.bf16.msra.mxu0 %v8271_v59  ;;  %v6580_v18 = vld [vmem:[%s8962_s3 + $0x184] ss:$12 sps:$4 sm:$0xff]  }
0x177e   :  { %4236 = vmatprep.subr.bf16.mxu1 %v8276_v34  ;;  %5951 = vmatprep.subr.bf16.mxu0 %v6632_v3 }
0x177f   :  { %4266 = vmatprep.mubr.bf16.mxu1 %v6631_v2  ;;  %5965 = vmatprep.mubr.msk.bf16.mxu0 %vm6633_vm0, %v6632_v3 }
0x1781   :  { %4237 = vmatpush1.bf16.msra.mxu1 %v8282_v40  ;;  %5952 = vmatpush3.bf16.msra.mxu0 %v8288_v6 }
0x1782   :  { %4238 = vmatprep.subr.bf16.mxu1 %v8294_v61  ;;  %5953 = vmatprep.subr.bf16.mxu0 %v6632_v3 }
0x1785   :  { %4239 = vmatpush1.bf16.msra.mxu1 %v8304_v47  ;;  %5954 = vmatpush3.bf16.msra.mxu0 %v8310_v19 }
0x1786   :  { %4240 = vmatprep.subr.bf16.mxu1 %v8316_v1  ;;  %5955 = vmatprep.subr.bf16.mxu0 %v6632_v3 }
0x1789   :  { %4241 = vmatpush1.bf16.msra.mxu1 %v8323_v24  ;;  %5956 = vmatpush3.bf16.msra.mxu0 %v8329_v57 }
0x178a   :  { %4242 = vmatprep.subr.bf16.mxu1 %v8335_v51  ;;  %5957 = vmatprep.subr.bf16.mxu0 %v6632_v3 }
0x178d   :  { %4243 = vmatpush1.bf16.msra.mxu1 %v8342_v60  ;;  %5958 = vmatpush3.bf16.msra.mxu0 %v8348_v4 }
0x178e   :  { %4244 = vmatprep.subr.bf16.mxu1 %v8354_v63  ;;  %5959 = vmatprep.subr.bf16.mxu0 %v6632_v3 }
0x1791   :  { %4245 = vmatpush1.bf16.msra.mxu1 %v8361_v50  ;;  %5960 = vmatpush3.bf16.msra.mxu0 %v8367_v5 }
0x1792   :  { %4246 = vmatprep.subr.bf16.mxu1 %v8373_v62  ;;  %5961 = vmatprep.subr.bf16.mxu0 %v6632_v3 }
0x1795   :  { %4247 = vmatpush1.bf16.msra.mxu1 %v8380_v52  ;;  %5962 = vmatpush3.bf16.msra.mxu0 %v8386_v13 }
0x1796   :  { %4248 = vmatprep.subr.bf16.mxu1 %v8392_v23  ;;  %5963 = vmatprep.subr.bf16.mxu0 %v6632_v3 }
0x1799   :  { %4249 = vmatpush1.bf16.msra.mxu1 %v8399_v31  ;;  %5964 = vmatpush3.bf16.msra.mxu0 %v8405_v0  ;;  %v4226_v0 = vrot.slane %v8691_v49, 2 }
0x179a   :  { %4352 = vmatprep.subr.bf16.mxu1 %v6580_v18  ;;  %5969 = vmatprep.subr.bf16.mxu0 %v6632_v3  ;;  %v6592_v18 = vld [vmem:[%s8962_s3 + $0x1e4] ss:$12 sps:$4 sm:$0xff]  }
0x184f   :  { %v4150_v59 = vpop.f32.mrb[96].mxu1  ;;  %v4211_v34 = vpop.f32.mrb[100].mxu0 }
0x1850   :  { %v4159_v40 = vrot.slane %v4150_v59, 4  ;;  %v4152_v6 = vpop.f32.mrb[97].mxu1  ;;  %v5947_v61 = vpop.f32.mrb[101].mxu0  ;;  %v4212_v13 = vadd.f32 %v8509_v11, %v4211_v34  ;;  %v6593_v59 = vld [vmem:[%s8962_s3 + $0x1e0] ss:$12 sps:$4 sm:$0xff]  }
0x1851   :  { %v4160_v47 = vrot.slane %v4152_v6, 4  ;;  %v4154_v19 = vpop.f32.mrb[98].mxu1  ;;  %v4214_v1 = vpop.f32.mrb[102].mxu0  ;;  %v6594_v34 = vld [vmem:[%s8962_s3 + $0x1e8] ss:$12 sps:$4 sm:$0xff]  }
0x1852   :  { %v4163_v24 = vadd.f32 %v4159_v40, %v8498_v55  ;;  %v4155_v57 = vpop.f32.mrb[99].mxu1  ;;  %v5948_v51 = vpop.f32.mrb[103].mxu0  ;;  %v4218_v23 = vrot.slane %v4212_v13, 4  ;;  %v6595_v40 = vld [vmem:[%s8962_s3 + $0x1fc] ss:$12 sps:$4 sm:$0xff]  }
0x1853   :  { %v4164_v60 = vadd.f32 %v4160_v47, %v8502_v7  ;;  %v6596_v6 = vld [vmem:[%s8962_s3 + $0x1f8] ss:$12 sps:$4 sm:$0xff]   ;;  %v6597_v61 = vld [vmem:[%s8962_s3 + $0x200] ss:$12 sps:$4 sm:$0xff]   ;;  %v6599_v19 = vld [vmem:[%s8962_s3 + $0x210] ss:$12 sps:$4 sm:$0xff]  }
0x1854   :  { %v5142_v4 = vmul.f32 -1.442695, %v4163_v24  ;;  %v6598_v47 = vld [vmem:[%s8962_s3 + $0x214] ss:$12 sps:$4 sm:$0xff]   ;;  %v6600_v1 = vld [vmem:[%s8962_s3 + $0x218] ss:$12 sps:$4 sm:$0xff]  }
0x1855   :  { %v5143_v63 = vmul.f32 -1.442695, %v4164_v60  ;;  %v6601_v24 = vld [vmem:[%s8962_s3 + $0x22c] ss:$12 sps:$4 sm:$0xff]   ;;  %v6602_v57 = vld [vmem:[%s8962_s3 + $0x228] ss:$12 sps:$4 sm:$0xff]  }
0x1856   :  { %6494 = vpow2.f32 %v5142_v4  ;;  %v6603_v51 = vld [vmem:[%s8962_s3 + $0x230] ss:$12 sps:$4 sm:$0xff]  }
0x1857   :  { %6496 = vpow2.f32 %v5143_v63 }
0x1860   :  { %v6495_v50 = vpop.eup %6494 }
0x1861   :  { %v6497_v5 = vpop.eup %6496  ;;  %v4171_v62 = vadd.f32 1.0, %v6495_v50 }
0x1862   :  { %v4172_v52 = vadd.f32 1.0, %v6497_v5 }
0x1863   :  { %6498 = vrcp.f32 %v4171_v62 }
0x1864   :  { %6500 = vrcp.f32 %v4172_v52 }
0x186d   :  { %v6499_v31 = vpop.eup %6498 }
0x186e   :  { %v6501_v36 = vpop.eup %6500  ;;  %v4220_v10 = vmul.f32 %v6499_v31, %v4218_v23 }
0x186f   :  { %v4228_v8 = vmul.f32 %v6501_v36, %v4226_v0  ;;  %v4223_v33 = vsub.f32 1.0, %v6501_v36 }
0x1870   :  { %v4221_v38 = vadd.f32 %v4220_v10, %v8486_v37 }
0x1872   :  { %6502 = vtanh.f32 %v4221_v38 }
0x187c   :  { %v6503_v26 = vpop.eup %6502 }
0x187d   :  { %v4224_v35 = vmul.f32 %v6503_v26, %v4223_v33 }
0x187f   :  { %v8742_v27 = vadd.f32 %v4228_v8, %v4224_v35 }
0x1881   :  { %v4230_v22 = vpack.c.bf16 %v8742_v27, %v8742_v27  ;;  %v4471_v53 = vsel %vm186_vm6, %v8742_v27, %v4469_v9 }
0x1882   :  { %v4492_v56 = vrot.slane %v4471_v53, 2 }
0x1883   :  { %v4232_v46 = vrot.slane %v4230_v22, 2 }
0x1884   :  { %v8752_v41 = vsel %vm1617_vm7, %v4489_v20, %v4492_v56 }
0x1885   :  { %4267 = vmatmul.mubr.bf16.vlgmr.msra.gmra.mrb[100].mxu1 %v4232_v46  ;;  %5966 = vmatmul.mubr.bf16.vlgmr.msra.gmra.mrb[104].mxu0 %v4232_v46 }
0x1886   :  { %4353 = vmatpush1.bf16.msra.mxu1 %v6581_v14  ;;  %5970 = vmatpush3.bf16.msra.mxu0 %v6582_v32 }
0x1887   :  { %4354 = vmatprep.subr.bf16.mxu1 %v6583_v39  ;;  %5971 = vmatprep.subr.bf16.mxu0 %v6632_v3 }
0x1888   :  { %4384 = vmatprep.mubr.bf16.mxu1 %v6631_v2  ;;  %5985 = vmatprep.mubr.msk.bf16.mxu0 %vm6633_vm0, %v6632_v3  ;;  %v6587_v2 = vld [vmem:[%s8962_s3 + $0x1b0] ss:$12 sps:$4 sm:$0xff]  }
0x188a   :  { %4355 = vmatpush1.bf16.msra.mxu1 %v6584_v42  ;;  %5972 = vmatpush3.bf16.msra.mxu0 %v6585_v45 }
0x188b   :  { %4356 = vmatprep.subr.bf16.mxu1 %v6586_v43  ;;  %5973 = vmatprep.subr.bf16.mxu0 %v6632_v3 }
0x188e   :  { %4357 = vmatpush1.bf16.msra.mxu1 %v6587_v2  ;;  %5974 = vmatpush3.bf16.msra.mxu0 %v6588_v30  ;;  %v4512_v30 = vld [vmem:[%s8965_s6] sm:$0xff] }
0x188f   :  { %4358 = vmatprep.subr.bf16.mxu1 %v6589_v16  ;;  %5975 = vmatprep.subr.bf16.mxu0 %v6632_v3  ;;  %v4513_v16 = vld [vmem:[%s8965_s6 + $0x8] sm:$0xff] }
0x1892   :  { %4359 = vmatpush1.bf16.msra.mxu1 %v6590_v21  ;;  %5976 = vmatpush3.bf16.msra.mxu0 %v6591_v44  ;;  %v4515_v21 = vld [vmem:[%s8965_s6 + $0x18] sm:$0xff] }
0x1893   :  { %4360 = vmatprep.subr.bf16.mxu1 %v6592_v18  ;;  %5977 = vmatprep.subr.bf16.mxu0 %v6632_v3  ;;  %v4516_v18 = vld [vmem:[%s8965_s6 + $0x20] sm:$0xff] }
0x1896   :  { %4361 = vmatpush1.bf16.msra.mxu1 %v6593_v59  ;;  %5978 = vmatpush3.bf16.msra.mxu0 %v6594_v34  ;;  %v4517_v59 = vld [vmem:[%s8965_s6 + $0x28] sm:$0xff] }
0x1897   :  { %4362 = vmatprep.subr.bf16.mxu1 %v6595_v40  ;;  %5979 = vmatprep.subr.bf16.mxu0 %v6632_v3  ;;  %v6046_v34 = vpack.c.bf16 %v4517_v59, %v4516_v18  ;;  %v4518_v40 = vld [vmem:[%s8965_s6 + $0x30] sm:$0xff] }
0x189a   :  { %4363 = vmatpush1.bf16.msra.mxu1 %v6596_v6  ;;  %5980 = vmatpush3.bf16.msra.mxu0 %v6597_v61  ;;  %v4519_v6 = vld [vmem:[%s8965_s6 + $0x38] sm:$0xff] }
0x189b   :  { %4364 = vmatprep.subr.bf16.mxu1 %v6598_v47  ;;  %5981 = vmatprep.subr.bf16.mxu0 %v6632_v3  ;;  %v6050_v61 = vpack.c.bf16 %v4519_v6, %v4518_v40  ;;  %v4520_v47 = vld [vmem:[%s8965_s6 + $0x40] sm:$0xff] }
0x189e   :  { %4365 = vmatpush1.bf16.msra.mxu1 %v6599_v19  ;;  %5982 = vmatpush3.bf16.msra.mxu0 %v6600_v1  ;;  %v4521_v19 = vld [vmem:[%s8965_s6 + $0x48] sm:$0xff] }
0x189f   :  { %4366 = vmatprep.subr.bf16.mxu1 %v6601_v24  ;;  %5983 = vmatprep.subr.bf16.mxu0 %v6632_v3  ;;  %v6054_v1 = vpack.c.bf16 %v4521_v19, %v4520_v47  ;;  %v4522_v24 = vld [vmem:[%s8965_s6 + $0x50] sm:$0xff]  ;;  %v5150_v47 = vld [vmem:[#allocation2] ss:$0 sm:$0xff] }
0x18a2   :  { %4367 = vmatpush1.bf16.msra.mxu1 %v6602_v57  ;;  %5984 = vmatpush3.bf16.msra.mxu0 %v6603_v51  ;;  %v4523_v57 = vld [vmem:[%s8965_s6 + $0x58] sm:$0xff] }
0x18a3   :  { %v6058_v51 = vpack.c.bf16 %v4523_v57, %v4522_v24  ;;  %6073 = vmatprep.subr.bf16.mxu0 %v6635_v29 }
0x1958   :  { %v4268_v60 = vpop.f32.mrb[100].mxu1  ;;  %v4329_v4 = vpop.f32.mrb[104].mxu0 }
0x1959   :  { %v4277_v63 = vrot.slane %v4268_v60, 6  ;;  %v4270_v50 = vpop.f32.mrb[101].mxu1  ;;  %v5967_v5 = vpop.f32.mrb[105].mxu0  ;;  %v4330_v35 = vadd.f32 %v8509_v11, %v4329_v4  ;;  %v4524_v60 = vld [vmem:[%s8965_s6 + $0x60] sm:$0xff]  ;;  %v4525_v4 = vld [vmem:[%s8965_s6 + $0x68] sm:$0xff] }
0x195a   :  { %v4278_v62 = vrot.slane %v4270_v50, 6  ;;  %v4272_v52 = vpop.f32.mrb[102].mxu1  ;;  %v4332_v13 = vpop.f32.mrb[106].mxu0  ;;  %v4526_v50 = vld [vmem:[%s8965_s6 + $0x70] sm:$0xff]  ;;  %v4527_v5 = vld [vmem:[%s8965_s6 + $0x78] sm:$0xff] }
0x195b   :  { %v4281_v23 = vadd.f32 %v4277_v63, %v8490_v48  ;;  %v4273_v31 = vpop.f32.mrb[103].mxu1  ;;  %v5968_v0 = vpop.f32.mrb[107].mxu0  ;;  %v4336_v22 = vrot.slane %v4330_v35, 6  ;;  %v6062_v63 = vpack.c.bf16 %v4525_v4, %v4524_v60 }
0x195c   :  { %v4282_v10 = vadd.f32 %v4278_v62, %v8494_v15  ;;  %v4344_v15 = vrot.slane %v8742_v27, 2  ;;  %v6066_v62 = vpack.c.bf16 %v4527_v5, %v4526_v50 }
0x195d   :  { %v5144_v36 = vmul.f32 -1.442695, %v4281_v23 }
0x195e   :  { %v5145_v8 = vmul.f32 -1.442695, %v4282_v10 }
0x195f   :  { %6504 = vpow2.f32 %v5144_v36 }
0x1960   :  { %6506 = vpow2.f32 %v5145_v8 }
0x1969   :  { %v6505_v38 = vpop.eup %6504 }
0x196a   :  { %v4289_v33 = vadd.f32 1.0, %v6505_v38  ;;  %v6507_v26 = vpop.eup %6506 }
0x196b   :  { %v4290_v9 = vadd.f32 1.0, %v6507_v26 }
0x196c   :  { %6508 = vrcp.f32 %v4289_v33 }
0x196d   :  { %6510 = vrcp.f32 %v4290_v9 }
0x1976   :  { %v6509_v53 = vpop.eup %6508 }
0x1977   :  { %v4338_v20 = vmul.f32 %v6509_v53, %v4336_v22  ;;  %v6511_v56 = vpop.eup %6510 }
0x1978   :  { %v4341_v46 = vsub.f32 1.0, %v6511_v56  ;;  %v4346_v32 = vmul.f32 %v6511_v56, %v4344_v15 }
0x1979   :  { %v4339_v48 = vadd.f32 %v4338_v20, %v8478_v12 }
0x197b   :  { %6512 = vtanh.f32 %v4339_v48 }
0x1985   :  { %v6513_v14 = vpop.eup %6512 }
0x1986   :  { %v4342_v39 = vmul.f32 %v6513_v14, %v4341_v46 }
0x1988   :  { %v8840_v42 = vadd.f32 %v4346_v32, %v4342_v39 }
0x198a   :  { %v4348_v11 = vpack.c.bf16 %v8840_v42, %v8840_v42  ;;  %v4472_v12 = vsel %vm186_vm6, %v8840_v42, %v3884_v58  ;;  %v6038_v58 = vpack.c.bf16 %v4513_v16, %v4512_v30  ;;  %v4453_v56 = vrot.slane %v8840_v42, 2 }
0x198b   :  { %v4495_v45 = vrot.slane %v4472_v12, 6  ;;  %v4465_v16 = vrot.slane %v8691_v49, 6 }
0x198c   :  { %v4350_v43 = vrot.slane %v4348_v11, 1  ;;  %6039 = vmatprep.subr.bf16.mxu1 %v6038_v58 }
0x198d   :  { %v8851_v2 = vsel %vm1619_vm8, %v8752_v41, %v4495_v45  ;;  %v4514_v41 = vld [vmem:[%s8965_s6 + $0x10] sm:$0xff]  ;;  %v4467_v18 = vsel %vm186_vm6, %v8647_v28, %v4465_v16  ;;  %v6606_v28 = vld [vmem:[%s8959_s0] sm:$0xff] }
0x198e   :  { %4385 = vmatmul.mubr.bf16.vlgmr.msra.gmra.mrb[104].mxu1 %v4350_v43  ;;  %5986 = vmatmul.mubr.bf16.vlgmr.msra.gmra.mrb[108].mxu0 %v4350_v43  ;;  %v6042_v44 = vpack.c.bf16 %v4515_v21, %v4514_v41  ;;  %v4461_v43 = vrot.slane %v8840_v42, 6  ;;  %v4486_v27 = vrot.slane %v4467_v18, 2  ;;  %vm4506_vm11 = vcmp.eq.s32.totalorder %v6606_v28, 1 }
0x198f   :  { %6035 = vmatprep.mubr.msk.f32.mxu0 %vm6633_vm0, %v6632_v3  ;;  %6041 = vmatpush3.bf16.msra.mxu1 %v6038_v58  ;;  %v4473_v58 = vrot.slane %v8513_v17, 6 }
0x1990   :  { %6043 = vmatprep.subr.bf16.mxu1 %v6042_v44  ;;  %v4463_v21 = vsel %vm186_vm6, %v8557_v25, %v4461_v43 }
0x1991   :  { %v4480_v25 = vrot.slane %v4463_v21, 2 }
0x1993   :  { %6045 = vmatpush3.bf16.msra.mxu1 %v6042_v44 }
0x1994   :  { %6047 = vmatprep.subr.bf16.mxu1 %v6046_v34 }
0x1997   :  { %6049 = vmatpush3.bf16.msra.mxu1 %v6046_v34 }
0x1998   :  { %6051 = vmatprep.subr.bf16.mxu1 %v6050_v61 }
0x199b   :  { %6053 = vmatpush3.bf16.msra.mxu1 %v6050_v61  ;;  %v5148_v61 = vsel %vm4506_vm11, 1.0, %v6632_v3 }
0x199c   :  { %6055 = vmatprep.subr.bf16.mxu1 %v6054_v1 }
0x199f   :  { %6057 = vmatpush3.bf16.msra.mxu1 %v6054_v1  ;;  %v4610_v1 = vmul.f32 1e+10, %v5148_v61 }
0x19a0   :  { %6059 = vmatprep.subr.bf16.mxu1 %v6058_v51 }
0x19a3   :  { %6061 = vmatpush3.bf16.msra.mxu1 %v6058_v51 }
0x19a4   :  { %6063 = vmatprep.subr.bf16.mxu1 %v6062_v63 }
0x19a7   :  { %6065 = vmatpush3.bf16.msra.mxu1 %v6062_v63 }
0x19a8   :  { %6067 = vmatprep.subr.bf16.mxu1 %v6066_v62 }
0x19ab   :  { %6069 = vmatpush3.bf16.msra.mxu1 %v6066_v62 }
0x19ac   :  { %6070 = vmatprep.subr.bf16.mxu1 %v6635_v29 }
0x1a61   :  { %v4386_v52 = vpop.f32.mrb[104].mxu1  ;;  %v4441_v13 = vpop.f32.mrb[108].mxu0 }
0x1a62   :  { %v4393_v23 = vadd.f32 %v4386_v52, %v8498_v55  ;;  %v4388_v31 = vpop.f32.mrb[105].mxu1  ;;  %v5987_v0 = vpop.f32.mrb[109].mxu0  ;;  %v6604_v55 = vld [vmem:[%s8964_s5 + $0x2] ss:$0 sm:$0xff] }
0x1a63   :  { %v4394_v36 = vadd.f32 %v4388_v31, %v8502_v7  ;;  %v4390_v10 = vpop.f32.mrb[106].mxu1  ;;  %v4444_v8 = vpop.f32.mrb[110].mxu0  ;;  %v4442_v48 = vadd.f32 %v6604_v55, %v4441_v13 }
0x1a64   :  { %v5146_v38 = vmul.f32 -1.442695, %v4393_v23  ;;  %v4391_v33 = vpop.f32.mrb[107].mxu1  ;;  %v5988_v26 = vpop.f32.mrb[111].mxu0 }
0x1a65   :  { %v5147_v35 = vmul.f32 -1.442695, %v4394_v36 }
0x1a66   :  { %6514 = vpow2.f32 %v5146_v38 }
0x1a67   :  { %6516 = vpow2.f32 %v5147_v35 }
0x1a70   :  { %v6515_v9 = vpop.eup %6514 }
0x1a71   :  { %v6517_v22 = vpop.eup %6516  ;;  %v4401_v53 = vadd.f32 1.0, %v6515_v9  ;;  %v4642_v9 = vld [vmem:[%s8967_s8] sm:$0x3]  ;;  %s6607_s8 = scalar_lea.vmem %s4802_s22, 32 }
0x1a72   :  { %v4402_v20 = vadd.f32 1.0, %v6517_v22  ;;  %p6608_p0 = scmp.ne.s32.totalorder %s4802_s22, %s6607_s8  ;;  %p6613_p2 = scmp.lt.s32.totalorder %s6607_s8, %s6607_s8 }
0x1a73   :  { %6518 = vrcp.f32 %v4401_v53 }
0x1a74   :  { %6520 = vrcp.f32 %v4402_v20  ;;  %p6614_p3 = por %p6613_p2, %p6612_p1 }
0x1a76   :  { %p6615_p4 = pnand %p6614_p3, %p6608_p0 }
0x1a7d   :  { %v6519_v7 = vpop.eup %6518 }
0x1a7e   :  { %v6521_v46 = vpop.eup %6520  ;;  %v4447_v14 = vmul.f32 %v6519_v7, %v4442_v48 }
0x1a7f   :  { %v4455_v32 = vmul.f32 %v6521_v46, %v4453_v56  ;;  %v4450_v11 = vsub.f32 1.0, %v6521_v46 }
0x1a80   :  { %v4448_v39 = vadd.f32 %v4447_v14, %v8486_v37  ;;  %v4464_v37 = vsel %vm186_vm6, %v8603_v54, %v4344_v15 }
0x1a81   :  { %v4483_v40 = vrot.slane %v4464_v37, 6 }
0x1a82   :  { %6522 = vtanh.f32 %v4448_v39 }
0x1a8c   :  { %v6523_v12 = vpop.eup %6522 }
0x1a8d   :  { %v4451_v45 = vmul.f32 %v6523_v12, %v4450_v11 }
0x1a8f   :  { %v4456_v30 = vadd.f32 %v4455_v32, %v4451_v45 }
0x1a91   :  { %v4458_v41 = vrot.slane %v4456_v30, 2  ;;  %v4475_v44 = vsel %vm186_vm6, %v4456_v30, %v4473_v58 }
0x1a92   :  { %v4498_v42 = vrot.slane %v4475_v44, 2 }
0x1a93   :  { %v4460_v49 = vsel %vm186_vm6, %v8513_v17, %v4458_v41  ;;  %v6605_v17 = vld [vmem:[%s8959_s0 + $0x8] sm:$0xff] }
0x1a94   :  { %v4477_v59 = vrot.slane %v4460_v49, 6  ;;  %v4505_v34 = vsel %vm1621_vm9, %v8851_v2, %v4498_v42  ;;  %vm4507_vm10 = vcmp.eq.s32.totalorder %v6605_v17, 1 }
0x1a95   :  { %v5149_v2 = vsel %vm4507_vm10, 1.0, %v6632_v3 }
0x1a96   :  { %v4500_v6 = vsel %vm1617_vm7, %v4477_v59, %v4480_v25  ;;  %v4611_v19 = vmul.f32 1e+10, %v5149_v2 }
0x1a97   :  { %v4501_v54 = vsel %vm1619_vm8, %v4500_v6, %v4483_v40 }
0x1a98   :  { %v4502_v15 = vsel %vm1621_vm9, %v4501_v54, %v4486_v27 }
0x1a99   :  { %6021 = vmatprep.mubr.f32.mxu1 %v4502_v15 }
0x1a9a   :  { %6022 = vmatmul.mubr.f32.vlgmr.msra.gmra.mrb[108].mxu1 %v4505_v34 }
0x1a9b   :  { %6028 = vmatprep.mubr.msk.f32.mxu1 %vm6633_vm0, %v6632_v3 }
0x1b6d   :  { %v6023_v24 = vpop.f32.mrb[108].mxu1 }
0x1b6e   :  { %v4607_v57 = vadd.f32 %v6023_v24, %v5150_v47  ;;  %v4601_v51 = vpop.f32.mrb[109].mxu1 }
0x1b6f   :  { %v4602_v60 = vadd.f32 %v5150_v47, %v4601_v51 }
0x1b70   :  { %v4613_v4 = vsub.f32 %v4607_v57, %v4611_v19 }
0x1b71   :  { %v4612_v63 = vsub.f32 %v4602_v60, %v4610_v1 }
0x1b72   :  { %v4616_v50 = vsel %vm4614_vm12, %v4613_v4, -inf }
0x1b73   :  { %v4615_v5 = vsel %vm4614_vm12, %v4612_v63, -inf }
0x1b74   :  { %v4617_v62 = vmax.f32 %v4615_v5, %v4616_v50 }
0x1b76   :  { %v4618_v52 = vrot.slane %v4617_v62, 4 }
0x1b78   :  { %v4619_v13 = vmax.f32 %v4617_v62, %v4618_v52 }
0x1b7a   :  { %v4620_v23 = vrot.slane %v4619_v13, 2 }
0x1b7c   :  { %v4621_v31 = vmax.f32 %v4619_v13, %v4620_v23 }
0x1b7e   :  { %v4622_v0 = vrot.slane %v4621_v31, 1 }
0x1b80   :  { %v4623_v36 = vmax.f32 %v4621_v31, %v4622_v0 }
0x1b82   :  { %v4624_v3 = vsub.f32 %v4612_v63, %v4623_v36  ;;  %v4625_v10 = vsub.f32 %v4613_v4, %v4623_v36 }
0x1b84   :  { %v4626_v8 = vmul.f32 1.442695, %v4624_v3  ;;  %v4628_v38 = vmul.f32 1.442695, %v4625_v10 }
0x1b86   :  { %6524 = vpow2.f32 %v4626_v8 }
0x1b87   :  { %6526 = vpow2.f32 %v4628_v38 }
0x1b90   :  { %v6525_v33 = vpop.eup %6524 }
0x1b91   :  { %v6527_v26 = vpop.eup %6526  ;;  %4632 = vperm.xlu1 %6083, %v6525_v33  }
0x1b92   :  { %v6071_v35 = vpack.c.bf16 %v6527_v26, %v6525_v33 }
0x1b94   :  { %6072 = vmatpush3.bf16.msra.mxu1 %v6071_v35 }
0x1b95   :  { %4637 = vperm.xlu1 %6083, %v6527_v26  }
0x1b97   :  { %6029 = vmatmul.mubr.msk.f32.vlgmr.msra.gmra.mrb[110].mxu1 %vm4643_vm13, %v4642_v9 }
0x1c10   :  { %v4633_v22 = vpop.permute.xlu1 %4632 }
0x1c11   :  { %v4640_v20 = vmul.f32 %v4633_v22, %v4502_v15 }
0x1c14   :  { %v4638_v53 = vpop.permute.xlu1 %4637 }
0x1c15   :  { %v4641_v55 = vmul.f32 %v4638_v53, %v4505_v34 }
0x1c17   :  { %v6074_v48 = vpack.c.bf16 %v4641_v55, %v4640_v20 }
0x1c19   :  { %6075 = vmatpush3.bf16.msra.mxu0 %v6074_v48 }
0x1c1c   :  { %6036 = vmatmul.mubr.msk.f32.vlgmr.msra.gmra.mrb[112].mxu0 %vm4643_vm13, %v4642_v9 }
0x1c6a   :  { %v4713_v7 = vpop.f32.mrb[110].mxu1 }
0x1c6b   :  { %6528 = vrcp.f32 %v4713_v7  ;;  %v6030_v56 = vpop.f32.mrb[111].mxu1 }
0x1c75   :  { %v6529_v46 = vpop.eup %6528 }
0x1c76   :  { %4790 = vperm.xlu0 %6082, %v6529_v46  }
0x1cef   :  { %v4783_v14 = vpop.f32.mrb[112].mxu0 }
0x1cf0   :  { %v6037_v32 = vpop.f32.mrb[113].mxu0 }
0x1cf5   :  { %v4791_v39 = vpop.permute.xlu0 %4790 }
0x1cf6   :  { %v4793_v11 = vmul.f32 %v4791_v39, %v4783_v14 }
0x1cf8   :  { %4794 = vst [vmem:[#allocation3] sm:$0x3] %v4793_v11 }
0x1cf9   :  { %6618 = shalt.err (!%p6615_p4)
}
0x1cfa   :  { %s6619_s25 = scalar_lea.hbm %s8968_s9, 32 }
0x1cfb   :  { %p6620_p5 = scmp.ne.s32.totalorder %s8968_s9, %s6619_s25  ;;  %p6623_p6 = scmp.lt.u32.totalorder %s6619_s25, %s8968_s9 }
0x1cfd   :  { %p6625_p7 = pnand %p6623_p6, %p6620_p5 }
0x1cff   :  { %6628 = shalt.err (!%p6625_p7)
}
0x1d00   :  { %4804 = dma.vmem_to_hbm [thread:$0]  %s4802_s22, 32, %s8968_s9, [#allocation4]  }
0x1d01   :  { %6629 = dma.done.wait [#allocation4], 32  }
0x1d02   :  { %6630 = vsyncadd [#allocation4], 4294967264 }
0x1d03   :  { %4808 = vsyncpa [#allocation4], 1 }

</bundles_post_ra>
